<compile_context>
chip_gen: v6e
topology: v6e:2x2x1
jax: 0.10.0
libtpu: 0.0.40
codegen_flags: <defaults>
</compile_context>

<pallas_src>
import jax
import jax.numpy as jnp
from jax.experimental import pallas as pl
from jax.experimental.pallas import tpu as pltpu


LATENT = 2
D_IN = 784            # 28 * 28
D_PAD = 896           # 7 * 128 -- lane-dense padding of 784
LAT_PAD = 128         # fused (mn | sd) projection padded to one lane tile


def _round_up(x, m):
    return (x + m - 1) // m * m


def vae_kernel(x_ref, eps_ref, w2_ref, b2_ref, w34_ref, b34_ref,
               w5_ref, b5_ref, w7_ref, b7_ref, xrec_ref, msd_ref):
    # ---- encoder -----------------------------------------------------------
    # fc2: bf16 MXU matmul, f32 accumulate. Dropout == identity (eval mode).
    h = jnp.dot(x_ref[...], w2_ref[...], preferred_element_type=jnp.float32)
    h = jnp.maximum(h + b2_ref[...], 0.0)                  # relu, f32 on VPU

    # Fused fc3|fc4: single [896, 128] projection. mn -> lanes 0:2, sd -> 2:4.
    msd = jnp.dot(h, w34_ref[...], preferred_element_type=jnp.float32)
    msd = msd + b34_ref[...]
    msd_ref[...] = msd                                     # packed (mn|sd) out

    mn = msd[:, 0:LATENT]                                  # [TB, 2]
    sd = msd[:, LATENT:2 * LATENT]                         # [TB, 2]
    eps = eps_ref[...][:, 0:LATENT]                        # [TB, 2]
    z = mn + jnp.exp(sd) * eps                             # reparameterization

    # ---- decoder -----------------------------------------------------------
    # fc5 (K=2) as VPU broadcast-FMAs -- avoids a degenerate MXU round-trip.
    w5 = w5_ref[...]                                       # [8, 896] (rows 0:2 used)
    d = (z[:, 0:1] * w5[0:1, :]
         + z[:, 1:2] * w5[1:2, :]
         + b5_ref[...])
    d = jnp.maximum(d, 0.0)                                # relu(fc5(z)), f32

    # fc7 + sigmoid: bf16 MXU matmul, f32 accumulate / activation.
    logits = jnp.dot(d.astype(w7_ref.dtype), w7_ref[...],
                     preferred_element_type=jnp.float32)
    xrec_ref[...] = jax.nn.sigmoid(logits + b7_ref[...])


def init_linear(key, in_features, out_features):
    """PyTorch-style init U(-1/sqrt(fan_in), 1/sqrt(fan_in)).

    Weight is returned already transposed to [in_features, out_features] so
    the kernel computes y = x @ W + b; bias is 1-D [out_features].
    """
    k_w, k_b = jax.random.split(key)
    bound = 1.0 / float(in_features) ** 0.5
    w = jax.random.uniform(k_w, (in_features, out_features), jnp.float32,
                           minval=-bound, maxval=bound)
    b = jax.random.uniform(k_b, (out_features,), jnp.float32,
                           minval=-bound, maxval=bound)
    return w, b


def pack_params(params):
    """Pad params to lane-dense shapes, fuse fc3|fc4, cast big weights to bf16."""
    (w2, b2), (w3, b3), (w4, b4), (w5, b5), (w7, b7) = params

    w2p = jnp.zeros((D_PAD, D_PAD), jnp.bfloat16).at[:D_IN, :D_IN].set(
        w2.astype(jnp.bfloat16))
    b2p = jnp.zeros((1, D_PAD), jnp.float32).at[0, :D_IN].set(b2)

    w34p = (jnp.zeros((D_PAD, LAT_PAD), jnp.float32)
            .at[:D_IN, 0:LATENT].set(w3)
            .at[:D_IN, LATENT:2 * LATENT].set(w4))
    b34p = (jnp.zeros((1, LAT_PAD), jnp.float32)
            .at[0, 0:LATENT].set(b3)
            .at[0, LATENT:2 * LATENT].set(b4))

    w5p = jnp.zeros((8, D_PAD), jnp.float32).at[:LATENT, :D_IN].set(w5)
    b5p = jnp.zeros((1, D_PAD), jnp.float32).at[0, :D_IN].set(b5)

    w7p = jnp.zeros((D_PAD, D_PAD), jnp.bfloat16).at[:D_IN, :D_IN].set(
        w7.astype(jnp.bfloat16))
    b7p = jnp.zeros((1, D_PAD), jnp.float32).at[0, :D_IN].set(b7)

    return w2p, b2p, w34p, b34p, w5p, b5p, w7p, b7p


@jax.jit
def mnist_vae_forward(x_nchw, packed, eps):
    """x_nchw: [B, 1, 28, 28] float32. Returns (x_recon [B,1,28,28], mn, sd)."""
    B = x_nchw.shape[0]
    x_flat = x_nchw.reshape(B, D_IN)

    # Batch tile: fill the MXU M dimension (256 on v6e/v7x) for big batches;
    # pad tiny batches up to the 8-sublane granule.
    if B >= 256:
        TB = 256
    elif B >= 128:
        TB = 128
    else:
        TB = _round_up(B, 8)
    B_pad = _round_up(B, TB)
    grid = (B_pad // TB,)

    x_pad = (jnp.zeros((B_pad, D_PAD), jnp.bfloat16)
             .at[:B, :D_IN].set(x_flat.astype(jnp.bfloat16)))
    eps_pad = (jnp.zeros((B_pad, LAT_PAD), jnp.float32)
               .at[:B, :LATENT].set(eps.astype(jnp.float32)))

    w2p, b2p, w34p, b34p, w5p, b5p, w7p, b7p = packed

    def batch_spec(shape):
        return pl.BlockSpec(shape, lambda i: (i, 0))

    def const_spec(shape):
        return pl.BlockSpec(shape, lambda i: (0, 0))

    # Advisory cost hint for the XLA scheduler (2 big matmuls + fused fc3|fc4
    # + fc5 FMAs per padded row; exp + sigmoid transcendentals).
    flops = B_pad * 2 * (D_PAD * D_PAD * 2 + D_PAD * LAT_PAD + LATENT * D_PAD)
    transcendentals = B_pad * (LATENT + D_PAD)
    bytes_accessed = (
        x_pad.size * 2 + eps_pad.size * 4
        + w2p.size * 2 + w7p.size * 2 + w34p.size * 4
        + (w5p.size + b2p.size + b5p.size + b7p.size + b34p.size) * 4
        + B_pad * D_PAD * 4 + B_pad * LAT_PAD * 4)
    cost = pl.CostEstimate(flops=flops, transcendentals=transcendentals,
                           bytes_accessed=bytes_accessed)

    xrec_pad, msd_pad = pl.pallas_call(
        vae_kernel,
        grid=grid,
        in_specs=[
            batch_spec((TB, D_PAD)),           # x tile (bf16)
            batch_spec((TB, LAT_PAD)),         # eps tile (lane-padded)
            const_spec((D_PAD, D_PAD)),        # w2 (bf16, VMEM-resident)
            const_spec((1, D_PAD)),            # b2
            const_spec((D_PAD, LAT_PAD)),      # fused fc3|fc4 weight
            const_spec((1, LAT_PAD)),          # fused fc3|fc4 bias
            const_spec((8, D_PAD)),            # w5 (rows 0:2 used)
            const_spec((1, D_PAD)),            # b5
            const_spec((D_PAD, D_PAD)),        # w7 (bf16, VMEM-resident)
            const_spec((1, D_PAD)),            # b7
        ],
        out_specs=(
            batch_spec((TB, D_PAD)),           # x_recon (lane-dense 896)
            batch_spec((TB, LAT_PAD)),         # packed mn|sd
        ),
        out_shape=(
            jax.ShapeDtypeStruct((B_pad, D_PAD), jnp.float32),
            jax.ShapeDtypeStruct((B_pad, LAT_PAD), jnp.float32),
        ),
        compiler_params=pltpu.CompilerParams(
            dimension_semantics=("parallel",),
            vmem_limit_bytes=32 * 1024 * 1024,
        ),
        cost_estimate=cost,
    )(x_pad, eps_pad, w2p, b2p, w34p, b34p, w5p, b5p, w7p, b7p)

    x_recon = xrec_pad[:B, :D_IN].reshape(B, 1, 28, 28)
    mn = msd_pad[:B, 0:LATENT]
    sd = msd_pad[:B, LATENT:2 * LATENT]
    return x_recon, mn, sd


def vae_reference(x_nchw, params, eps):
    """Pure-JAX f32 reference of the same (eval-mode) forward pass."""
    (w2, b2), (w3, b3), (w4, b4), (w5, b5), (w7, b7) = params
    x = x_nchw.reshape(-1, D_IN)
    h = jax.nn.relu(x @ w2 + b2)
    mn = h @ w3 + b3
    sd = h @ w4 + b4
    z = mn + jnp.exp(sd) * eps
    d = jax.nn.relu(z @ w5 + b5)
    xr = jax.nn.sigmoid(d @ w7 + b7)
    return xr.reshape(-1, 1, 28, 28), mn, sd


if __name__ == "__main__":
    key = jax.random.PRNGKey(0)
    k_x, k_eps, k2, k3, k4, k5, k7 = jax.random.split(key, 7)

    B = 4
    x = jax.random.uniform(k_x, (B, 1, 28, 28), jnp.float32)   # NCHW input
    eps = jax.random.normal(k_eps, (B, LATENT), jnp.float32)   # reparam noise

    # Only fc2, fc3, fc4, fc5, fc7 participate in forward (fc1/fc6 unused).
    params = (
        init_linear(k2, D_IN, D_IN),     # fc2: 784 -> 784
        init_linear(k3, D_IN, LATENT),   # fc3: 784 -> 2
        init_linear(k4, D_IN, LATENT),   # fc4: 784 -> 2
        init_linear(k5, LATENT, D_IN),   # fc5: 2   -> 784
        init_linear(k7, D_IN, D_IN),     # fc7: 784 -> 784
    )
    packed = pack_params(params)

    x_recon, mn, sd = mnist_vae_forward(x, packed, eps)
    jax.block_until_ready((x_recon, mn, sd))

    assert x_recon.shape == (B, 1, 28, 28)
    assert mn.shape == (B, LATENT)
    assert sd.shape == (B, LATENT)
    assert bool(jnp.isfinite(x_recon).all())
    assert bool(jnp.isfinite(mn).all()) and bool(jnp.isfinite(sd).all())

    # Correctness vs. pure-JAX f32 reference (loose tol: fc2/fc7 run in bf16).
    xr_ref, mn_ref, sd_ref = vae_reference(x, params, eps)
    assert bool(jnp.allclose(x_recon, xr_ref, atol=2e-2, rtol=2e-2))
    assert bool(jnp.allclose(mn, mn_ref, atol=2e-2, rtol=2e-2))
    assert bool(jnp.allclose(sd, sd_ref, atol=2e-2, rtol=2e-2))

    print("KERNEL_OK")
</pallas_src>

<mosaic_0001>
module attributes {stable_mosaic.version = 11 : i64} {
  func.func @vae_kernel(%arg0: i32, %arg1: memref<8x896xbf16, #tpu.memory_space<vmem>>, %arg2: memref<8x128xf32, #tpu.memory_space<vmem>>, %arg3: memref<896x896xbf16, #tpu.memory_space<vmem>>, %arg4: memref<1x896xf32, #tpu.memory_space<vmem>>, %arg5: memref<896x128xf32, #tpu.memory_space<vmem>>, %arg6: memref<1x128xf32, #tpu.memory_space<vmem>>, %arg7: memref<8x896xf32, #tpu.memory_space<vmem>>, %arg8: memref<1x896xf32, #tpu.memory_space<vmem>>, %arg9: memref<896x896xbf16, #tpu.memory_space<vmem>>, %arg10: memref<1x896xf32, #tpu.memory_space<vmem>>, %arg11: memref<8x896xf32, #tpu.memory_space<vmem>>, %arg12: memref<8x128xf32, #tpu.memory_space<vmem>>) attributes {dimension_semantics = [#tpu.dimension_semantics<parallel>], iteration_bounds = array<i64: 1>, scalar_prefetch = 0 : i64, scratch_operands = 0 : i64, tpu.core_type = #tpu.core_type<tc>, window_params = [{transform_indices = @transform_0, window_bounds = array<i64: 8, 896>}, {transform_indices = @transform_1, window_bounds = array<i64: 8, 128>}, {pipeline_mode = #tpu.pipeline_mode<synchronous>, transform_indices = @transform_2, window_bounds = array<i64: 896, 896>}, {pipeline_mode = #tpu.pipeline_mode<synchronous>, transform_indices = @transform_3, window_bounds = array<i64: 1, 896>}, {pipeline_mode = #tpu.pipeline_mode<synchronous>, transform_indices = @transform_4, window_bounds = array<i64: 896, 128>}, {pipeline_mode = #tpu.pipeline_mode<synchronous>, transform_indices = @transform_5, window_bounds = array<i64: 1, 128>}, {pipeline_mode = #tpu.pipeline_mode<synchronous>, transform_indices = @transform_6, window_bounds = array<i64: 8, 896>}, {pipeline_mode = #tpu.pipeline_mode<synchronous>, transform_indices = @transform_7, window_bounds = array<i64: 1, 896>}, {pipeline_mode = #tpu.pipeline_mode<synchronous>, transform_indices = @transform_8, window_bounds = array<i64: 896, 896>}, {pipeline_mode = #tpu.pipeline_mode<synchronous>, transform_indices = @transform_9, window_bounds = array<i64: 1, 896>}, {transform_indices = @transform_10, window_bounds = array<i64: 8, 896>}, {transform_indices = @transform_11, window_bounds = array<i64: 8, 128>}]} {
    %c0 = arith.constant 0 : index
    %c0_0 = arith.constant 0 : index
    %0 = vector.load %arg1[%c0, %c0_0] : memref<8x896xbf16, #tpu.memory_space<vmem>>, vector<8x896xbf16>
    %c0_1 = arith.constant 0 : index
    %c0_2 = arith.constant 0 : index
    %1 = vector.load %arg3[%c0_1, %c0_2] : memref<896x896xbf16, #tpu.memory_space<vmem>>, vector<896x896xbf16>
    %cst = arith.constant dense<0.000000e+00> : vector<8x896xf32>
    %2 = tpu.matmul %0, %1, %cst {dimension_numbers = #tpu.dot_dimension_numbers<[1], [0], [0], [1], [0, 0, 1, 1], [], []>} : vector<8x896xbf16>, vector<896x896xbf16>, vector<8x896xf32> -> vector<8x896xf32>
    %c0_3 = arith.constant 0 : index
    %c0_4 = arith.constant 0 : index
    %3 = vector.load %arg4[%c0_3, %c0_4] : memref<1x896xf32, #tpu.memory_space<vmem>>, vector<1x896xf32>
    %4 = vector.broadcast %3 : vector<1x896xf32> to vector<8x896xf32>
    %5 = arith.addf %2, %4 : vector<8x896xf32>
    %cst_5 = arith.constant 0.000000e+00 : f32
    %6 = vector.broadcast %cst_5 : f32 to vector<8x896xf32>
    %7 = arith.maximumf %5, %6 : vector<8x896xf32>
    %c0_6 = arith.constant 0 : index
    %c0_7 = arith.constant 0 : index
    %8 = vector.load %arg5[%c0_6, %c0_7] : memref<896x128xf32, #tpu.memory_space<vmem>>, vector<896x128xf32>
    %cst_8 = arith.constant dense<0.000000e+00> : vector<8x128xf32>
    %9 = tpu.matmul %7, %8, %cst_8 {dimension_numbers = #tpu.dot_dimension_numbers<[1], [0], [0], [1], [0, 0, 1, 1], [], []>} : vector<8x896xf32>, vector<896x128xf32>, vector<8x128xf32> -> vector<8x128xf32>
    %c0_9 = arith.constant 0 : index
    %c0_10 = arith.constant 0 : index
    %10 = vector.load %arg6[%c0_9, %c0_10] : memref<1x128xf32, #tpu.memory_space<vmem>>, vector<1x128xf32>
    %11 = vector.broadcast %10 : vector<1x128xf32> to vector<8x128xf32>
    %12 = arith.addf %9, %11 : vector<8x128xf32>
    %c0_11 = arith.constant 0 : index
    %c0_12 = arith.constant 0 : index
    %13 = vector.load %arg12[%c0_11, %c0_12] : memref<8x128xf32, #tpu.memory_space<vmem>>, vector<8x128xf32>
    tpu.vector_store %arg12[%c0_11, %c0_12], %12 {strides = array<i32>} : memref<8x128xf32, #tpu.memory_space<vmem>>, vector<8x128xf32>,
    %14 = vector.extract_strided_slice %12 {offsets = [0, 0], sizes = [8, 2], strides = [1, 1]} : vector<8x128xf32> to vector<8x2xf32>
    %15 = vector.extract_strided_slice %12 {offsets = [0, 2], sizes = [8, 2], strides = [1, 1]} : vector<8x128xf32> to vector<8x2xf32>
    %c0_13 = arith.constant 0 : index
    %c0_14 = arith.constant 0 : index
    %16 = vector.load %arg2[%c0_13, %c0_14] : memref<8x128xf32, #tpu.memory_space<vmem>>, vector<8x128xf32>
    %17 = vector.extract_strided_slice %16 {offsets = [0, 0], sizes = [8, 2], strides = [1, 1]} : vector<8x128xf32> to vector<8x2xf32>
    %18 = math.exp %15 : vector<8x2xf32>
    %19 = arith.mulf %18, %17 : vector<8x2xf32>
    %20 = arith.addf %14, %19 : vector<8x2xf32>
    %c0_15 = arith.constant 0 : index
    %c0_16 = arith.constant 0 : index
    %21 = vector.load %arg7[%c0_15, %c0_16] : memref<8x896xf32, #tpu.memory_space<vmem>>, vector<8x896xf32>
    %22 = vector.extract_strided_slice %20 {offsets = [0, 0], sizes = [8, 1], strides = [1, 1]} : vector<8x2xf32> to vector<8x1xf32>
    %23 = vector.extract_strided_slice %21 {offsets = [0, 0], sizes = [1, 896], strides = [1, 1]} : vector<8x896xf32> to vector<1x896xf32>
    %24 = vector.broadcast %22 : vector<8x1xf32> to vector<8x896xf32>
    %25 = vector.broadcast %23 : vector<1x896xf32> to vector<8x896xf32>
    %26 = arith.mulf %24, %25 : vector<8x896xf32>
    %27 = vector.extract_strided_slice %20 {offsets = [0, 1], sizes = [8, 1], strides = [1, 1]} : vector<8x2xf32> to vector<8x1xf32>
    %28 = vector.extract_strided_slice %21 {offsets = [1, 0], sizes = [1, 896], strides = [1, 1]} : vector<8x896xf32> to vector<1x896xf32>
    %29 = vector.broadcast %27 : vector<8x1xf32> to vector<8x896xf32>
    %30 = vector.broadcast %28 : vector<1x896xf32> to vector<8x896xf32>
    %31 = arith.mulf %29, %30 : vector<8x896xf32>
    %32 = arith.addf %26, %31 : vector<8x896xf32>
    %c0_17 = arith.constant 0 : index
    %c0_18 = arith.constant 0 : index
    %33 = vector.load %arg8[%c0_17, %c0_18] : memref<1x896xf32, #tpu.memory_space<vmem>>, vector<1x896xf32>
    %34 = vector.broadcast %33 : vector<1x896xf32> to vector<8x896xf32>
    %35 = arith.addf %32, %34 : vector<8x896xf32>
    %cst_19 = arith.constant 0.000000e+00 : f32
    %36 = vector.broadcast %cst_19 : f32 to vector<8x896xf32>
    %37 = arith.maximumf %35, %36 : vector<8x896xf32>
    %38 = arith.truncf %37 : vector<8x896xf32> to vector<8x896xbf16>
    %c0_20 = arith.constant 0 : index
    %c0_21 = arith.constant 0 : index
    %39 = vector.load %arg9[%c0_20, %c0_21] : memref<896x896xbf16, #tpu.memory_space<vmem>>, vector<896x896xbf16>
    %cst_22 = arith.constant dense<0.000000e+00> : vector<8x896xf32>
    %40 = tpu.matmul %38, %39, %cst_22 {dimension_numbers = #tpu.dot_dimension_numbers<[1], [0], [0], [1], [0, 0, 1, 1], [], []>} : vector<8x896xbf16>, vector<896x896xbf16>, vector<8x896xf32> -> vector<8x896xf32>
    %c0_23 = arith.constant 0 : index
    %c0_24 = arith.constant 0 : index
    %41 = vector.load %arg10[%c0_23, %c0_24] : memref<1x896xf32, #tpu.memory_space<vmem>>, vector<1x896xf32>
    %42 = vector.broadcast %41 : vector<1x896xf32> to vector<8x896xf32>
    %43 = arith.addf %40, %42 : vector<8x896xf32>
    %44 = arith.negf %43 : vector<8x896xf32>
    %45 = math.exp %44 : vector<8x896xf32>
    %cst_25 = arith.constant 1.000000e+00 : f32
    %46 = vector.broadcast %cst_25 : f32 to vector<8x896xf32>
    %47 = arith.addf %46, %45 : vector<8x896xf32>
    %48 = arith.divf %46, %47 : vector<8x896xf32>
    %c0_26 = arith.constant 0 : index
    %c0_27 = arith.constant 0 : index
    %49 = vector.load %arg11[%c0_26, %c0_27] : memref<8x896xf32, #tpu.memory_space<vmem>>, vector<8x896xf32>
    tpu.vector_store %arg11[%c0_26, %c0_27], %48 {strides = array<i32>} : memref<8x896xf32, #tpu.memory_space<vmem>>, vector<8x896xf32>,
    return
  }
  func.func @transform_0(%arg0: i32) -> (i32, i32) {
    %c0_i32 = arith.constant 0 : i32
    %c0_i32_0 = arith.constant 0 : i32
    return %arg0, %c0_i32 : i32, i32
  }
  func.func @transform_1(%arg0: i32) -> (i32, i32) {
    %c0_i32 = arith.constant 0 : i32
    %c0_i32_0 = arith.constant 0 : i32
    return %arg0, %c0_i32 : i32, i32
  }
  func.func @transform_2(%arg0: i32) -> (i32, i32) {
    %c0_i32 = arith.constant 0 : i32
    %c0_i32_0 = arith.constant 0 : i32
    %c0_i32_1 = arith.constant 0 : i32
    return %c0_i32, %c0_i32_0 : i32, i32
  }
  func.func @transform_3(%arg0: i32) -> (i32, i32) {
    %c0_i32 = arith.constant 0 : i32
    %c0_i32_0 = arith.constant 0 : i32
    %c0_i32_1 = arith.constant 0 : i32
    return %c0_i32, %c0_i32_0 : i32, i32
  }
  func.func @transform_4(%arg0: i32) -> (i32, i32) {
    %c0_i32 = arith.constant 0 : i32
    %c0_i32_0 = arith.constant 0 : i32
    %c0_i32_1 = arith.constant 0 : i32
    return %c0_i32, %c0_i32_0 : i32, i32
  }
  func.func @transform_5(%arg0: i32) -> (i32, i32) {
    %c0_i32 = arith.constant 0 : i32
    %c0_i32_0 = arith.constant 0 : i32
    %c0_i32_1 = arith.constant 0 : i32
    return %c0_i32, %c0_i32_0 : i32, i32
  }
  func.func @transform_6(%arg0: i32) -> (i32, i32) {
    %c0_i32 = arith.constant 0 : i32
    %c0_i32_0 = arith.constant 0 : i32
    %c0_i32_1 = arith.constant 0 : i32
    return %c0_i32, %c0_i32_0 : i32, i32
  }
  func.func @transform_7(%arg0: i32) -> (i32, i32) {
    %c0_i32 = arith.constant 0 : i32
    %c0_i32_0 = arith.constant 0 : i32
    %c0_i32_1 = arith.constant 0 : i32
    return %c0_i32, %c0_i32_0 : i32, i32
  }
  func.func @transform_8(%arg0: i32) -> (i32, i32) {
    %c0_i32 = arith.constant 0 : i32
    %c0_i32_0 = arith.constant 0 : i32
    %c0_i32_1 = arith.constant 0 : i32
    return %c0_i32, %c0_i32_0 : i32, i32
  }
  func.func @transform_9(%arg0: i32) -> (i32, i32) {
    %c0_i32 = arith.constant 0 : i32
    %c0_i32_0 = arith.constant 0 : i32
    %c0_i32_1 = arith.constant 0 : i32
    return %c0_i32, %c0_i32_0 : i32, i32
  }
  func.func @transform_10(%arg0: i32) -> (i32, i32) {
    %c0_i32 = arith.constant 0 : i32
    %c0_i32_0 = arith.constant 0 : i32
    return %arg0, %c0_i32 : i32, i32
  }
  func.func @transform_11(%arg0: i32) -> (i32, i32) {
    %c0_i32 = arith.constant 0 : i32
    %c0_i32_0 = arith.constant 0 : i32
    return %arg0, %c0_i32 : i32, i32
  }
}

</mosaic_0001>

<bundles_post_ra>
// kernel: mnist_vae_forward.1
= control target key start
LH: loop header
LB: loop body
LE: loop exit
PB: predicated region body
PF: predicated region fallthrough
CT: control target
= control target key end

     0   :  { %17 = vsyncpa [#allocation3], 0  ;;  %s10059_s0 = inlined_call_operand.vmem [shape: bf16[8,896], index: 0, kind: input, shape index: {}]   ;;  %s10060_s1 = inlined_call_operand.vmem [shape: f32[8,128], index: 1, kind: input, shape index: {}]   ;;  %s10061_s2 = inlined_call_operand.hbm [shape: bf16[896,896], index: 2, kind: input, shape index: {}]   ;;  %s10062_s3 = inlined_call_operand.hbm [shape: f32[1,896], index: 3, kind: input, shape index: {}]   ;;  %s10063_s4 = inlined_call_operand.hbm [shape: f32[896,128], index: 4, kind: input, shape index: {}]   ;;  %s10064_s5 = inlined_call_operand.hbm [shape: f32[1,128], index: 5, kind: input, shape index: {}]   ;;  %s10065_s6 = inlined_call_operand.hbm [shape: f32[8,896], index: 6, kind: input, shape index: {}]   ;;  %s10066_s7 = inlined_call_operand.hbm [shape: f32[1,896], index: 7, kind: input, shape index: {}]   ;;  %s10067_s8 = inlined_call_operand.hbm [shape: bf16[896,896], index: 8, kind: input, shape index: {}]   ;;  %s10068_s9 = inlined_call_operand.hbm [shape: f32[1,896], index: 9, kind: input, shape index: {}]   ;;  %s10069_s10 = inlined_call_operand.vmem [shape: f32[8,896], index: 10, kind: output, shape index: {0}]   ;;  %s10070_s11 = inlined_call_operand.vmem [shape: f32[8,128], index: 11, kind: output, shape index: {1}]  }
   0x1   :  { %18 = vsyncpa [#allocation5], 0 }
   0x2   :  { %19 = vsyncpa [#allocation8], 0 }
   0x3   :  { %20 = vsyncpa [#allocation11], 0 }
   0x4   :  { %21 = vsyncpa [#allocation14], 0  ;;  %s9602_s17 = smov [#allocation4]   ;;  %s9603_s19 = smov [#allocation7]  }
   0x5   :  { %s44_s18 = sshll.u32 %s9602_s17, 4  ;;  %s66_s20 = sshll.u32 %s9603_s19, 4  ;;  %s45_s18 = int_to_ptr.vmem [resolvable:$true] %s44_s18  ;;  %s67_s20 = int_to_ptr.vmem [resolvable:$true] %s66_s20 }
   0x6   :  { %s9440_s21 = scalar_lea.vmem %s45_s18, 112  ;;  %s9444_s22 = scalar_lea.vmem %s45_s18, 128 }
   0x7   :  { %p9441_p0 = scmp.ne.s32.totalorder %s45_s18, %s9440_s21  ;;  %p9445_p1 = scmp.lt.s32.totalorder %s45_s18, %s45_s18 }
   0x8   :  { %p9446_p2 = scmp.lt.s32.totalorder %s9444_s22, %s9440_s21 }
   0xa   :  { %p9447_p3 = por %p9446_p2, %p9445_p1 }
   0xc   :  { %p9448_p4 = pnand %p9447_p3, %p9441_p0 }
   0xe   :  { %9451 = shalt.err (!%p9448_p4)
}
   0xf   :  { %47 = dma.hbm_to_vmem [thread:$0]  %s10062_s3, 112, %s45_s18, [#allocation5]  }
  0x10   :  { %s9460_s25 = scalar_lea.vmem %s67_s20, 16  ;;  %s9464_s26 = scalar_lea.vmem %s67_s20, 32 }
  0x11   :  { %p9461_p5 = scmp.ne.s32.totalorder %s67_s20, %s9460_s25  ;;  %p9465_p6 = scmp.lt.s32.totalorder %s67_s20, %s67_s20 }
  0x12   :  { %p9466_p7 = scmp.lt.s32.totalorder %s9464_s26, %s9460_s25 }
  0x14   :  { %p9467_p8 = por %p9466_p7, %p9465_p6 }
  0x16   :  { %p9468_p9 = pnand %p9467_p8, %p9461_p5 }
  0x18   :  { %9471 = shalt.err (!%p9468_p9)
}
  0x19   :  { %69 = dma.hbm_to_vmem [thread:$0]  %s10064_s5, 16, %s67_s20, [#allocation8]  }
  0x1a   :  { %s9604_s29 = smov [#allocation10]   ;;  %s9605_s12 = smov [#allocation2]  }
  0x1b   :  { %s86_s30 = sshll.u32 %s9604_s29, 4  ;;  %s31_s13 = sshll.u32 %s9605_s12, 4  ;;  %s87_s30 = int_to_ptr.vmem [resolvable:$true] %s86_s30  ;;  %s32_s13 = int_to_ptr.vmem [resolvable:$true] %s31_s13 }
  0x1c   :  { %s9480_s14 = scalar_lea.vmem %s87_s30, 112  ;;  %s9484_s3 = scalar_lea.vmem %s87_s30, 128 }
  0x1d   :  { %p9481_p10 = scmp.ne.s32.totalorder %s87_s30, %s9480_s14  ;;  %p9485_p11 = scmp.lt.s32.totalorder %s87_s30, %s87_s30 }
  0x1e   :  { %p9486_p12 = scmp.lt.s32.totalorder %s9484_s3, %s9480_s14 }
  0x20   :  { %p9487_p13 = por %p9486_p12, %p9485_p11 }
  0x22   :  { %p9488_p0 = pnand %p9487_p13, %p9481_p10 }
  0x24   :  { %9491 = shalt.err (!%p9488_p0)
}
  0x25   :  { %89 = dma.hbm_to_vmem [thread:$0]  %s10066_s7, 112, %s87_s30, [#allocation11]  }
  0x26   :  { %s9500_s17 = scalar_lea.vmem %s32_s13, 50176  ;;  %p9505_p2 = scmp.lt.s32.totalorder %s32_s13, %s32_s13 }
  0x27   :  { %p9501_p1 = scmp.ne.s32.totalorder %s32_s13, %s9500_s17  ;;  %p9506_p3 = scmp.lt.s32.totalorder %s9500_s17, %s9500_s17 }
  0x29   :  { %p9507_p4 = por %p9506_p3, %p9505_p2 }
  0x2b   :  { %p9508_p5 = pnand %p9507_p4, %p9501_p1 }
  0x2d   :  { %9511 = shalt.err (!%p9508_p5)
}
  0x2e   :  { %s9606_s5 = smov 448   ;;  %s9607_s18 = smov 28  }
  0x2f   :  { %37 = dma.hbm_to_vmem [thread:$0]  %s10061_s2, 50176, %s32_s13, [#allocation3], %s9606_s5, %s9606_s5, %s9607_s18  }
  0x30   :  { %s9608_s21 = smov [#allocation6]  }
  0x31   :  { %s53_s22 = sshll.u32 %s9608_s21, 4  ;;  %s54_s22 = int_to_ptr.vmem [resolvable:$true] %s53_s22 }
  0x32   :  { %s9520_s7 = scalar_lea.vmem %s54_s22, 14336  ;;  %p9525_p7 = scmp.lt.s32.totalorder %s54_s22, %s54_s22 }
  0x33   :  { %p9521_p6 = scmp.ne.s32.totalorder %s54_s22, %s9520_s7  ;;  %p9526_p8 = scmp.lt.s32.totalorder %s9520_s7, %s9520_s7 }
  0x35   :  { %p9527_p9 = por %p9526_p8, %p9525_p7 }
  0x37   :  { %p9528_p10 = pnand %p9527_p9, %p9521_p6 }
  0x39   :  { %9531 = shalt.err (!%p9528_p10)
}
  0x3a   :  { %s9609_s23 = smov 128   ;;  %s9610_s24 = smov 8  }
  0x3b   :  { %59 = dma.hbm_to_vmem [thread:$0]  %s10063_s4, 14336, %s54_s22, [#allocation5], %s9609_s23, %s9609_s23, %s9610_s24  }
  0x3c   :  { %s9611_s27 = smov [#allocation9]   ;;  %s9612_s2 = smov [#allocation12]  }
  0x3d   :  { %s76_s28 = sshll.u32 %s9611_s27, 4  ;;  %s95_s29 = sshll.u32 %s9612_s2, 4  ;;  %s77_s28 = int_to_ptr.vmem [resolvable:$true] %s76_s28  ;;  %s96_s29 = int_to_ptr.vmem [resolvable:$true] %s95_s29 }
  0x3e   :  { %s9540_s30 = scalar_lea.vmem %s77_s28, 896  ;;  %p9545_p12 = scmp.lt.s32.totalorder %s77_s28, %s77_s28 }
  0x3f   :  { %p9541_p11 = scmp.ne.s32.totalorder %s77_s28, %s9540_s30  ;;  %p9546_p13 = scmp.lt.s32.totalorder %s9540_s30, %s9540_s30 }
  0x41   :  { %p9547_p0 = por %p9546_p13, %p9545_p12 }
  0x43   :  { %p9548_p1 = pnand %p9547_p0, %p9541_p11 }
  0x45   :  { %9551 = shalt.err (!%p9548_p1)
}
  0x46   :  { %79 = dma.hbm_to_vmem [thread:$0]  %s10065_s6, 896, %s77_s28, [#allocation8]  }
  0x47   :  { %s9560_s14 = scalar_lea.vmem %s96_s29, 50176  ;;  %p9565_p3 = scmp.lt.s32.totalorder %s96_s29, %s96_s29 }
  0x48   :  { %p9561_p2 = scmp.ne.s32.totalorder %s96_s29, %s9560_s14  ;;  %p9566_p4 = scmp.lt.s32.totalorder %s9560_s14, %s9560_s14 }
  0x4a   :  { %p9567_p5 = por %p9566_p4, %p9565_p3 }
  0x4c   :  { %p9568_p6 = pnand %p9567_p5, %p9561_p2 }
  0x4e   :  { %9571 = shalt.err (!%p9568_p6)
}
  0x4f   :  { %101 = dma.hbm_to_vmem [thread:$0]  %s10067_s8, 50176, %s96_s29, [#allocation11], %s9606_s5, %s9606_s5, %s9607_s18  }
  0x50   :  { %s9613_s15 = smov [#allocation13]  }
  0x51   :  { %s108_s16 = sshll.u32 %s9613_s15, 4  ;;  %s109_s16 = int_to_ptr.vmem [resolvable:$true] %s108_s16 }
  0x52   :  { %s9580_s17 = scalar_lea.vmem %s109_s16, 112  ;;  %s9584_s6 = scalar_lea.vmem %s109_s16, 128 }
  0x53   :  { %p9581_p7 = scmp.ne.s32.totalorder %s109_s16, %s9580_s17  ;;  %p9585_p8 = scmp.lt.s32.totalorder %s109_s16, %s109_s16 }
  0x54   :  { %p9586_p9 = scmp.lt.s32.totalorder %s9584_s6, %s9580_s17 }
  0x56   :  { %p9587_p10 = por %p9586_p9, %p9585_p8 }
  0x58   :  { %p9588_p11 = pnand %p9587_p10, %p9581_p7 }
  0x5a   :  { %9591 = shalt.err (!%p9588_p11)
}
  0x5b   :  { %111 = dma.hbm_to_vmem [thread:$0]  %s10068_s9, 112, %s109_s16, [#allocation14]  }
  0x5c   :  { %9592 = dma.done.wait [#allocation3], 50176  }
  0x5d   :  { %9593 = vsyncadd [#allocation3], 4294917120 }
  0x5e   :  { %9594 = dma.done.wait [#allocation5], 14448  }
  0x5f   :  { %9595 = vsyncadd [#allocation5], 4294952848 }
  0x60   :  { %9596 = dma.done.wait [#allocation8], 912  }
  0x61   :  { %9597 = vsyncadd [#allocation8], 4294966384 }
  0x62   :  { %9598 = dma.done.wait [#allocation11], 50288  }
  0x63   :  { %9599 = vsyncadd [#allocation11], 4294917008 }
  0x64   :  { %9600 = dma.done.wait [#allocation14], 112  }
  0x65   :  { %9601 = vsyncadd [#allocation14], 4294967184  ;;  %v9614_v0 = vmov 0   ;;  %v8272_v1 = vld [vmem:[#allocation2 + $0x18c] ss:$28 sps:$4 sm:$0xff]   ;;  %v137_v47 = vld [vmem:[%s10059_s0] sm:$0xff] }
  0x66   :  { %8269 = vset.pattern.permute.xlu1 %v9614_v0  ;;  %v8274_v2 = vld [vmem:[#allocation2 + $0x50c] ss:$28 sps:$4 sm:$0xff]   ;;  %2667 = vmatprep.subr.bf16.mxu0 %v8272_v1  ;;  %v8278_v5 = vld [vmem:[#allocation2 + $0x154] ss:$28 sps:$4 sm:$0xff]   ;;  %v8284_v9 = vld [vmem:[#allocation2 + $0x11c] ss:$28 sps:$4 sm:$0xff]   ;;  %v9714_v48 = vcombine.high %v137_v47, %v137_v47 }
  0x67   :  { %v8276_v3 = vld [vmem:[#allocation2 + $0x188] ss:$28 sps:$4 sm:$0xff]   ;;  %2708 = vmatprep.subr.bf16.mxu1 %v8274_v2  ;;  %v8280_v6 = vld [vmem:[#allocation2 + $0x4d4] ss:$28 sps:$4 sm:$0xff]   ;;  %v8286_v10 = vld [vmem:[#allocation2 + $0x49c] ss:$28 sps:$4 sm:$0xff]  }
  0x68   :  { %v8277_v4 = vld [vmem:[#allocation2 + $0x508] ss:$28 sps:$4 sm:$0xff]   ;;  %2668 = vmatpush1.bf16.msra.mxu0 %v8276_v3  ;;  %v8282_v7 = vld [vmem:[#allocation2 + $0x150] ss:$28 sps:$4 sm:$0xff]   ;;  %v8288_v11 = vld [vmem:[#allocation2 + $0x118] ss:$28 sps:$4 sm:$0xff]   ;;  %2699 = vmatprep.mubr.bf16.mxu0 %v9714_v48 }
  0x69   :  { %2709 = vmatpush1.bf16.msra.mxu1 %v8277_v4  ;;  %2669 = vmatprep.subr.bf16.mxu0 %v8278_v5  ;;  %v8283_v8 = vld [vmem:[#allocation2 + $0x4d0] ss:$28 sps:$4 sm:$0xff]   ;;  %v8289_v12 = vld [vmem:[#allocation2 + $0x498] ss:$28 sps:$4 sm:$0xff]   ;;  %v8290_v13 = vld [vmem:[#allocation2 + $0xe4] ss:$28 sps:$4 sm:$0xff]  }
  0x6a   :  { %2710 = vmatprep.subr.bf16.mxu1 %v8280_v6  ;;  %v8292_v14 = vld [vmem:[#allocation2 + $0x464] ss:$28 sps:$4 sm:$0xff]   ;;  %v8296_v17 = vld [vmem:[#allocation2 + $0xac] ss:$28 sps:$4 sm:$0xff]   ;;  %v8302_v21 = vld [vmem:[#allocation2 + $0x74] ss:$28 sps:$4 sm:$0xff]  }
  0x6b   :  { %v8294_v15 = vld [vmem:[#allocation2 + $0xe0] ss:$28 sps:$4 sm:$0xff]   ;;  %v8298_v18 = vld [vmem:[#allocation2 + $0x42c] ss:$28 sps:$4 sm:$0xff]   ;;  %v8304_v22 = vld [vmem:[#allocation2 + $0x3f4] ss:$28 sps:$4 sm:$0xff]  }
  0x6c   :  { %2670 = vmatpush1.bf16.msra.mxu0 %v8282_v7  ;;  %v8295_v16 = vld [vmem:[#allocation2 + $0x460] ss:$28 sps:$4 sm:$0xff]   ;;  %v8300_v19 = vld [vmem:[#allocation2 + $0xa8] ss:$28 sps:$4 sm:$0xff]   ;;  %v8306_v23 = vld [vmem:[#allocation2 + $0x70] ss:$28 sps:$4 sm:$0xff]  }
  0x6d   :  { %2711 = vmatpush1.bf16.msra.mxu1 %v8283_v8  ;;  %2671 = vmatprep.subr.bf16.mxu0 %v8284_v9  ;;  %v8301_v20 = vld [vmem:[#allocation2 + $0x428] ss:$28 sps:$4 sm:$0xff]   ;;  %v8307_v24 = vld [vmem:[#allocation2 + $0x3f0] ss:$28 sps:$4 sm:$0xff]   ;;  %v8308_v25 = vld [vmem:[#allocation2 + $0x3c] ss:$28 sps:$4 sm:$0xff]   ;;  %v9723_v8 = vcombine.low %v137_v47, %v137_v47 }
  0x6e   :  { %2712 = vmatprep.subr.bf16.mxu1 %v8286_v10  ;;  %v8310_v26 = vld [vmem:[#allocation2 + $0x3bc] ss:$28 sps:$4 sm:$0xff]   ;;  %v8314_v29 = vld [vmem:[#allocation2 + $0x4] ss:$28 sps:$4 sm:$0xff]   ;;  %v8320_v33 = vld [vmem:[#allocation2 + $0x34c] ss:$28 sps:$4 sm:$0xff]  }
  0x6f   :  { %v8312_v27 = vld [vmem:[#allocation2 + $0x38] ss:$28 sps:$4 sm:$0xff]   ;;  %v8316_v30 = vld [vmem:[#allocation2 + $0x384] ss:$28 sps:$4 sm:$0xff]   ;;  %v8322_v34 = vld [vmem:[#allocation2 + $0x6cc] ss:$28 sps:$4 sm:$0xff]  }
  0x70   :  { %2672 = vmatpush1.bf16.msra.mxu0 %v8288_v11  ;;  %v8313_v28 = vld [vmem:[#allocation2 + $0x3b8] ss:$28 sps:$4 sm:$0xff]   ;;  %v8318_v31 = vld [vmem:[#allocation2] ss:$28 sps:$4 sm:$0xff]   ;;  %v8324_v35 = vld [vmem:[#allocation2 + $0x348] ss:$28 sps:$4 sm:$0xff]  }
  0x71   :  { %2713 = vmatpush1.bf16.msra.mxu1 %v8289_v12  ;;  %2673 = vmatprep.subr.bf16.mxu0 %v8290_v13  ;;  %v8319_v32 = vld [vmem:[#allocation2 + $0x380] ss:$28 sps:$4 sm:$0xff]   ;;  %v8325_v36 = vld [vmem:[#allocation2 + $0x6c8] ss:$28 sps:$4 sm:$0xff]   ;;  %v8326_v37 = vld [vmem:[#allocation2 + $0x314] ss:$28 sps:$4 sm:$0xff]  }
  0x72   :  { %2714 = vmatprep.subr.bf16.mxu1 %v8292_v14  ;;  %v8328_v38 = vld [vmem:[#allocation2 + $0x694] ss:$28 sps:$4 sm:$0xff]   ;;  %v8332_v41 = vld [vmem:[#allocation2 + $0x2dc] ss:$28 sps:$4 sm:$0xff]   ;;  %v8338_v45 = vld [vmem:[#allocation2 + $0x2a4] ss:$28 sps:$4 sm:$0xff]  }
  0x73   :  { %v8330_v39 = vld [vmem:[#allocation2 + $0x310] ss:$28 sps:$4 sm:$0xff]   ;;  %v8334_v42 = vld [vmem:[#allocation2 + $0x65c] ss:$28 sps:$4 sm:$0xff]   ;;  %v8340_v46 = vld [vmem:[#allocation2 + $0x624] ss:$28 sps:$4 sm:$0xff]  }
  0x74   :  { %2674 = vmatpush1.bf16.msra.mxu0 %v8294_v15  ;;  %v8331_v40 = vld [vmem:[#allocation2 + $0x690] ss:$28 sps:$4 sm:$0xff]   ;;  %v8336_v43 = vld [vmem:[#allocation2 + $0x2d8] ss:$28 sps:$4 sm:$0xff]   ;;  %v8342_v50 = vld [vmem:[#allocation2 + $0x2a0] ss:$28 sps:$4 sm:$0xff]  }
  0x75   :  { %2715 = vmatpush1.bf16.msra.mxu1 %v8295_v16  ;;  %2675 = vmatprep.subr.bf16.mxu0 %v8296_v17  ;;  %v8337_v44 = vld [vmem:[#allocation2 + $0x658] ss:$28 sps:$4 sm:$0xff]   ;;  %v138_v49 = vld [vmem:[%s10059_s0 + $0x8] sm:$0xff]  ;;  %v8343_v51 = vld [vmem:[#allocation2 + $0x620] ss:$28 sps:$4 sm:$0xff]   ;;  %vm9616_vm0 = vmmov 0  }
  0x76   :  { %2716 = vmatprep.subr.bf16.mxu1 %v8298_v18  ;;  %v9719_v52 = vcombine.high %v138_v49, %v138_v49  ;;  %v8344_v53 = vld [vmem:[#allocation2 + $0x26c] ss:$28 sps:$4 sm:$0xff]   ;;  %v8350_v57 = vld [vmem:[#allocation2 + $0x234] ss:$28 sps:$4 sm:$0xff]   ;;  %v8356_v61 = vld [vmem:[#allocation2 + $0x1fc] ss:$28 sps:$4 sm:$0xff]   ;;  %v9725_v9 = vcombine.low %v138_v49, %v138_v49 }
  0x77   :  { %v8346_v54 = vld [vmem:[#allocation2 + $0x5ec] ss:$28 sps:$4 sm:$0xff]   ;;  %v8352_v58 = vld [vmem:[#allocation2 + $0x5b4] ss:$28 sps:$4 sm:$0xff]   ;;  %v8358_v62 = vld [vmem:[#allocation2 + $0x57c] ss:$28 sps:$4 sm:$0xff]  }
  0x78   :  { %2676 = vmatpush1.bf16.msra.mxu0 %v8300_v19  ;;  %2740 = vmatprep.mubr.bf16.mxu1 %v9719_v52  ;;  %v8348_v55 = vld [vmem:[#allocation2 + $0x268] ss:$28 sps:$4 sm:$0xff]   ;;  %v8354_v59 = vld [vmem:[#allocation2 + $0x230] ss:$28 sps:$4 sm:$0xff]   ;;  %v8360_v63 = vld [vmem:[#allocation2 + $0x1f8] ss:$28 sps:$4 sm:$0xff]  }
  0x79   :  { %2717 = vmatpush1.bf16.msra.mxu1 %v8301_v20  ;;  %2677 = vmatprep.subr.bf16.mxu0 %v8302_v21  ;;  %v8349_v56 = vld [vmem:[#allocation2 + $0x5e8] ss:$28 sps:$4 sm:$0xff]   ;;  %v8355_v60 = vld [vmem:[#allocation2 + $0x5b0] ss:$28 sps:$4 sm:$0xff]   ;;  %v8361_v1 = vld [vmem:[#allocation2 + $0x578] ss:$28 sps:$4 sm:$0xff]  }
  0x7a   :  { %2718 = vmatprep.subr.bf16.mxu1 %v8304_v22  ;;  %v8362_v2 = vld [vmem:[#allocation2 + $0x1c4] ss:$28 sps:$4 sm:$0xff]   ;;  %v8373_v6 = vld [vmem:[#allocation2 + $0x88c] ss:$28 sps:$4 sm:$0xff]   ;;  %v8380_v12 = vld [vmem:[#allocation2 + $0x854] ss:$28 sps:$4 sm:$0xff]  }
  0x7b   :  { %v8364_v3 = vld [vmem:[#allocation2 + $0x544] ss:$28 sps:$4 sm:$0xff]   ;;  %v8376_v7 = vld [vmem:[#allocation2 + $0xc0c] ss:$28 sps:$4 sm:$0xff]   ;;  %v8383_v13 = vld [vmem:[#allocation2 + $0xbd4] ss:$28 sps:$4 sm:$0xff]  }
  0x7c   :  { %2678 = vmatpush1.bf16.msra.mxu0 %v8306_v23  ;;  %v8366_v4 = vld [vmem:[#allocation2 + $0x1c0] ss:$28 sps:$4 sm:$0xff]   ;;  %v8371_v10 = vld [vmem:[#allocation2 + $0x888] ss:$28 sps:$4 sm:$0xff]   ;;  %v8378_v14 = vld [vmem:[#allocation2 + $0x850] ss:$28 sps:$4 sm:$0xff]  }
  0x7d   :  { %2719 = vmatpush1.bf16.msra.mxu1 %v8307_v24  ;;  %2679 = vmatprep.subr.bf16.mxu0 %v8308_v25  ;;  %v8367_v5 = vld [vmem:[#allocation2 + $0x540] ss:$28 sps:$4 sm:$0xff]   ;;  %v8374_v11 = vld [vmem:[#allocation2 + $0xc08] ss:$28 sps:$4 sm:$0xff]   ;;  %v8381_v15 = vld [vmem:[#allocation2 + $0xbd0] ss:$28 sps:$4 sm:$0xff]  }
  0x7e   :  { %2720 = vmatprep.subr.bf16.mxu1 %v8310_v26  ;;  %v8386_v16 = vld [vmem:[#allocation2 + $0x81c] ss:$28 sps:$4 sm:$0xff]   ;;  %v8392_v20 = vld [vmem:[#allocation2 + $0x7e4] ss:$28 sps:$4 sm:$0xff]   ;;  %v8398_v24 = vld [vmem:[#allocation2 + $0x7ac] ss:$28 sps:$4 sm:$0xff]  }
  0x7f   :  { %v8389_v17 = vld [vmem:[#allocation2 + $0xb9c] ss:$28 sps:$4 sm:$0xff]   ;;  %v8395_v21 = vld [vmem:[#allocation2 + $0xb64] ss:$28 sps:$4 sm:$0xff]   ;;  %v8401_v25 = vld [vmem:[#allocation2 + $0xb2c] ss:$28 sps:$4 sm:$0xff]  }
  0x80   :  { %2680 = vmatpush1.bf16.msra.mxu0 %v8312_v27  ;;  %v8384_v18 = vld [vmem:[#allocation2 + $0x818] ss:$28 sps:$4 sm:$0xff]   ;;  %v8390_v22 = vld [vmem:[#allocation2 + $0x7e0] ss:$28 sps:$4 sm:$0xff]   ;;  %v8396_v26 = vld [vmem:[#allocation2 + $0x7a8] ss:$28 sps:$4 sm:$0xff]  }
  0x81   :  { %2721 = vmatpush1.bf16.msra.mxu1 %v8313_v28  ;;  %2681 = vmatprep.subr.bf16.mxu0 %v8314_v29  ;;  %v8387_v19 = vld [vmem:[#allocation2 + $0xb98] ss:$28 sps:$4 sm:$0xff]   ;;  %v8393_v23 = vld [vmem:[#allocation2 + $0xb60] ss:$28 sps:$4 sm:$0xff]   ;;  %v8399_v27 = vld [vmem:[#allocation2 + $0xb28] ss:$28 sps:$4 sm:$0xff]  }
  0x82   :  { %2722 = vmatprep.subr.bf16.mxu1 %v8316_v30  ;;  %v8404_v28 = vld [vmem:[#allocation2 + $0x774] ss:$28 sps:$4 sm:$0xff]   ;;  %v8432_v49 = vld [vmem:[#allocation2 + $0x15c] ss:$28 sps:$4 sm:$0xff]   ;;  %s9617_s2 = smov 2  }
  0x83   :  { %v8407_v29 = vld [vmem:[#allocation2 + $0xaf4] ss:$28 sps:$4 sm:$0xff]  }
  0x84   :  { %2682 = vmatpush1.bf16.msra.mxu0 %v8318_v31  ;;  %v8402_v30 = vld [vmem:[#allocation2 + $0x770] ss:$28 sps:$4 sm:$0xff]  }
  0x85   :  { %2723 = vmatpush1.bf16.msra.mxu1 %v8319_v32  ;;  %2683 = vmatprep.subr.bf16.mxu0 %v8320_v33  ;;  %v8405_v31 = vld [vmem:[#allocation2 + $0xaf0] ss:$28 sps:$4 sm:$0xff]   ;;  %v8410_v32 = vld [vmem:[#allocation2 + $0x73c] ss:$28 sps:$4 sm:$0xff]  }
  0x86   :  { %2724 = vmatprep.subr.bf16.mxu1 %v8322_v34  ;;  %v8413_v33 = vld [vmem:[#allocation2 + $0xabc] ss:$28 sps:$4 sm:$0xff]   ;;  %v9733_v34 = vld [vmem:[%s10059_s0 + $0x10] sm:$0xff] }
  0x87   :  { %v8429_v47 = vld [vmem:[#allocation2 + $0xa14] ss:$28 sps:$4 sm:$0xff]  }
  0x88   :  { %2684 = vmatpush2.bf16.msra.mxu0 %v8324_v35  ;;  %v8408_v35 = vld [vmem:[#allocation2 + $0x738] ss:$28 sps:$4 sm:$0xff]  }
  0x89   :  { %2725 = vmatpush2.bf16.msra.mxu1 %v8325_v36  ;;  %2685 = vmatprep.subr.bf16.mxu0 %v8326_v37  ;;  %v9737_v36 = vcombine.high %v9733_v34, %v9733_v34  ;;  %v8411_v37 = vld [vmem:[#allocation2 + $0xab8] ss:$28 sps:$4 sm:$0xff]  }
  0x8a   :  { %2726 = vmatprep.subr.bf16.mxu1 %v8328_v38  ;;  %v8416_v38 = vld [vmem:[#allocation2 + $0x704] ss:$28 sps:$4 sm:$0xff]  }
  0x8c   :  { %2686 = vmatpush2.bf16.msra.mxu0 %v8330_v39  ;;  %v8419_v39 = vld [vmem:[#allocation2 + $0xa84] ss:$28 sps:$4 sm:$0xff]  }
  0x8d   :  { %2727 = vmatpush2.bf16.msra.mxu1 %v8331_v40  ;;  %2687 = vmatprep.subr.bf16.mxu0 %v8332_v41  ;;  %v8414_v40 = vld [vmem:[#allocation2 + $0x700] ss:$28 sps:$4 sm:$0xff]  }
  0x8e   :  { %2728 = vmatprep.subr.bf16.mxu1 %v8334_v42  ;;  %v8417_v41 = vld [vmem:[#allocation2 + $0xa80] ss:$28 sps:$4 sm:$0xff]   ;;  %v8422_v42 = vld [vmem:[#allocation2 + $0xa4c] ss:$28 sps:$4 sm:$0xff]  }
  0x90   :  { %2688 = vmatpush2.bf16.msra.mxu0 %v8336_v43  ;;  %v8425_v43 = vld [vmem:[#allocation2 + $0x194] ss:$28 sps:$4 sm:$0xff]  }
  0x91   :  { %2729 = vmatpush2.bf16.msra.mxu1 %v8337_v44  ;;  %2689 = vmatprep.subr.bf16.mxu0 %v8338_v45  ;;  %v8420_v44 = vld [vmem:[#allocation2 + $0xa48] ss:$28 sps:$4 sm:$0xff]   ;;  %v9743_v45 = vld [vmem:[%s10059_s0 + $0x18] ss:$0 sps:$4 sm:$0xff]  }
  0x92   :  { %2730 = vmatprep.subr.bf16.mxu1 %v8340_v46  ;;  %v8423_v46 = vld [vmem:[#allocation2 + $0x190] ss:$28 sps:$4 sm:$0xff]  }
  0x94   :  { %2690 = vmatpush2.bf16.msra.mxu0 %v8342_v50  ;;  %v8427_v50 = vld [vmem:[#allocation2 + $0xa10] ss:$28 sps:$4 sm:$0xff]  }
  0x95   :  { %2731 = vmatpush2.bf16.msra.mxu1 %v8343_v51  ;;  %2691 = vmatprep.subr.bf16.mxu0 %v8344_v53  ;;  %v8430_v51 = vld [vmem:[#allocation2 + $0x158] ss:$28 sps:$4 sm:$0xff]  }
  0x96   :  { %2732 = vmatprep.subr.bf16.mxu1 %v8346_v54  ;;  %v8435_v53 = vld [vmem:[#allocation2 + $0x9dc] ss:$28 sps:$4 sm:$0xff]   ;;  %v8438_v54 = vld [vmem:[#allocation2 + $0x124] ss:$28 sps:$4 sm:$0xff]  }
  0x98   :  { %2692 = vmatpush2.bf16.msra.mxu0 %v8348_v55  ;;  %v8433_v55 = vld [vmem:[#allocation2 + $0x9d8] ss:$28 sps:$4 sm:$0xff]  }
  0x99   :  { %2733 = vmatpush2.bf16.msra.mxu1 %v8349_v56  ;;  %2693 = vmatprep.subr.bf16.mxu0 %v8350_v57  ;;  %v8436_v56 = vld [vmem:[#allocation2 + $0x120] ss:$28 sps:$4 sm:$0xff]  }
  0x9a   :  { %2734 = vmatprep.subr.bf16.mxu1 %v8352_v58  ;;  %v8441_v57 = vld [vmem:[#allocation2 + $0x9a4] ss:$28 sps:$4 sm:$0xff]   ;;  %v8444_v58 = vld [vmem:[#allocation2 + $0xec] ss:$28 sps:$4 sm:$0xff]  }
  0x9c   :  { %2694 = vmatpush2.bf16.msra.mxu0 %v8354_v59  ;;  %v8439_v59 = vld [vmem:[#allocation2 + $0x9a0] ss:$28 sps:$4 sm:$0xff]  }
  0x9d   :  { %2735 = vmatpush2.bf16.msra.mxu1 %v8355_v60  ;;  %2695 = vmatprep.subr.bf16.mxu0 %v8356_v61  ;;  %v8442_v60 = vld [vmem:[#allocation2 + $0xe8] ss:$28 sps:$4 sm:$0xff]  }
  0x9e   :  { %2736 = vmatprep.subr.bf16.mxu1 %v8358_v62  ;;  %v8447_v61 = vld [vmem:[#allocation2 + $0x96c] ss:$28 sps:$4 sm:$0xff]   ;;  %v8450_v62 = vld [vmem:[#allocation2 + $0xb4] ss:$28 sps:$4 sm:$0xff]  }
  0xa0   :  { %2696 = vmatpush2.bf16.msra.mxu0 %v8360_v63  ;;  %v8445_v63 = vld [vmem:[#allocation2 + $0x968] ss:$28 sps:$4 sm:$0xff]  }
  0xa1   :  { %2737 = vmatpush2.bf16.msra.mxu1 %v8361_v1  ;;  %2697 = vmatprep.subr.bf16.mxu0 %v8362_v2  ;;  %v8448_v1 = vld [vmem:[#allocation2 + $0xb0] ss:$28 sps:$4 sm:$0xff]  }
  0xa2   :  { %2738 = vmatprep.subr.bf16.mxu1 %v8364_v3  ;;  %v8453_v2 = vld [vmem:[#allocation2 + $0x934] ss:$28 sps:$4 sm:$0xff]   ;;  %v8456_v3 = vld [vmem:[#allocation2 + $0x7c] ss:$28 sps:$4 sm:$0xff]  }
  0xa4   :  { %2698 = vmatpush2.bf16.msra.mxu0 %v8366_v4  ;;  %v8451_v4 = vld [vmem:[#allocation2 + $0x930] ss:$28 sps:$4 sm:$0xff]  }
  0xa5   :  { %2739 = vmatpush2.bf16.msra.mxu1 %v8367_v5  ;;  %2749 = vmatprep.subr.bf16.mxu0 %v8373_v6  ;;  %v8454_v5 = vld [vmem:[#allocation2 + $0x78] ss:$28 sps:$4 sm:$0xff]  }
  0xa6   :  { %2790 = vmatprep.subr.bf16.mxu1 %v8376_v7  ;;  %v8459_v6 = vld [vmem:[#allocation2 + $0x8fc] ss:$28 sps:$4 sm:$0xff]   ;;  %v8462_v7 = vld [vmem:[#allocation2 + $0x44] ss:$28 sps:$4 sm:$0xff]  }
  0xa7   :  { %2700 = vmatmul.mubr.bf16.vlgmr.msra.gmra.mxu0 %v9723_v8 }
  0xa8   :  { %2741 = vmatmul.mubr.bf16.vlgmr.msra.gmra.mxu1 %v9725_v9  ;;  %2750 = vmatpush1.bf16.msra.mxu0 %v8371_v10  ;;  %v8457_v10 = vld [vmem:[#allocation2 + $0x8f8] ss:$28 sps:$4 sm:$0xff]  }
  0xa9   :  { %2791 = vmatpush1.bf16.msra.mxu1 %v8374_v11  ;;  %2751 = vmatprep.subr.bf16.mxu0 %v8380_v12  ;;  %v8460_v11 = vld [vmem:[#allocation2 + $0x40] ss:$28 sps:$4 sm:$0xff]  }
  0xaa   :  { %2792 = vmatprep.subr.bf16.mxu1 %v8383_v13  ;;  %2822 = vmatprep.mubr.bf16.mxu1 %v9614_v0  ;;  %v8465_v12 = vld [vmem:[#allocation2 + $0x8c4] ss:$28 sps:$4 sm:$0xff]   ;;  %v8468_v13 = vld [vmem:[#allocation2 + $0xc] ss:$28 sps:$4 sm:$0xff]  }
  0xab   :  { %2781 = vmatprep.mubr.bf16.mxu0 %v9737_v36 }
  0xac   :  { %2752 = vmatpush1.bf16.msra.mxu0 %v8378_v14  ;;  %v8463_v14 = vld [vmem:[#allocation2 + $0x8c0] ss:$28 sps:$4 sm:$0xff]  }
  0xad   :  { %2793 = vmatpush1.bf16.msra.mxu1 %v8381_v15  ;;  %2753 = vmatprep.subr.bf16.mxu0 %v8386_v16  ;;  %v8466_v15 = vld [vmem:[#allocation2 + $0x8] ss:$28 sps:$4 sm:$0xff]   ;;  %v8473_v16 = vld [vmem:[#allocation2 + $0x354] ss:$28 sps:$4 sm:$0xff]  }
  0xae   :  { %2794 = vmatprep.subr.bf16.mxu1 %v8389_v17  ;;  %v8476_v17 = vld [vmem:[#allocation2 + $0x514] ss:$28 sps:$4 sm:$0xff]  }
  0xb0   :  { %2754 = vmatpush1.bf16.msra.mxu0 %v8384_v18  ;;  %v9749_v18 = vcombine.low %v9733_v34, %v9733_v34  ;;  %v8500_v34 = vld [vmem:[#allocation2 + $0x434] ss:$28 sps:$4 sm:$0xff]  }
  0xb1   :  { %2795 = vmatpush1.bf16.msra.mxu1 %v8387_v19  ;;  %2755 = vmatprep.subr.bf16.mxu0 %v8392_v20  ;;  %v8471_v19 = vld [vmem:[#allocation2 + $0x350] ss:$28 sps:$4 sm:$0xff]  }
  0xb2   :  { %2796 = vmatprep.subr.bf16.mxu1 %v8395_v21  ;;  %v8474_v20 = vld [vmem:[#allocation2 + $0x510] ss:$28 sps:$4 sm:$0xff]   ;;  %v8479_v21 = vld [vmem:[#allocation2 + $0x31c] ss:$28 sps:$4 sm:$0xff]  }
  0xb4   :  { %2756 = vmatpush1.bf16.msra.mxu0 %v8390_v22  ;;  %v8482_v22 = vld [vmem:[#allocation2 + $0x4dc] ss:$28 sps:$4 sm:$0xff]  }
  0xb5   :  { %2797 = vmatpush1.bf16.msra.mxu1 %v8393_v23  ;;  %2757 = vmatprep.subr.bf16.mxu0 %v8398_v24  ;;  %v8477_v23 = vld [vmem:[#allocation2 + $0x318] ss:$28 sps:$4 sm:$0xff]  }
  0xb6   :  { %2798 = vmatprep.subr.bf16.mxu1 %v8401_v25  ;;  %v8480_v24 = vld [vmem:[#allocation2 + $0x4d8] ss:$28 sps:$4 sm:$0xff]   ;;  %v8485_v25 = vld [vmem:[#allocation2 + $0x2e4] ss:$28 sps:$4 sm:$0xff]  }
  0xb8   :  { %2758 = vmatpush1.bf16.msra.mxu0 %v8396_v26  ;;  %v8488_v26 = vld [vmem:[#allocation2 + $0x4a4] ss:$28 sps:$4 sm:$0xff]  }
  0xb9   :  { %2799 = vmatpush1.bf16.msra.mxu1 %v8399_v27  ;;  %2759 = vmatprep.subr.bf16.mxu0 %v8404_v28  ;;  %v8483_v27 = vld [vmem:[#allocation2 + $0x2e0] ss:$28 sps:$4 sm:$0xff]  }
  0xba   :  { %2800 = vmatprep.subr.bf16.mxu1 %v8407_v29  ;;  %v8486_v28 = vld [vmem:[#allocation2 + $0x4a0] ss:$28 sps:$4 sm:$0xff]   ;;  %v8491_v29 = vld [vmem:[#allocation2 + $0x2ac] ss:$28 sps:$4 sm:$0xff]  }
  0xbc   :  { %2760 = vmatpush1.bf16.msra.mxu0 %v8402_v30  ;;  %v8494_v30 = vld [vmem:[#allocation2 + $0x46c] ss:$28 sps:$4 sm:$0xff]  }
  0xbd   :  { %2801 = vmatpush1.bf16.msra.mxu1 %v8405_v31  ;;  %2761 = vmatprep.subr.bf16.mxu0 %v8410_v32  ;;  %v8489_v31 = vld [vmem:[#allocation2 + $0x2a8] ss:$28 sps:$4 sm:$0xff]  }
  0xbe   :  { %2802 = vmatprep.subr.bf16.mxu1 %v8413_v33  ;;  %v8492_v32 = vld [vmem:[#allocation2 + $0x468] ss:$28 sps:$4 sm:$0xff]   ;;  %v8497_v33 = vld [vmem:[#allocation2 + $0x274] ss:$28 sps:$4 sm:$0xff]  }
  0xc0   :  { %2762 = vmatpush1.bf16.msra.mxu0 %v8408_v35  ;;  %v8495_v35 = vld [vmem:[#allocation2 + $0x270] ss:$28 sps:$4 sm:$0xff]  }
  0xc1   :  { %2803 = vmatpush1.bf16.msra.mxu1 %v8411_v37  ;;  %2763 = vmatprep.subr.bf16.mxu0 %v8416_v38  ;;  %v8498_v37 = vld [vmem:[#allocation2 + $0x430] ss:$28 sps:$4 sm:$0xff]   ;;  %v8503_v38 = vld [vmem:[#allocation2 + $0x23c] ss:$28 sps:$4 sm:$0xff]  }
  0xc2   :  { %2804 = vmatprep.subr.bf16.mxu1 %v8419_v39  ;;  %v8506_v39 = vld [vmem:[#allocation2 + $0x3fc] ss:$28 sps:$4 sm:$0xff]  }
  0xc4   :  { %2764 = vmatpush1.bf16.msra.mxu0 %v8414_v40  ;;  %v8501_v40 = vld [vmem:[#allocation2 + $0x238] ss:$28 sps:$4 sm:$0xff]  }
  0xc5   :  { %2805 = vmatpush1.bf16.msra.mxu1 %v8417_v41  ;;  %2765 = vmatprep.subr.bf16.mxu0 %v8422_v42  ;;  %v8504_v41 = vld [vmem:[#allocation2 + $0x3f8] ss:$28 sps:$4 sm:$0xff]   ;;  %v8509_v42 = vld [vmem:[#allocation2 + $0x204] ss:$28 sps:$4 sm:$0xff]  }
  0xc6   :  { %2831 = vmatprep.subr.bf16.mxu1 %v8425_v43  ;;  %v8512_v43 = vld [vmem:[#allocation2 + $0x3c4] ss:$28 sps:$4 sm:$0xff]  }
  0xc8   :  { %2823 = vmatmul.mubr.bf16.vlgmr.msra.gmra.mxu1 %v9743_v45  ;;  %2766 = vmatpush2.bf16.msra.mxu0 %v8420_v44  ;;  %v8507_v44 = vld [vmem:[#allocation2 + $0x200] ss:$28 sps:$4 sm:$0xff]  }
  0xc9   :  { %2832 = vmatpush1.bf16.msra.mxu1 %v8423_v46  ;;  %2767 = vmatprep.subr.bf16.mxu0 %v8429_v47  ;;  %v8510_v46 = vld [vmem:[#allocation2 + $0x3c0] ss:$28 sps:$4 sm:$0xff]   ;;  %v8515_v47 = vld [vmem:[#allocation2 + $0x1cc] ss:$28 sps:$4 sm:$0xff]  }
  0xca   :  { %2833 = vmatprep.subr.bf16.mxu1 %v8432_v49  ;;  %2863 = vmatprep.mubr.bf16.mxu1 %v9714_v48  ;;  %v8518_v49 = vld [vmem:[#allocation2 + $0x38c] ss:$28 sps:$4 sm:$0xff]  }
  0xcc   :  { %2768 = vmatpush2.bf16.msra.mxu0 %v8427_v50  ;;  %v8513_v50 = vld [vmem:[#allocation2 + $0x1c8] ss:$28 sps:$4 sm:$0xff]  }
  0xcd   :  { %2834 = vmatpush1.bf16.msra.mxu1 %v8430_v51  ;;  %2769 = vmatprep.subr.bf16.mxu0 %v8435_v53  ;;  %v8516_v51 = vld [vmem:[#allocation2 + $0x388] ss:$28 sps:$4 sm:$0xff]   ;;  %v8521_v53 = vld [vmem:[#allocation2 + $0x6d4] ss:$28 sps:$4 sm:$0xff]  }
  0xce   :  { %2835 = vmatprep.subr.bf16.mxu1 %v8438_v54  ;;  %v8524_v54 = vld [vmem:[#allocation2 + $0x894] ss:$28 sps:$4 sm:$0xff]  }
  0xd0   :  { %2770 = vmatpush2.bf16.msra.mxu0 %v8433_v55  ;;  %v8519_v55 = vld [vmem:[#allocation2 + $0x6d0] ss:$28 sps:$4 sm:$0xff]  }
  0xd1   :  { %2836 = vmatpush1.bf16.msra.mxu1 %v8436_v56  ;;  %2771 = vmatprep.subr.bf16.mxu0 %v8441_v57  ;;  %v8522_v56 = vld [vmem:[#allocation2 + $0x890] ss:$28 sps:$4 sm:$0xff]   ;;  %v8527_v57 = vld [vmem:[#allocation2 + $0x69c] ss:$28 sps:$4 sm:$0xff]  }
  0xd2   :  { %2837 = vmatprep.subr.bf16.mxu1 %v8444_v58  ;;  %v8530_v58 = vld [vmem:[#allocation2 + $0x85c] ss:$28 sps:$4 sm:$0xff]  }
  0xd4   :  { %2772 = vmatpush2.bf16.msra.mxu0 %v8439_v59  ;;  %v8525_v59 = vld [vmem:[#allocation2 + $0x698] ss:$28 sps:$4 sm:$0xff]  }
  0xd5   :  { %2838 = vmatpush1.bf16.msra.mxu1 %v8442_v60  ;;  %2773 = vmatprep.subr.bf16.mxu0 %v8447_v61  ;;  %v8528_v60 = vld [vmem:[#allocation2 + $0x858] ss:$28 sps:$4 sm:$0xff]   ;;  %v8533_v61 = vld [vmem:[#allocation2 + $0x664] ss:$28 sps:$4 sm:$0xff]  }
  0xd6   :  { %2839 = vmatprep.subr.bf16.mxu1 %v8450_v62  ;;  %v8536_v62 = vld [vmem:[#allocation2 + $0x824] ss:$28 sps:$4 sm:$0xff]  }
  0xd8   :  { %2774 = vmatpush2.bf16.msra.mxu0 %v8445_v63  ;;  %v8531_v63 = vld [vmem:[#allocation2 + $0x660] ss:$28 sps:$4 sm:$0xff]  }
  0xd9   :  { %2840 = vmatpush1.bf16.msra.mxu1 %v8448_v1  ;;  %2775 = vmatprep.subr.bf16.mxu0 %v8453_v2  ;;  %v8534_v1 = vld [vmem:[#allocation2 + $0x820] ss:$28 sps:$4 sm:$0xff]   ;;  %v8539_v2 = vld [vmem:[#allocation2 + $0x62c] ss:$28 sps:$4 sm:$0xff]  }
  0xda   :  { %2841 = vmatprep.subr.bf16.mxu1 %v8456_v3  ;;  %v8542_v3 = vld [vmem:[#allocation2 + $0x7ec] ss:$28 sps:$4 sm:$0xff]  }
  0xdc   :  { %2776 = vmatpush2.bf16.msra.mxu0 %v8451_v4  ;;  %v8537_v4 = vld [vmem:[#allocation2 + $0x628] ss:$28 sps:$4 sm:$0xff]  }
  0xdd   :  { %2842 = vmatpush1.bf16.msra.mxu1 %v8454_v5  ;;  %2777 = vmatprep.subr.bf16.mxu0 %v8459_v6  ;;  %v8540_v5 = vld [vmem:[#allocation2 + $0x7e8] ss:$28 sps:$4 sm:$0xff]   ;;  %v8545_v6 = vld [vmem:[#allocation2 + $0x5f4] ss:$28 sps:$4 sm:$0xff]  }
  0xde   :  { %2843 = vmatprep.subr.bf16.mxu1 %v8462_v7  ;;  %v8548_v7 = vld [vmem:[#allocation2 + $0x7b4] ss:$28 sps:$4 sm:$0xff]  }
  0xe0   :  { %2778 = vmatpush2.bf16.msra.mxu0 %v8457_v10  ;;  %v8543_v10 = vld [vmem:[#allocation2 + $0x5f0] ss:$28 sps:$4 sm:$0xff]  }
  0xe1   :  { %2844 = vmatpush1.bf16.msra.mxu1 %v8460_v11  ;;  %2779 = vmatprep.subr.bf16.mxu0 %v8465_v12  ;;  %v8546_v11 = vld [vmem:[#allocation2 + $0x7b0] ss:$28 sps:$4 sm:$0xff]   ;;  %v8551_v12 = vld [vmem:[#allocation2 + $0x5bc] ss:$28 sps:$4 sm:$0xff]  }
  0xe2   :  { %2845 = vmatprep.subr.bf16.mxu1 %v8468_v13  ;;  %v8554_v13 = vld [vmem:[#allocation2 + $0x77c] ss:$28 sps:$4 sm:$0xff]  }
  0xe4   :  { %2780 = vmatpush2.bf16.msra.mxu0 %v8463_v14  ;;  %v8549_v14 = vld [vmem:[#allocation2 + $0x5b8] ss:$28 sps:$4 sm:$0xff]  }
  0xe5   :  { %2846 = vmatpush1.bf16.msra.mxu1 %v8466_v15  ;;  %2872 = vmatprep.subr.bf16.mxu0 %v8476_v17  ;;  %v8552_v15 = vld [vmem:[#allocation2 + $0x778] ss:$28 sps:$4 sm:$0xff]   ;;  %v8560_v17 = vld [vmem:[#allocation2 + $0x744] ss:$28 sps:$4 sm:$0xff]  }
  0xe6   :  { %2847 = vmatprep.subr.bf16.mxu1 %v8473_v16  ;;  %v8557_v16 = vld [vmem:[#allocation2 + $0x584] ss:$28 sps:$4 sm:$0xff]  }
  0xe7   :  { %2782 = vmatmul.mubr.bf16.vlgmr.msra.gmra.mxu0 %v9749_v18 }
  0xe8   :  { %2873 = vmatpush1.bf16.msra.mxu0 %v8474_v20  ;;  %2904 = vmatprep.mubr.bf16.mxu0 %v9719_v52  ;;  %v8558_v20 = vld [vmem:[#allocation2 + $0x740] ss:$28 sps:$4 sm:$0xff]  }
  0xe9   :  { %2848 = vmatpush2.bf16.msra.mxu1 %v8471_v19  ;;  %2874 = vmatprep.subr.bf16.mxu0 %v8482_v22  ;;  %v8555_v19 = vld [vmem:[#allocation2 + $0x580] ss:$28 sps:$4 sm:$0xff]   ;;  %v8566_v22 = vld [vmem:[#allocation2 + $0x70c] ss:$28 sps:$4 sm:$0xff]  }
  0xea   :  { %2849 = vmatprep.subr.bf16.mxu1 %v8479_v21  ;;  %v8563_v21 = vld [vmem:[#allocation2 + $0x54c] ss:$28 sps:$4 sm:$0xff]  }
  0xec   :  { %2875 = vmatpush1.bf16.msra.mxu0 %v8480_v24  ;;  %v8564_v24 = vld [vmem:[#allocation2 + $0x708] ss:$28 sps:$4 sm:$0xff]  }
  0xed   :  { %2850 = vmatpush2.bf16.msra.mxu1 %v8477_v23  ;;  %2876 = vmatprep.subr.bf16.mxu0 %v8488_v26  ;;  %v8561_v23 = vld [vmem:[#allocation2 + $0x548] ss:$28 sps:$4 sm:$0xff]   ;;  %v8572_v26 = vld [vmem:[#allocation2 + $0xc14] ss:$28 sps:$4 sm:$0xff]  }
  0xee   :  { %2851 = vmatprep.subr.bf16.mxu1 %v8485_v25  ;;  %v8569_v25 = vld [vmem:[#allocation2 + $0xa54] ss:$28 sps:$4 sm:$0xff]  }
  0xf0   :  { %2877 = vmatpush1.bf16.msra.mxu0 %v8486_v28  ;;  %v8570_v28 = vld [vmem:[#allocation2 + $0xc10] ss:$28 sps:$4 sm:$0xff]  }
  0xf1   :  { %2852 = vmatpush2.bf16.msra.mxu1 %v8483_v27  ;;  %2878 = vmatprep.subr.bf16.mxu0 %v8494_v30  ;;  %v8567_v27 = vld [vmem:[#allocation2 + $0xa50] ss:$28 sps:$4 sm:$0xff]   ;;  %v8578_v30 = vld [vmem:[#allocation2 + $0xbdc] ss:$28 sps:$4 sm:$0xff]  }
  0xf2   :  { %2853 = vmatprep.subr.bf16.mxu1 %v8491_v29  ;;  %v8575_v29 = vld [vmem:[#allocation2 + $0xa1c] ss:$28 sps:$4 sm:$0xff]  }
  0xf4   :  { %2879 = vmatpush1.bf16.msra.mxu0 %v8492_v32  ;;  %v8576_v32 = vld [vmem:[#allocation2 + $0xbd8] ss:$28 sps:$4 sm:$0xff]  }
  0xf5   :  { %2854 = vmatpush2.bf16.msra.mxu1 %v8489_v31  ;;  %2880 = vmatprep.subr.bf16.mxu0 %v8500_v34  ;;  %v8573_v31 = vld [vmem:[#allocation2 + $0xa18] ss:$28 sps:$4 sm:$0xff]   ;;  %v8584_v34 = vld [vmem:[#allocation2 + $0xba4] ss:$28 sps:$4 sm:$0xff]  }
  0xf6   :  { %2855 = vmatprep.subr.bf16.mxu1 %v8497_v33  ;;  %v8581_v33 = vld [vmem:[#allocation2 + $0x9e4] ss:$28 sps:$4 sm:$0xff]  }
  0xf8   :  { %2881 = vmatpush1.bf16.msra.mxu0 %v8498_v37  ;;  %v8582_v37 = vld [vmem:[#allocation2 + $0xba0] ss:$28 sps:$4 sm:$0xff]  }
  0xf9   :  { %2856 = vmatpush2.bf16.msra.mxu1 %v8495_v35  ;;  %2882 = vmatprep.subr.bf16.mxu0 %v8506_v39  ;;  %v8579_v35 = vld [vmem:[#allocation2 + $0x9e0] ss:$28 sps:$4 sm:$0xff]   ;;  %v8590_v39 = vld [vmem:[#allocation2 + $0xb6c] ss:$28 sps:$4 sm:$0xff]  }
  0xfa   :  { %2857 = vmatprep.subr.bf16.mxu1 %v8503_v38  ;;  %v8587_v38 = vld [vmem:[#allocation2 + $0x9ac] ss:$28 sps:$4 sm:$0xff]  }
  0xfc   :  { %2883 = vmatpush1.bf16.msra.mxu0 %v8504_v41  ;;  %v8588_v41 = vld [vmem:[#allocation2 + $0xb68] ss:$28 sps:$4 sm:$0xff]  }
  0xfd   :  { %2858 = vmatpush2.bf16.msra.mxu1 %v8501_v40  ;;  %2884 = vmatprep.subr.bf16.mxu0 %v8512_v43  ;;  %v8585_v40 = vld [vmem:[#allocation2 + $0x9a8] ss:$28 sps:$4 sm:$0xff]   ;;  %v8596_v43 = vld [vmem:[#allocation2 + $0xb34] ss:$28 sps:$4 sm:$0xff]  }
  0xfe   :  { %2859 = vmatprep.subr.bf16.mxu1 %v8509_v42  ;;  %v8593_v42 = vld [vmem:[#allocation2 + $0x974] ss:$28 sps:$4 sm:$0xff]  }
 0x100   :  { %2885 = vmatpush1.bf16.msra.mxu0 %v8510_v46  ;;  %v8594_v46 = vld [vmem:[#allocation2 + $0xb30] ss:$28 sps:$4 sm:$0xff]  }
 0x101   :  { %2860 = vmatpush2.bf16.msra.mxu1 %v8507_v44  ;;  %2886 = vmatprep.subr.bf16.mxu0 %v8518_v49  ;;  %v8591_v44 = vld [vmem:[#allocation2 + $0x970] ss:$28 sps:$4 sm:$0xff]   ;;  %v8602_v49 = vld [vmem:[#allocation2 + $0xafc] ss:$28 sps:$4 sm:$0xff]  }
 0x102   :  { %2861 = vmatprep.subr.bf16.mxu1 %v8515_v47  ;;  %v8599_v47 = vld [vmem:[#allocation2 + $0x93c] ss:$28 sps:$4 sm:$0xff]  }
 0x104   :  { %2887 = vmatpush1.bf16.msra.mxu0 %v8516_v51  ;;  %v8600_v51 = vld [vmem:[#allocation2 + $0xaf8] ss:$28 sps:$4 sm:$0xff]  }
 0x105   :  { %2862 = vmatpush2.bf16.msra.mxu1 %v8513_v50  ;;  %2888 = vmatprep.subr.bf16.mxu0 %v8521_v53  ;;  %v8597_v50 = vld [vmem:[#allocation2 + $0x938] ss:$28 sps:$4 sm:$0xff]   ;;  %v8605_v53 = vld [vmem:[#allocation2 + $0x904] ss:$28 sps:$4 sm:$0xff]  }
 0x106   :  { %2913 = vmatprep.subr.bf16.mxu1 %v8524_v54  ;;  %v8608_v54 = vld [vmem:[#allocation2 + $0xac4] ss:$28 sps:$4 sm:$0xff]  }
 0x108   :  { %2864 = vmatmul.mubr.bf16.vlgmr.msra.gmra.mxu1 %v9723_v8  ;;  %2889 = vmatpush2.bf16.msra.mxu0 %v8519_v55  ;;  %v8603_v55 = vld [vmem:[#allocation2 + $0x900] ss:$28 sps:$4 sm:$0xff]  }
 0x109   :  { %2914 = vmatpush1.bf16.msra.mxu1 %v8522_v56  ;;  %2890 = vmatprep.subr.bf16.mxu0 %v8527_v57  ;;  %v8606_v56 = vld [vmem:[#allocation2 + $0xac0] ss:$28 sps:$4 sm:$0xff]   ;;  %v8611_v57 = vld [vmem:[#allocation2 + $0x8cc] ss:$28 sps:$4 sm:$0xff]  }
 0x10a   :  { %2915 = vmatprep.subr.bf16.mxu1 %v8530_v58  ;;  %2945 = vmatprep.mubr.bf16.mxu1 %v9737_v36  ;;  %v8614_v58 = vld [vmem:[#allocation2 + $0xa8c] ss:$28 sps:$4 sm:$0xff]  }
 0x10c   :  { %2891 = vmatpush2.bf16.msra.mxu0 %v8525_v59  ;;  %v8609_v59 = vld [vmem:[#allocation2 + $0x8c8] ss:$28 sps:$4 sm:$0xff]  }
 0x10d   :  { %2916 = vmatpush1.bf16.msra.mxu1 %v8528_v60  ;;  %2892 = vmatprep.subr.bf16.mxu0 %v8533_v61  ;;  %v8612_v60 = vld [vmem:[#allocation2 + $0xa88] ss:$28 sps:$4 sm:$0xff]   ;;  %v8617_v61 = vld [vmem:[#allocation2 + $0x19c] ss:$28 sps:$4 sm:$0xff]  }
 0x10e   :  { %2917 = vmatprep.subr.bf16.mxu1 %v8536_v62  ;;  %v8620_v62 = vld [vmem:[#allocation2 + $0x51c] ss:$28 sps:$4 sm:$0xff]  }
 0x110   :  { %2893 = vmatpush2.bf16.msra.mxu0 %v8531_v63  ;;  %v8615_v63 = vld [vmem:[#allocation2 + $0x198] ss:$28 sps:$4 sm:$0xff]  }
 0x111   :  { %2918 = vmatpush1.bf16.msra.mxu1 %v8534_v1  ;;  %2894 = vmatprep.subr.bf16.mxu0 %v8539_v2  ;;  %v8618_v1 = vld [vmem:[#allocation2 + $0x518] ss:$28 sps:$4 sm:$0xff]   ;;  %v8623_v2 = vld [vmem:[#allocation2 + $0x164] ss:$28 sps:$4 sm:$0xff]  }
 0x112   :  { %2919 = vmatprep.subr.bf16.mxu1 %v8542_v3  ;;  %v8626_v3 = vld [vmem:[#allocation2 + $0x4e4] ss:$28 sps:$4 sm:$0xff]  }
 0x114   :  { %2895 = vmatpush2.bf16.msra.mxu0 %v8537_v4  ;;  %v8621_v4 = vld [vmem:[#allocation2 + $0x160] ss:$28 sps:$4 sm:$0xff]  }
 0x115   :  { %2920 = vmatpush1.bf16.msra.mxu1 %v8540_v5  ;;  %2896 = vmatprep.subr.bf16.mxu0 %v8545_v6  ;;  %v8624_v5 = vld [vmem:[#allocation2 + $0x4e0] ss:$28 sps:$4 sm:$0xff]   ;;  %v8629_v6 = vld [vmem:[#allocation2 + $0x12c] ss:$28 sps:$4 sm:$0xff]  }
 0x116   :  { %2921 = vmatprep.subr.bf16.mxu1 %v8548_v7  ;;  %v8632_v7 = vld [vmem:[#allocation2 + $0x4ac] ss:$28 sps:$4 sm:$0xff]  }
 0x118   :  { %2897 = vmatpush2.bf16.msra.mxu0 %v8543_v10  ;;  %v8627_v10 = vld [vmem:[#allocation2 + $0x128] ss:$28 sps:$4 sm:$0xff]  }
 0x119   :  { %2922 = vmatpush1.bf16.msra.mxu1 %v8546_v11  ;;  %2898 = vmatprep.subr.bf16.mxu0 %v8551_v12  ;;  %v8630_v11 = vld [vmem:[#allocation2 + $0x4a8] ss:$28 sps:$4 sm:$0xff]   ;;  %v591_v12 = vlaneseq }
 0x11a   :  { %2923 = vmatprep.subr.bf16.mxu1 %v8554_v13  ;;  %v8635_v13 = vld [vmem:[#allocation2 + $0xf4] ss:$28 sps:$4 sm:$0xff]  }
 0x11c   :  { %2899 = vmatpush2.bf16.msra.mxu0 %v8549_v14  ;;  %v8633_v14 = vld [vmem:[#allocation2 + $0xf0] ss:$28 sps:$4 sm:$0xff]  }
 0x11d   :  { %2924 = vmatpush1.bf16.msra.mxu1 %v8552_v15  ;;  %2900 = vmatprep.subr.bf16.mxu0 %v8557_v16  ;;  %v9761_v15 = vshrl.u32 %v591_v12, 7  ;;  %v8636_v16 = vld [vmem:[#allocation2 + $0x470] ss:$28 sps:$4 sm:$0xff]   ;;  %v8687_v12 = vld [vmem:[#allocation2 + $0x278] ss:$28 sps:$4 sm:$0xff]  }
 0x11e   :  { %2925 = vmatprep.subr.bf16.mxu1 %v8560_v17  ;;  %v8641_v17 = vld [vmem:[#allocation2 + $0xbc] ss:$28 sps:$4 sm:$0xff]  }
 0x120   :  { %2901 = vmatpush2.bf16.msra.mxu0 %v8555_v19  ;;  %v8644_v19 = vld [vmem:[#allocation2 + $0x43c] ss:$28 sps:$4 sm:$0xff]  }
 0x121   :  { %2926 = vmatpush1.bf16.msra.mxu1 %v8558_v20  ;;  %2902 = vmatprep.subr.bf16.mxu0 %v8563_v21  ;;  %v8639_v20 = vld [vmem:[#allocation2 + $0xb8] ss:$28 sps:$4 sm:$0xff]  }
 0x122   :  { %2927 = vmatprep.subr.bf16.mxu1 %v8566_v22  ;;  %v8642_v21 = vld [vmem:[#allocation2 + $0x438] ss:$28 sps:$4 sm:$0xff]   ;;  %v9764_v22 = vsub.s32 0, %v9761_v15 }
 0x124   :  { %2903 = vmatpush2.bf16.msra.mxu0 %v8561_v23  ;;  %v8647_v23 = vld [vmem:[#allocation2 + $0x84] ss:$28 sps:$4 sm:$0xff]  }
 0x125   :  { %2928 = vmatpush1.bf16.msra.mxu1 %v8564_v24  ;;  %2954 = vmatprep.subr.bf16.mxu0 %v8572_v26  ;;  %v8650_v24 = vld [vmem:[#allocation2 + $0x404] ss:$28 sps:$4 sm:$0xff]  }
 0x126   :  { %2929 = vmatprep.subr.bf16.mxu1 %v8569_v25  ;;  %v8645_v25 = vld [vmem:[#allocation2 + $0x80] ss:$28 sps:$4 sm:$0xff]  }
 0x127   :  { %2905 = vmatmul.mubr.bf16.vlgmr.msra.gmra.mxu0 %v9725_v9  ;;  %v8648_v26 = vld [vmem:[#allocation2 + $0x400] ss:$28 sps:$4 sm:$0xff]  }
 0x128   :  { %2955 = vmatpush1.bf16.msra.mxu0 %v8570_v28  ;;  %2986 = vmatprep.mubr.bf16.mxu0 %v9614_v0  ;;  %v8656_v28 = vld [vmem:[#allocation2 + $0x3cc] ss:$28 sps:$4 sm:$0xff]  }
 0x129   :  { %2930 = vmatpush2.bf16.msra.mxu1 %v8567_v27  ;;  %2956 = vmatprep.subr.bf16.mxu0 %v8578_v30  ;;  %v8653_v27 = vld [vmem:[#allocation2 + $0x4c] ss:$28 sps:$4 sm:$0xff]  }
 0x12a   :  { %2931 = vmatprep.subr.bf16.mxu1 %v8575_v29  ;;  %v8651_v29 = vld [vmem:[#allocation2 + $0x48] ss:$28 sps:$4 sm:$0xff]  }
 0x12b   :  { %v8654_v30 = vld [vmem:[#allocation2 + $0x3c8] ss:$28 sps:$4 sm:$0xff]  }
 0x12c   :  { %2957 = vmatpush1.bf16.msra.mxu0 %v8576_v32  ;;  %v8662_v32 = vld [vmem:[#allocation2 + $0x394] ss:$28 sps:$4 sm:$0xff]  }
 0x12d   :  { %2932 = vmatpush2.bf16.msra.mxu1 %v8573_v31  ;;  %2958 = vmatprep.subr.bf16.mxu0 %v8584_v34  ;;  %v8659_v31 = vld [vmem:[#allocation2 + $0x14] ss:$28 sps:$4 sm:$0xff]  }
 0x12e   :  { %2933 = vmatprep.subr.bf16.mxu1 %v8581_v33  ;;  %v8657_v33 = vld [vmem:[#allocation2 + $0x10] ss:$28 sps:$4 sm:$0xff]  }
 0x12f   :  { %v8660_v34 = vld [vmem:[#allocation2 + $0x390] ss:$28 sps:$4 sm:$0xff]  }
 0x130   :  { %2959 = vmatpush1.bf16.msra.mxu0 %v8582_v37  ;;  %v9767_v37 = vsub.s32 1, %v9761_v15 }
 0x131   :  { %2934 = vmatpush2.bf16.msra.mxu1 %v8579_v35  ;;  %2960 = vmatprep.subr.bf16.mxu0 %v8590_v39  ;;  %v589_v35 = vld [vmem:[#allocation4] sm:$0xff]  ;;  %v8668_v39 = vld [vmem:[#allocation2 + $0x6dc] ss:$28 sps:$4 sm:$0xff]  }
 0x132   :  { %2935 = vmatprep.subr.bf16.mxu1 %v8587_v38  ;;  %v8665_v38 = vld [vmem:[#allocation2 + $0x35c] ss:$28 sps:$4 sm:$0xff]  }
 0x134   :  { %2961 = vmatpush1.bf16.msra.mxu0 %v8588_v41  ;;  %v8666_v41 = vld [vmem:[#allocation2 + $0x6d8] ss:$28 sps:$4 sm:$0xff]  }
 0x135   :  { %2936 = vmatpush2.bf16.msra.mxu1 %v8585_v40  ;;  %2962 = vmatprep.subr.bf16.mxu0 %v8596_v43  ;;  %v8663_v40 = vld [vmem:[#allocation2 + $0x358] ss:$28 sps:$4 sm:$0xff]   ;;  %v8671_v43 = vld [vmem:[#allocation2 + $0x324] ss:$28 sps:$4 sm:$0xff]  }
 0x136   :  { %2937 = vmatprep.subr.bf16.mxu1 %v8593_v42  ;;  %v594_v42 = vrot.slane %v589_v35, %v9764_v22 }
 0x138   :  { %2963 = vmatpush1.bf16.msra.mxu0 %v8594_v46  ;;  %v598_v46 = vrot.slane %v589_v35, %v9767_v37  ;;  %v8717_v35 = vld [vmem:[#allocation2 + $0x860] ss:$28 sps:$4 sm:$0xff]  }
 0x139   :  { %2938 = vmatpush2.bf16.msra.mxu1 %v8591_v44  ;;  %2964 = vmatprep.subr.bf16.mxu0 %v8602_v49  ;;  %v8674_v44 = vld [vmem:[#allocation2 + $0x6a4] ss:$28 sps:$4 sm:$0xff]  }
 0x13a   :  { %2939 = vmatprep.subr.bf16.mxu1 %v8599_v47  ;;  %v8669_v47 = vld [vmem:[#allocation2 + $0x320] ss:$28 sps:$4 sm:$0xff]  }
 0x13c   :  { %2965 = vmatpush1.bf16.msra.mxu0 %v8600_v51  ;;  %v8672_v51 = vld [vmem:[#allocation2 + $0x6a0] ss:$28 sps:$4 sm:$0xff]  }
 0x13d   :  { %2940 = vmatpush2.bf16.msra.mxu1 %v8597_v50  ;;  %2966 = vmatprep.subr.bf16.mxu0 %v8608_v54  ;;  %v8677_v54 = vld [vmem:[#allocation2 + $0x2ec] ss:$28 sps:$4 sm:$0xff]  }
 0x13e   :  { %2941 = vmatprep.subr.bf16.mxu1 %v8605_v53 }
 0x140   :  { %2967 = vmatpush1.bf16.msra.mxu0 %v8606_v56 }
 0x141   :  { %2942 = vmatpush2.bf16.msra.mxu1 %v8603_v55  ;;  %2968 = vmatprep.subr.bf16.mxu0 %v8614_v58 }
 0x142   :  { %2943 = vmatprep.subr.bf16.mxu1 %v8611_v57  ;;  %v8680_v57 = vld [vmem:[#allocation2 + $0x66c] ss:$28 sps:$4 sm:$0xff]  }
 0x144   :  { %2969 = vmatpush1.bf16.msra.mxu0 %v8612_v60  ;;  %v8675_v60 = vld [vmem:[#allocation2 + $0x2e8] ss:$28 sps:$4 sm:$0xff]  }
 0x145   :  { %2944 = vmatpush2.bf16.msra.mxu1 %v8609_v59  ;;  %2995 = vmatprep.subr.bf16.mxu0 %v8617_v61 }
 0x146   :  { %3036 = vmatprep.subr.bf16.mxu1 %v8620_v62  ;;  %v8678_v62 = vld [vmem:[#allocation2 + $0x668] ss:$28 sps:$4 sm:$0xff]  }
 0x147   :  { %2987 = vmatmul.mubr.bf16.vlgmr.msra.gmra.mxu0 %v9743_v45  ;;  %v8638_v45 = vld [vmem:[#allocation2 + $0x474] ss:$28 sps:$4 sm:$0xff]  }
 0x148   :  { %2946 = vmatmul.mubr.bf16.vlgmr.msra.gmra.mxu1 %v9749_v18  ;;  %2996 = vmatpush1.bf16.msra.mxu0 %v8615_v63 }
 0x149   :  { %3037 = vmatpush1.bf16.msra.mxu1 %v8618_v1  ;;  %2997 = vmatprep.subr.bf16.mxu0 %v8623_v2  ;;  %v8683_v2 = vld [vmem:[#allocation2 + $0x2b4] ss:$28 sps:$4 sm:$0xff]  }
 0x14a   :  { %3038 = vmatprep.subr.bf16.mxu1 %v8626_v3  ;;  %3027 = vmatprep.mubr.bf16.mxu0 %v9714_v48 }
 0x14b   :  { %3068 = vmatprep.mubr.bf16.mxu1 %v9719_v52 }
 0x14c   :  { %2998 = vmatpush1.bf16.msra.mxu0 %v8621_v4  ;;  %v8686_v4 = vld [vmem:[#allocation2 + $0x634] ss:$28 sps:$4 sm:$0xff]  }
 0x14d   :  { %3039 = vmatpush1.bf16.msra.mxu1 %v8624_v5  ;;  %2999 = vmatprep.subr.bf16.mxu0 %v8629_v6  ;;  %v8681_v6 = vld [vmem:[#allocation2 + $0x2b0] ss:$28 sps:$4 sm:$0xff]  }
 0x14e   :  { %3040 = vmatprep.subr.bf16.mxu1 %v8632_v7  ;;  %v8684_v7 = vld [vmem:[#allocation2 + $0x630] ss:$28 sps:$4 sm:$0xff]  }
 0x150   :  { %3000 = vmatpush1.bf16.msra.mxu0 %v8627_v10  ;;  %v8689_v10 = vld [vmem:[#allocation2 + $0x27c] ss:$28 sps:$4 sm:$0xff]  }
 0x151   :  { %3041 = vmatpush1.bf16.msra.mxu1 %v8630_v11  ;;  %3001 = vmatprep.subr.bf16.mxu0 %v8635_v13  ;;  %v8692_v11 = vld [vmem:[#allocation2 + $0x5fc] ss:$28 sps:$4 sm:$0xff]  }
 0x152   :  { %3042 = vmatprep.subr.bf16.mxu1 %v8638_v45  ;;  %v8690_v13 = vld [vmem:[#allocation2 + $0x5f8] ss:$28 sps:$4 sm:$0xff]   ;;  %v8695_v45 = vld [vmem:[#allocation2 + $0x244] ss:$28 sps:$4 sm:$0xff]  }
 0x154   :  { %3002 = vmatpush1.bf16.msra.mxu0 %v8633_v14  ;;  %v8698_v14 = vld [vmem:[#allocation2 + $0x5c4] ss:$28 sps:$4 sm:$0xff]  }
 0x155   :  { %3043 = vmatpush1.bf16.msra.mxu1 %v8636_v16  ;;  %3003 = vmatprep.subr.bf16.mxu0 %v8641_v17  ;;  %v8693_v16 = vld [vmem:[#allocation2 + $0x240] ss:$28 sps:$4 sm:$0xff]  }
 0x156   :  { %3044 = vmatprep.subr.bf16.mxu1 %v8644_v19  ;;  %v8696_v17 = vld [vmem:[#allocation2 + $0x5c0] ss:$28 sps:$4 sm:$0xff]   ;;  %v8701_v19 = vld [vmem:[#allocation2 + $0x20c] ss:$28 sps:$4 sm:$0xff]  }
 0x158   :  { %3004 = vmatpush1.bf16.msra.mxu0 %v8639_v20  ;;  %v8704_v20 = vld [vmem:[#allocation2 + $0x58c] ss:$28 sps:$4 sm:$0xff]  }
 0x159   :  { %3045 = vmatpush1.bf16.msra.mxu1 %v8642_v21  ;;  %3005 = vmatprep.subr.bf16.mxu0 %v8647_v23  ;;  %v8699_v21 = vld [vmem:[#allocation2 + $0x208] ss:$28 sps:$4 sm:$0xff]  }
 0x15a   :  { %3046 = vmatprep.subr.bf16.mxu1 %v8650_v24  ;;  %v8702_v23 = vld [vmem:[#allocation2 + $0x588] ss:$28 sps:$4 sm:$0xff]   ;;  %v8707_v24 = vld [vmem:[#allocation2 + $0x1d4] ss:$28 sps:$4 sm:$0xff]  }
 0x15c   :  { %3006 = vmatpush1.bf16.msra.mxu0 %v8645_v25  ;;  %v8710_v25 = vld [vmem:[#allocation2 + $0x554] ss:$28 sps:$4 sm:$0xff]  }
 0x15d   :  { %3047 = vmatpush1.bf16.msra.mxu1 %v8648_v26  ;;  %3007 = vmatprep.subr.bf16.mxu0 %v8653_v27  ;;  %v8705_v26 = vld [vmem:[#allocation2 + $0x1d0] ss:$28 sps:$4 sm:$0xff]  }
 0x15e   :  { %3048 = vmatprep.subr.bf16.mxu1 %v8656_v28  ;;  %v8708_v27 = vld [vmem:[#allocation2 + $0x550] ss:$28 sps:$4 sm:$0xff]   ;;  %v8713_v28 = vld [vmem:[#allocation2 + $0x89c] ss:$28 sps:$4 sm:$0xff]  }
 0x160   :  { %3008 = vmatpush1.bf16.msra.mxu0 %v8651_v29  ;;  %v8716_v29 = vld [vmem:[#allocation2 + $0xc1c] ss:$28 sps:$4 sm:$0xff]  }
 0x161   :  { %3049 = vmatpush1.bf16.msra.mxu1 %v8654_v30  ;;  %3009 = vmatprep.subr.bf16.mxu0 %v8659_v31  ;;  %v8711_v30 = vld [vmem:[#allocation2 + $0x898] ss:$28 sps:$4 sm:$0xff]  }
 0x162   :  { %3050 = vmatprep.subr.bf16.mxu1 %v8662_v32  ;;  %v8714_v31 = vld [vmem:[#allocation2 + $0xc18] ss:$28 sps:$4 sm:$0xff]   ;;  %v8719_v32 = vld [vmem:[#allocation2 + $0x864] ss:$28 sps:$4 sm:$0xff]  }
 0x164   :  { %3010 = vmatpush1.bf16.msra.mxu0 %v8657_v33  ;;  %v8722_v33 = vld [vmem:[#allocation2 + $0xbe4] ss:$28 sps:$4 sm:$0xff]  }
 0x165   :  { %3051 = vmatpush1.bf16.msra.mxu1 %v8660_v34  ;;  %3011 = vmatprep.subr.bf16.mxu0 %v8665_v38  ;;  %v8720_v38 = vld [vmem:[#allocation2 + $0xbe0] ss:$28 sps:$4 sm:$0xff]  }
 0x166   :  { %3052 = vmatprep.subr.bf16.mxu1 %v8668_v39  ;;  %v8725_v39 = vld [vmem:[#allocation2 + $0x82c] ss:$28 sps:$4 sm:$0xff]  }
 0x167   :  { %v2701_v49 = vpop.f32.mrf.mxu0 }
 0x168   :  { %v2742_v50 = vpop.f32.mrf.mxu1  ;;  %v2702_v53 = vadd.f32 %v2701_v49, %v594_v42  ;;  %3012 = vmatpush2.bf16.msra.mxu0 %v8663_v40  ;;  %v8728_v40 = vld [vmem:[#allocation2 + $0xbac] ss:$28 sps:$4 sm:$0xff]  }
 0x169   :  { %3053 = vmatpush2.bf16.msra.mxu1 %v8666_v41  ;;  %v2703_v55 = vpop.f32.mrf.mxu0  ;;  %3013 = vmatprep.subr.bf16.mxu0 %v8671_v43  ;;  %v8723_v42 = vld [vmem:[#allocation2 + $0x828] ss:$28 sps:$4 sm:$0xff]  }
 0x16a   :  { %v2744_v56 = vpop.f32.mrf.mxu1  ;;  %3054 = vmatprep.subr.bf16.mxu1 %v8674_v44  ;;  %v2704_v58 = vadd.f32 %v2703_v55, %v598_v46  ;;  %v9771_v59 = vadd.f32 %v2742_v50, %v2702_v53  ;;  %v8726_v43 = vld [vmem:[#allocation2 + $0xba8] ss:$28 sps:$4 sm:$0xff]   ;;  %v8731_v46 = vld [vmem:[#allocation2 + $0x7f4] ss:$28 sps:$4 sm:$0xff]   ;;  %v8737_v53 = vld [vmem:[#allocation2 + $0x7bc] ss:$28 sps:$4 sm:$0xff]  }
 0x16b   :  { %v2705_v61 = vpop.f32.mrf.mxu0  ;;  %v8729_v50 = vld [vmem:[#allocation2 + $0x7f0] ss:$28 sps:$4 sm:$0xff]   ;;  %v8735_v55 = vld [vmem:[#allocation2 + $0x7b8] ss:$28 sps:$4 sm:$0xff]  }
 0x16c   :  { %v2746_v63 = vpop.f32.mrf.mxu1  ;;  %v9773_v1 = vadd.f32 %v2744_v56, %v2704_v58  ;;  %3014 = vmatpush2.bf16.msra.mxu0 %v8669_v47  ;;  %v8734_v47 = vld [vmem:[#allocation2 + $0xb74] ss:$28 sps:$4 sm:$0xff]   ;;  %v8746_v58 = vld [vmem:[#allocation2 + $0xb04] ss:$28 sps:$4 sm:$0xff]  }
 0x16d   :  { %3055 = vmatpush2.bf16.msra.mxu1 %v8672_v51  ;;  %v2706_v3 = vpop.f32.mrf.mxu0  ;;  %3015 = vmatprep.subr.bf16.mxu0 %v8677_v54  ;;  %v8732_v51 = vld [vmem:[#allocation2 + $0xb70] ss:$28 sps:$4 sm:$0xff]   ;;  %v8740_v54 = vld [vmem:[#allocation2 + $0xb3c] ss:$28 sps:$4 sm:$0xff]  }
 0x16e   :  { %3056 = vmatprep.subr.bf16.mxu1 %v8680_v57  ;;  %v2747_v5 = vpop.f32.mrf.mxu1  ;;  %v8738_v56 = vld [vmem:[#allocation2 + $0xb38] ss:$28 sps:$4 sm:$0xff]   ;;  %v8743_v57 = vld [vmem:[#allocation2 + $0x784] ss:$28 sps:$4 sm:$0xff]   ;;  %v8752_v63 = vld [vmem:[#allocation2 + $0xacc] ss:$28 sps:$4 sm:$0xff]  }
 0x16f   :  { %v8744_v61 = vld [vmem:[#allocation2 + $0xb00] ss:$28 sps:$4 sm:$0xff]   ;;  %v8750_v3 = vld [vmem:[#allocation2 + $0xac8] ss:$28 sps:$4 sm:$0xff]   ;;  %v8758_v5 = vld [vmem:[#allocation2 + $0xa94] ss:$28 sps:$4 sm:$0xff]  }
 0x170   :  { %3016 = vmatpush2.bf16.msra.mxu0 %v8675_v60  ;;  %v8741_v60 = vld [vmem:[#allocation2 + $0x780] ss:$28 sps:$4 sm:$0xff]  }
 0x171   :  { %3057 = vmatpush2.bf16.msra.mxu1 %v8678_v62  ;;  %3017 = vmatprep.subr.bf16.mxu0 %v8683_v2  ;;  %v8749_v62 = vld [vmem:[#allocation2 + $0x74c] ss:$28 sps:$4 sm:$0xff]  }
 0x172   :  { %3058 = vmatprep.subr.bf16.mxu1 %v8686_v4  ;;  %v8747_v2 = vld [vmem:[#allocation2 + $0x748] ss:$28 sps:$4 sm:$0xff]   ;;  %v8755_v4 = vld [vmem:[#allocation2 + $0x714] ss:$28 sps:$4 sm:$0xff]  }
 0x174   :  { %3018 = vmatpush2.bf16.msra.mxu0 %v8681_v6  ;;  %v8753_v6 = vld [vmem:[#allocation2 + $0x710] ss:$28 sps:$4 sm:$0xff]  }
 0x175   :  { %3059 = vmatpush2.bf16.msra.mxu1 %v8684_v7  ;;  %3019 = vmatprep.subr.bf16.mxu0 %v8689_v10  ;;  %v8756_v7 = vld [vmem:[#allocation2 + $0xa90] ss:$28 sps:$4 sm:$0xff]   ;;  %v8761_v10 = vld [vmem:[#allocation2 + $0xa5c] ss:$28 sps:$4 sm:$0xff]  }
 0x176   :  { %3060 = vmatprep.subr.bf16.mxu1 %v8692_v11  ;;  %v8762_v11 = vld [vmem:[#allocation2 + $0x360] ss:$28 sps:$4 sm:$0xff]  }
 0x178   :  { %3020 = vmatpush2.bf16.msra.mxu0 %v8687_v12  ;;  %v8759_v12 = vld [vmem:[#allocation2 + $0xa58] ss:$28 sps:$4 sm:$0xff]  }
 0x179   :  { %3061 = vmatpush2.bf16.msra.mxu1 %v8690_v13  ;;  %3021 = vmatprep.subr.bf16.mxu0 %v8695_v45  ;;  %v8763_v13 = vld [vmem:[#allocation2 + $0x1a0] ss:$28 sps:$4 sm:$0xff]  }
 0x17a   :  { %3062 = vmatprep.subr.bf16.mxu1 %v8698_v14  ;;  %v8766_v45 = vld [vmem:[#allocation2 + $0xa24] ss:$28 sps:$4 sm:$0xff]  }
 0x17b   :  { %v8767_v14 = vld [vmem:[#allocation2 + $0x328] ss:$28 sps:$4 sm:$0xff]  }
 0x17c   :  { %3022 = vmatpush2.bf16.msra.mxu0 %v8693_v16  ;;  %v8764_v16 = vld [vmem:[#allocation2 + $0xa20] ss:$28 sps:$4 sm:$0xff]  }
 0x17d   :  { %3063 = vmatpush2.bf16.msra.mxu1 %v8696_v17  ;;  %3023 = vmatprep.subr.bf16.mxu0 %v8701_v19  ;;  %v8768_v17 = vld [vmem:[#allocation2 + $0x168] ss:$28 sps:$4 sm:$0xff]  }
 0x17e   :  { %3064 = vmatprep.subr.bf16.mxu1 %v8704_v20  ;;  %v9429_v20 = vld [vmem:[%s10059_s0 + $0x18] ss:$0 sps:$4 sm:$0xff]  }
 0x180   :  { %3024 = vmatpush2.bf16.msra.mxu0 %v8699_v21  ;;  %v8771_v21 = vld [vmem:[#allocation2 + $0x9ec] ss:$28 sps:$4 sm:$0xff]  }
 0x181   :  { %3065 = vmatpush2.bf16.msra.mxu1 %v8702_v23  ;;  %3025 = vmatprep.subr.bf16.mxu0 %v8707_v24  ;;  %v8772_v23 = vld [vmem:[#allocation2 + $0x2f0] ss:$28 sps:$4 sm:$0xff]  }
 0x182   :  { %3066 = vmatprep.subr.bf16.mxu1 %v8710_v25 }
 0x184   :  { %3026 = vmatpush2.bf16.msra.mxu0 %v8705_v26 }
 0x185   :  { %3067 = vmatpush2.bf16.msra.mxu1 %v8708_v27  ;;  %3077 = vmatprep.subr.bf16.mxu0 %v8713_v28  ;;  %v8769_v28 = vld [vmem:[#allocation2 + $0x9e8] ss:$28 sps:$4 sm:$0xff]  }
 0x186   :  { %3118 = vmatprep.subr.bf16.mxu1 %v8716_v29  ;;  %v8773_v29 = vld [vmem:[#allocation2 + $0x130] ss:$28 sps:$4 sm:$0xff]  }
 0x187   :  { %3028 = vmatmul.mubr.bf16.vlgmr.msra.gmra.mxu0 %v9723_v8 }
 0x188   :  { %3069 = vmatmul.mubr.bf16.vlgmr.msra.gmra.mxu1 %v9725_v9  ;;  %v9777_v34 = vpop.f32.mrf.mxu1  ;;  %3078 = vmatpush1.bf16.msra.mxu0 %v8711_v30 }
 0x189   :  { %3119 = vmatpush1.bf16.msra.mxu1 %v8714_v31  ;;  %3079 = vmatprep.subr.bf16.mxu0 %v8719_v32  ;;  %v8776_v31 = vld [vmem:[#allocation2 + $0x9b4] ss:$28 sps:$4 sm:$0xff]  }
 0x18a   :  { %3120 = vmatprep.subr.bf16.mxu1 %v8722_v33  ;;  %v9779_v41 = vpop.f32.mrf.mxu1  ;;  %3150 = vmatprep.mubr.bf16.mxu1 %v9614_v0  ;;  %v8777_v32 = vld [vmem:[#allocation2 + $0x2b8] ss:$28 sps:$4 sm:$0xff]  }
 0x18b   :  { %3109 = vmatprep.mubr.bf16.mxu0 %v9737_v36 }
 0x18c   :  { %v2828_v44 = vpop.f32.mrf.mxu1  ;;  %3080 = vmatpush1.bf16.msra.mxu0 %v8717_v35  ;;  %v8774_v35 = vld [vmem:[#allocation2 + $0x9b0] ss:$28 sps:$4 sm:$0xff]  }
 0x18d   :  { %3121 = vmatpush1.bf16.msra.mxu1 %v8720_v38  ;;  %3081 = vmatprep.subr.bf16.mxu0 %v8725_v39  ;;  %v8781_v38 = vld [vmem:[#allocation2 + $0x97c] ss:$28 sps:$4 sm:$0xff]   ;;  %v8791_v44 = vld [vmem:[#allocation2 + $0x90c] ss:$28 sps:$4 sm:$0xff]  }
 0x18e   :  { %3122 = vmatprep.subr.bf16.mxu1 %v8728_v40  ;;  %v2829_v49 = vpop.f32.mrf.mxu1  ;;  %v8782_v39 = vld [vmem:[#allocation2 + $0x280] ss:$28 sps:$4 sm:$0xff]  }
 0x18f   :  { %v8786_v40 = vld [vmem:[#allocation2 + $0x944] ss:$28 sps:$4 sm:$0xff]   ;;  %v8793_v49 = vld [vmem:[#allocation2 + $0x50] ss:$28 sps:$4 sm:$0xff]  }
 0x190   :  { %3082 = vmatpush1.bf16.msra.mxu0 %v8723_v42  ;;  %v8787_v42 = vld [vmem:[#allocation2 + $0x248] ss:$28 sps:$4 sm:$0xff]  }
 0x191   :  { %3123 = vmatpush1.bf16.msra.mxu1 %v8726_v43  ;;  %3083 = vmatprep.subr.bf16.mxu0 %v8731_v46  ;;  %v8788_v43 = vld [vmem:[#allocation2 + $0x88] ss:$28 sps:$4 sm:$0xff]   ;;  %v8792_v46 = vld [vmem:[#allocation2 + $0x210] ss:$28 sps:$4 sm:$0xff]  }
 0x192   :  { %3124 = vmatprep.subr.bf16.mxu1 %v8734_v47  ;;  %v8789_v47 = vld [vmem:[#allocation2 + $0x908] ss:$28 sps:$4 sm:$0xff]  }
 0x194   :  { %3084 = vmatpush1.bf16.msra.mxu0 %v8729_v50  ;;  %v8796_v50 = vld [vmem:[#allocation2 + $0x8d4] ss:$28 sps:$4 sm:$0xff]  }
 0x195   :  { %3125 = vmatpush1.bf16.msra.mxu1 %v8732_v51  ;;  %3085 = vmatprep.subr.bf16.mxu0 %v8737_v53  ;;  %v8797_v51 = vld [vmem:[#allocation2 + $0x1d8] ss:$28 sps:$4 sm:$0xff]   ;;  %v8794_v53 = vld [vmem:[#allocation2 + $0x8d0] ss:$28 sps:$4 sm:$0xff]  }
 0x196   :  { %3126 = vmatprep.subr.bf16.mxu1 %v8740_v54  ;;  %v8798_v54 = vld [vmem:[#allocation2 + $0x18] ss:$28 sps:$4 sm:$0xff]  }
 0x198   :  { %3086 = vmatpush1.bf16.msra.mxu0 %v8735_v55  ;;  %v8799_v55 = vld [vmem:[#allocation2 + $0x6e0] ss:$28 sps:$4 sm:$0xff]  }
 0x199   :  { %3127 = vmatpush1.bf16.msra.mxu1 %v8738_v56  ;;  %3087 = vmatprep.subr.bf16.mxu0 %v8743_v57  ;;  %v8800_v56 = vld [vmem:[#allocation2 + $0xa60] ss:$28 sps:$4 sm:$0xff]  }
 0x19a   :  { %3128 = vmatprep.subr.bf16.mxu1 %v8746_v58  ;;  %v8801_v57 = vld [vmem:[#allocation2 + $0x520] ss:$28 sps:$4 sm:$0xff]  }
 0x19b   :  { %v8802_v58 = vld [vmem:[#allocation2 + $0x8a0] ss:$28 sps:$4 sm:$0xff]  }
 0x19c   :  { %3088 = vmatpush1.bf16.msra.mxu0 %v8741_v60  ;;  %v8803_v60 = vld [vmem:[#allocation2 + $0x6a8] ss:$28 sps:$4 sm:$0xff]  }
 0x19d   :  { %3129 = vmatpush1.bf16.msra.mxu1 %v8744_v61  ;;  %3089 = vmatprep.subr.bf16.mxu0 %v8749_v62  ;;  %v8804_v61 = vld [vmem:[#allocation2 + $0xa28] ss:$28 sps:$4 sm:$0xff]  }
 0x19e   :  { %3130 = vmatprep.subr.bf16.mxu1 %v8752_v63  ;;  %v8805_v62 = vld [vmem:[#allocation2 + $0x4e8] ss:$28 sps:$4 sm:$0xff]  }
 0x19f   :  { %v8806_v63 = vld [vmem:[#allocation2 + $0x868] ss:$28 sps:$4 sm:$0xff]  }
 0x1a0   :  { %3090 = vmatpush1.bf16.msra.mxu0 %v8747_v2  ;;  %v8807_v2 = vld [vmem:[#allocation2 + $0x670] ss:$28 sps:$4 sm:$0xff]  }
 0x1a1   :  { %3131 = vmatpush1.bf16.msra.mxu1 %v8750_v3  ;;  %3091 = vmatprep.subr.bf16.mxu0 %v8755_v4  ;;  %v8808_v3 = vld [vmem:[#allocation2 + $0x9f0] ss:$28 sps:$4 sm:$0xff]  }
 0x1a2   :  { %3132 = vmatprep.subr.bf16.mxu1 %v8758_v5 }
 0x1a4   :  { %3092 = vmatpush1.bf16.msra.mxu0 %v8753_v6  ;;  %v8809_v6 = vld [vmem:[#allocation2 + $0x4b0] ss:$28 sps:$4 sm:$0xff]  }
 0x1a5   :  { %3133 = vmatpush1.bf16.msra.mxu1 %v8756_v7  ;;  %3093 = vmatprep.subr.bf16.mxu0 %v8761_v10  ;;  %v8810_v7 = vld [vmem:[#allocation2 + $0x830] ss:$28 sps:$4 sm:$0xff]  }
 0x1a6   :  { %7904 = vmatprep.subr.bf16.mxu1 %v8762_v11  ;;  %v8812_v11 = vld [vmem:[#allocation2 + $0x9b8] ss:$28 sps:$4 sm:$0xff]  }
 0x1a7   :  { %v2783_v19 = vpop.f32.mrf.mxu0 }
 0x1a8   :  { %3151 = vmatmul.mubr.bf16.vlgmr.msra.gmra.mxu1 %v9429_v20  ;;  %v2784_v24 = vadd.f32 %v2783_v19, %v9771_v59  ;;  %3094 = vmatpush2.bf16.msra.mxu0 %v8759_v12  ;;  %v8819_v19 = vld [vmem:[#allocation2 + $0x5c8] ss:$28 sps:$4 sm:$0xff]  }
 0x1a9   :  { %7905 = vmatpush3.bf16.msra.mxu1 %v8763_v13  ;;  %v2785_v25 = vpop.f32.mrf.mxu0  ;;  %3095 = vmatprep.subr.bf16.mxu0 %v8766_v45  ;;  %v8813_v13 = vld [vmem:[#allocation2 + $0x478] ss:$28 sps:$4 sm:$0xff]   ;;  %v8821_v20 = vld [vmem:[#allocation2 + $0x408] ss:$28 sps:$4 sm:$0xff]  }
 0x1aa   :  { %7906 = vmatprep.subr.bf16.mxu1 %v8767_v14  ;;  %v9788_v26 = vadd.f32 %v9777_v34, %v2784_v24  ;;  %v2786_v27 = vadd.f32 %v2785_v25, %v9773_v1  ;;  %3191 = vmatprep.mubr.bf16.mxu1 %v9714_v48  ;;  %v8778_v34 = vld [vmem:[#allocation2 + $0xf8] ss:$28 sps:$4 sm:$0xff]   ;;  %v8783_v1 = vld [vmem:[#allocation2 + $0xc0] ss:$28 sps:$4 sm:$0xff]   ;;  %v8824_v24 = vld [vmem:[#allocation2 + $0x910] ss:$28 sps:$4 sm:$0xff]  }
 0x1ab   :  { %v2787_v30 = vpop.f32.mrf.mxu0  ;;  %v8779_v48 = vld [vmem:[#allocation2 + $0x978] ss:$28 sps:$4 sm:$0xff]   ;;  %v8815_v14 = vld [vmem:[#allocation2 + $0x600] ss:$28 sps:$4 sm:$0xff]   ;;  %v8825_v25 = vld [vmem:[#allocation2 + $0x3d0] ss:$28 sps:$4 sm:$0xff]  }
 0x1ac   :  { %v9793_v33 = vadd.f32 %v9779_v41, %v2786_v27  ;;  %3096 = vmatpush2.bf16.msra.mxu0 %v8764_v16  ;;  %v8784_v41 = vld [vmem:[#allocation2 + $0x940] ss:$28 sps:$4 sm:$0xff]   ;;  %v8814_v45 = vld [vmem:[#allocation2 + $0x7f8] ss:$28 sps:$4 sm:$0xff]   ;;  %v8826_v27 = vld [vmem:[#allocation2 + $0x750] ss:$28 sps:$4 sm:$0xff]  }
 0x1ad   :  { %7907 = vmatpush3.bf16.msra.mxu1 %v8768_v17  ;;  %v2788_v59 = vpop.f32.mrf.mxu0  ;;  %3097 = vmatprep.subr.bf16.mxu0 %v8771_v21  ;;  %v8816_v16 = vld [vmem:[#allocation2 + $0x980] ss:$28 sps:$4 sm:$0xff]   ;;  %v8822_v21 = vld [vmem:[#allocation2 + $0x788] ss:$28 sps:$4 sm:$0xff]   ;;  %v8829_v30 = vld [vmem:[#allocation2 + $0x398] ss:$28 sps:$4 sm:$0xff]  }
 0x1ae   :  { %7908 = vmatprep.subr.bf16.mxu1 %v8772_v23  ;;  %v8817_v17 = vld [vmem:[#allocation2 + $0x440] ss:$28 sps:$4 sm:$0xff]   ;;  %v8823_v23 = vld [vmem:[#allocation2 + $0x590] ss:$28 sps:$4 sm:$0xff]  }
 0x1af   :  { %v8831_v59 = vld [vmem:[#allocation2 + $0xc20] ss:$28 sps:$4 sm:$0xff]  }
 0x1b0   :  { %3098 = vmatpush2.bf16.msra.mxu0 %v8769_v28  ;;  %v8827_v28 = vld [vmem:[#allocation2 + $0x558] ss:$28 sps:$4 sm:$0xff]  }
 0x1b1   :  { %7909 = vmatpush3.bf16.msra.mxu1 %v8773_v29  ;;  %3099 = vmatprep.subr.bf16.mxu0 %v8776_v31  ;;  %v8828_v29 = vld [vmem:[#allocation2 + $0x8d8] ss:$28 sps:$4 sm:$0xff]  }
 0x1b2   :  { %7910 = vmatprep.subr.bf16.mxu1 %v8777_v32  ;;  %v8830_v31 = vld [vmem:[#allocation2 + $0x718] ss:$28 sps:$4 sm:$0xff]   ;;  %v3357_v32 = vld [vmem:[#allocation6 + $0xf8] sm:$0xff] }
 0x1b4   :  { %3100 = vmatpush2.bf16.msra.mxu0 %v8774_v35  ;;  %v3341_v35 = vld [vmem:[#allocation6 + $0x78] sm:$0xff] }
 0x1b5   :  { %7911 = vmatpush3.bf16.msra.mxu1 %v8778_v34  ;;  %3101 = vmatprep.subr.bf16.mxu0 %v8781_v38  ;;  %v3356_v34 = vld [vmem:[#allocation6 + $0xf0] sm:$0xff]  ;;  %v9615_v38 = vmov 0.0  }
 0x1b6   :  { %7912 = vmatprep.subr.bf16.mxu1 %v8782_v39  ;;  %v3340_v39 = vld [vmem:[#allocation6 + $0x70] sm:$0xff] }
 0x1b8   :  { %3102 = vmatpush2.bf16.msra.mxu0 %v8779_v48  ;;  %v3355_v48 = vld [vmem:[#allocation6 + $0xe8] sm:$0xff] }
 0x1b9   :  { %7913 = vmatpush3.bf16.msra.mxu1 %v8783_v1  ;;  %3103 = vmatprep.subr.bf16.mxu0 %v8786_v40  ;;  %v3320_v1 = vmax.f32 %v9793_v33, 0.0 }
 0x1ba   :  { %7914 = vmatprep.subr.bf16.mxu1 %v8787_v42  ;;  %v8832_v42 = vld [vmem:[#allocation2 + $0xbe8] ss:$28 sps:$4 sm:$0xff]  }
 0x1bc   :  { %3104 = vmatpush2.bf16.msra.mxu0 %v8784_v41  ;;  %v3339_v41 = vld [vmem:[#allocation6 + $0x68] sm:$0xff] }
 0x1bd   :  { %7915 = vmatpush3.bf16.msra.mxu1 %v8788_v43  ;;  %3105 = vmatprep.subr.bf16.mxu0 %v8791_v44  ;;  %v3354_v44 = vld [vmem:[#allocation6 + $0xe0] sm:$0xff] }
 0x1be   :  { %7916 = vmatprep.subr.bf16.mxu1 %v8792_v46  ;;  %v3338_v46 = vld [vmem:[#allocation6 + $0x60] sm:$0xff] }
 0x1c0   :  { %3106 = vmatpush2.bf16.msra.mxu0 %v8789_v47  ;;  %v3353_v47 = vld [vmem:[#allocation6 + $0xd8] sm:$0xff] }
 0x1c1   :  { %7917 = vmatpush3.bf16.msra.mxu1 %v8793_v49  ;;  %3107 = vmatprep.subr.bf16.mxu0 %v8796_v50  ;;  %v8833_v49 = vld [vmem:[#allocation2 + $0xbb0] ss:$28 sps:$4 sm:$0xff]   ;;  %v3352_v50 = vld [vmem:[#allocation6 + $0xd0] sm:$0xff] }
 0x1c2   :  { %7918 = vmatprep.subr.bf16.mxu1 %v8797_v51  ;;  %v3336_v51 = vld [vmem:[#allocation6 + $0x50] sm:$0xff] }
 0x1c4   :  { %3108 = vmatpush2.bf16.msra.mxu0 %v8794_v53  ;;  %v3351_v53 = vld [vmem:[#allocation6 + $0xc8] sm:$0xff] }
 0x1c5   :  { %7919 = vmatpush3.bf16.msra.mxu1 %v8798_v54  ;;  %7926 = vmatprep.subr.bf16.mxu0 %v8799_v55  ;;  %v8834_v54 = vld [vmem:[#allocation2 + $0xb78] ss:$28 sps:$4 sm:$0xff]  }
 0x1c6   :  { %7948 = vmatprep.subr.bf16.mxu1 %v8800_v56  ;;  %v3335_v55 = vld [vmem:[#allocation6 + $0x48] sm:$0xff]  ;;  %v3350_v56 = vld [vmem:[#allocation6 + $0xc0] sm:$0xff] }
 0x1c7   :  { %3110 = vmatmul.mubr.bf16.vlgmr.msra.gmra.mxu0 %v9749_v18 }
 0x1c8   :  { %3192 = vmatmul.mubr.bf16.vlgmr.msra.gmra.mxu1 %v9723_v8  ;;  %v9797_v4 = vpop.f32.mrf.mxu1  ;;  %7927 = vmatpush3.bf16.msra.mxu0 %v8801_v57  ;;  %v8811_v8 = vld [vmem:[#allocation2 + $0x638] ss:$28 sps:$4 sm:$0xff]   ;;  %v3334_v57 = vld [vmem:[#allocation6 + $0x40] sm:$0xff] }
 0x1c9   :  { %7949 = vmatpush3.bf16.msra.mxu1 %v8802_v58  ;;  %7928 = vmatprep.subr.bf16.mxu0 %v8803_v60  ;;  %v3349_v58 = vld [vmem:[#allocation6 + $0xb8] sm:$0xff] }
 0x1ca   :  { %7950 = vmatprep.subr.bf16.mxu1 %v8804_v61  ;;  %v9799_v5 = vpop.f32.mrf.mxu1  ;;  %3231 = vmatprep.mubr.bf16.mxu0 %v9719_v52  ;;  %v8818_v52 = vld [vmem:[#allocation2 + $0x7c0] ss:$28 sps:$4 sm:$0xff]  }
 0x1cb   :  { %3271 = vmatprep.mubr.bf16.mxu1 %v9737_v36  ;;  %v8820_v36 = vld [vmem:[#allocation2 + $0x948] ss:$28 sps:$4 sm:$0xff]   ;;  %v8835_v60 = vld [vmem:[#allocation2 + $0xb40] ss:$28 sps:$4 sm:$0xff]  }
 0x1cc   :  { %v2869_v10 = vpop.f32.mrf.mxu1  ;;  %7929 = vmatpush3.bf16.msra.mxu0 %v8805_v62  ;;  %v3333_v61 = vld [vmem:[#allocation6 + $0x38] sm:$0xff]  ;;  %v3348_v62 = vld [vmem:[#allocation6 + $0xb0] sm:$0xff] }
 0x1cd   :  { %7951 = vmatpush3.bf16.msra.mxu1 %v8806_v63  ;;  %7930 = vmatprep.subr.bf16.mxu0 %v8807_v2  ;;  %v3332_v63 = vld [vmem:[#allocation6 + $0x30] sm:$0xff]  ;;  %v3347_v2 = vld [vmem:[#allocation6 + $0xa8] sm:$0xff]  ;;  %v3330_v10 = vld [vmem:[#allocation6 + $0x20] sm:$0xff] }
 0x1ce   :  { %7952 = vmatprep.subr.bf16.mxu1 %v8808_v3  ;;  %v2870_v12 = vpop.f32.mrf.mxu1  ;;  %v8836_v3 = vld [vmem:[#allocation2 + $0xb08] ss:$28 sps:$4 sm:$0xff]  }
 0x1cf   :  { %v3329_v12 = vld [vmem:[#allocation6 + $0x18] sm:$0xff] }
 0x1d0   :  { %7931 = vmatpush3.bf16.msra.mxu0 %v8809_v6  ;;  %v3331_v6 = vld [vmem:[#allocation6 + $0x28] sm:$0xff] }
 0x1d1   :  { %7953 = vmatpush3.bf16.msra.mxu1 %v8810_v7  ;;  %7932 = vmatprep.subr.bf16.mxu0 %v8811_v8  ;;  %v3346_v7 = vld [vmem:[#allocation6 + $0xa0] sm:$0xff]  ;;  %v3345_v8 = vld [vmem:[#allocation6 + $0x98] sm:$0xff] }
 0x1d2   :  { %7954 = vmatprep.subr.bf16.mxu1 %v8812_v11  ;;  %v8837_v11 = vld [vmem:[#allocation2 + $0xad0] ss:$28 sps:$4 sm:$0xff]  }
 0x1d4   :  { %7933 = vmatpush3.bf16.msra.mxu0 %v8813_v13  ;;  %v3344_v13 = vld [vmem:[#allocation6 + $0x90] sm:$0xff] }
 0x1d5   :  { %7955 = vmatpush3.bf16.msra.mxu1 %v8814_v45  ;;  %7934 = vmatprep.subr.bf16.mxu0 %v8815_v14  ;;  %v3328_v45 = vld [vmem:[#allocation6 + $0x10] sm:$0xff]  ;;  %v9820_v14 = vsub.s32 3, %v9761_v15 }
 0x1d6   :  { %7956 = vmatprep.subr.bf16.mxu1 %v8816_v16  ;;  %v3343_v16 = vld [vmem:[#allocation6 + $0x88] sm:$0xff] }
 0x1d8   :  { %7935 = vmatpush3.bf16.msra.mxu0 %v8817_v17  ;;  %v8838_v17 = vld [vmem:[#allocation2 + $0xa98] ss:$28 sps:$4 sm:$0xff]  }
 0x1d9   :  { %7957 = vmatpush3.bf16.msra.mxu1 %v8818_v52  ;;  %7936 = vmatprep.subr.bf16.mxu0 %v8819_v19  ;;  %v3327_v52 = vld [vmem:[#allocation6 + $0x8] sm:$0xff]  ;;  %v3342_v19 = vld [vmem:[#allocation6 + $0x80] sm:$0xff] }
 0x1da   :  { %7958 = vmatprep.subr.bf16.mxu1 %v8820_v36  ;;  %v3389_v36 = vld [vmem:[#allocation6 + $0x1f8] sm:$0xff] }
 0x1dc   :  { %7937 = vmatpush3.bf16.msra.mxu0 %v8821_v20  ;;  %v3326_v20 = vld [vmem:[#allocation6] sm:$0xff] }
 0x1dd   :  { %7959 = vmatpush3.bf16.msra.mxu1 %v8822_v21  ;;  %7938 = vmatprep.subr.bf16.mxu0 %v8823_v23  ;;  %v9823_v21 = vld [vmem:[#allocation4] sm:$0xff] }
 0x1de   :  { %7960 = vmatprep.subr.bf16.mxu1 %v8824_v24  ;;  %v606_v23 = vrot.slane %v9823_v21, %v9820_v14  ;;  %v9828_v24 = vsub.s32 2, %v9761_v15 }
 0x1e0   :  { %7939 = vmatpush3.bf16.msra.mxu0 %v8825_v25  ;;  %v3373_v25 = vld [vmem:[#allocation6 + $0x178] sm:$0xff] }
 0x1e1   :  { %7961 = vmatpush3.bf16.msra.mxu1 %v8826_v27  ;;  %7940 = vmatprep.subr.bf16.mxu0 %v8827_v28  ;;  %v3421_v27 = vld [vmem:[#allocation6 + $0x2f8] sm:$0xff]  ;;  %v3388_v28 = vld [vmem:[#allocation6 + $0x1f0] sm:$0xff] }
 0x1e2   :  { %7962 = vmatprep.subr.bf16.mxu1 %v8828_v29  ;;  %v3405_v29 = vld [vmem:[#allocation6 + $0x278] sm:$0xff] }
 0x1e4   :  { %7941 = vmatpush3.bf16.msra.mxu0 %v8829_v30  ;;  %v3319_v30 = vmax.f32 %v9788_v26, 0.0  ;;  %v3371_v26 = vld [vmem:[#allocation6 + $0x168] sm:$0xff] }
 0x1e5   :  { %7963 = vmatpush3.bf16.msra.mxu1 %v8830_v31  ;;  %8176 = vmatprep.subr.bf16.mxu0 %v9615_v38  ;;  %v3372_v31 = vld [vmem:[#allocation6 + $0x170] sm:$0xff] }
 0x1e6   :  { %7979 = vmatprep.subr.mxu1 %v3357_v32  ;;  %v2868_v32 = vadd.f32 %v9799_v5, %v606_v23  ;;  %v3386_v5 = vld [vmem:[#allocation6 + $0x1e0] sm:$0xff]  ;;  %v3364_v23 = vld [vmem:[#allocation6 + $0x130] sm:$0xff] }
 0x1e7   :  { %v9805_v40 = vpop.f32.mrf.mxu0  ;;  %3232 = vmatmul.mubr.bf16.vlgmr.msra.gmra.mxu0 %v9725_v9 }
 0x1e8   :  { %3272 = vmatmul.mubr.bf16.vlgmr.msra.gmra.mxu1 %v9749_v18  ;;  %8177 = vmatpush3.bf16.msra.mxu0 %v8831_v59  ;;  %v3337_v18 = vld [vmem:[#allocation6 + $0x58] sm:$0xff]  ;;  %v3387_v59 = vld [vmem:[#allocation6 + $0x1e8] sm:$0xff] }
 0x1e9   :  { %7980 = vmatpush3.msra.mxu1 %v3341_v35  ;;  %3509 = vmatprep.mubr.f32.mxu1 %v3320_v1  ;;  %v9809_v43 = vpop.f32.mrf.mxu0  ;;  %v602_v35 = vrot.slane %v9823_v21, %v9828_v24  ;;  %v3420_v1 = vld [vmem:[#allocation6 + $0x2f0] sm:$0xff] }
 0x1ea   :  { %7981 = vmatprep.subr.mxu1 %v3356_v34  ;;  %8178 = vmatprep.subr.bf16.mxu0 %v9615_v38 }
 0x1eb   :  { %7982 = vmatpush3.msra.mxu1 %v3340_v39  ;;  %v2910_v33 = vpop.f32.mrf.mxu0  ;;  %8192 = vmatprep.mubr.msk.bf16.mxu0 %vm9616_vm0, %v9615_v38 }
 0x1ec   :  { %7983 = vmatprep.subr.mxu1 %v3355_v48  ;;  %8179 = vmatpush3.bf16.msra.mxu0 %v8832_v42  ;;  %v9431_v48 = vld [vmem:[%s10059_s0 + $0x18] ss:$0 sps:$4 sm:$0xff]   ;;  %v2909_v42 = vadd.f32 %v9809_v43, %v2868_v32  ;;  %v3370_v33 = vld [vmem:[#allocation6 + $0x160] sm:$0xff]  ;;  %v3369_v43 = vld [vmem:[#allocation6 + $0x158] sm:$0xff] }
 0x1ed   :  { %7984 = vmatpush3.msra.mxu1 %v3339_v41  ;;  %v2911_v9 = vpop.f32.mrf.mxu0  ;;  %8180 = vmatprep.subr.bf16.mxu0 %v9615_v38  ;;  %v3404_v41 = vld [vmem:[#allocation6 + $0x270] sm:$0xff]  ;;  %v3378_v32 = vld [vmem:[#allocation6 + $0x1a0] sm:$0xff] }
 0x1ee   :  { %7985 = vmatprep.subr.mxu1 %v3354_v44  ;;  %v3385_v9 = vld [vmem:[#allocation6 + $0x1d8] sm:$0xff] }
 0x1ef   :  { %7986 = vmatpush3.msra.mxu1 %v3338_v46 }
 0x1f0   :  { %7987 = vmatprep.subr.mxu1 %v3353_v47  ;;  %8181 = vmatpush3.bf16.msra.mxu0 %v8833_v49  ;;  %v3419_v47 = vld [vmem:[#allocation6 + $0x2e8] sm:$0xff] }
 0x1f1   :  { %7988 = vmatpush3.msra.mxu1 %v3337_v18  ;;  %8182 = vmatprep.subr.bf16.mxu0 %v9615_v38  ;;  %v3403_v18 = vld [vmem:[#allocation6 + $0x268] sm:$0xff] }
 0x1f2   :  { %7989 = vmatprep.subr.mxu1 %v3352_v50  ;;  %v2866_v50 = vadd.f32 %v9797_v4, %v602_v35  ;;  %v3383_v4 = vld [vmem:[#allocation6 + $0x1c8] sm:$0xff]  ;;  %v3362_v35 = vld [vmem:[#allocation6 + $0x120] sm:$0xff] }
 0x1f3   :  { %7990 = vmatpush3.msra.mxu1 %v3336_v51 }
 0x1f4   :  { %7991 = vmatprep.subr.mxu1 %v3351_v53  ;;  %8183 = vmatpush3.bf16.msra.mxu0 %v8834_v54  ;;  %v3418_v54 = vld [vmem:[#allocation6 + $0x2e0] sm:$0xff] }
 0x1f5   :  { %7992 = vmatpush3.msra.mxu1 %v3335_v55  ;;  %8184 = vmatprep.subr.bf16.mxu0 %v9615_v38 }
 0x1f6   :  { %7993 = vmatprep.subr.mxu1 %v3350_v56  ;;  %v3384_v56 = vld [vmem:[#allocation6 + $0x1d0] sm:$0xff] }
 0x1f7   :  { %7994 = vmatpush3.msra.mxu1 %v3334_v57  ;;  %v3402_v57 = vld [vmem:[#allocation6 + $0x260] sm:$0xff] }
 0x1f8   :  { %7995 = vmatprep.subr.mxu1 %v3349_v58  ;;  %8185 = vmatpush3.bf16.msra.mxu0 %v8835_v60  ;;  %v2907_v58 = vadd.f32 %v9805_v40, %v2866_v50  ;;  %v3382_v40 = vld [vmem:[#allocation6 + $0x1c0] sm:$0xff] }
 0x1f9   :  { %7996 = vmatpush3.msra.mxu1 %v3333_v61  ;;  %8186 = vmatprep.subr.bf16.mxu0 %v9615_v38  ;;  %v3368_v61 = vld [vmem:[#allocation6 + $0x150] sm:$0xff]  ;;  %v3358_v50 = vld [vmem:[#allocation6 + $0x100] sm:$0xff] }
 0x1fa   :  { %7997 = vmatprep.subr.mxu1 %v3348_v62 }
 0x1fb   :  { %7998 = vmatpush3.msra.mxu1 %v3332_v63 }
 0x1fc   :  { %7999 = vmatprep.subr.mxu1 %v3347_v2  ;;  %8187 = vmatpush3.bf16.msra.mxu0 %v8836_v3  ;;  %v3417_v2 = vld [vmem:[#allocation6 + $0x2d8] sm:$0xff] }
 0x1fd   :  { %8000 = vmatpush3.msra.mxu1 %v3331_v6  ;;  %8188 = vmatprep.subr.bf16.mxu0 %v9615_v38  ;;  %v3401_v3 = vld [vmem:[#allocation6 + $0x258] sm:$0xff]  ;;  %v3416_v6 = vld [vmem:[#allocation6 + $0x2d0] sm:$0xff] }
 0x1fe   :  { %8001 = vmatprep.subr.mxu1 %v3346_v7 }
 0x1ff   :  { %8002 = vmatpush3.msra.mxu1 %v3330_v10  ;;  %v3367_v10 = vld [vmem:[#allocation6 + $0x148] sm:$0xff] }
 0x200   :  { %8003 = vmatprep.subr.mxu1 %v3345_v8  ;;  %8189 = vmatpush3.bf16.msra.mxu0 %v8837_v11  ;;  %v3400_v8 = vld [vmem:[#allocation6 + $0x250] sm:$0xff]  ;;  %v3415_v11 = vld [vmem:[#allocation6 + $0x2c8] sm:$0xff] }
 0x201   :  { %8004 = vmatpush3.msra.mxu1 %v3329_v12  ;;  %8190 = vmatprep.subr.bf16.mxu0 %v9615_v38  ;;  %v3366_v12 = vld [vmem:[#allocation6 + $0x140] sm:$0xff] }
 0x202   :  { %8005 = vmatprep.subr.mxu1 %v3344_v13  ;;  %v3399_v13 = vld [vmem:[#allocation6 + $0x248] sm:$0xff] }
 0x203   :  { %8006 = vmatpush3.msra.mxu1 %v3328_v45  ;;  %v3381_v45 = vld [vmem:[#allocation6 + $0x1b8] sm:$0xff] }
 0x204   :  { %8007 = vmatprep.subr.mxu1 %v3343_v16  ;;  %8191 = vmatpush3.bf16.msra.mxu0 %v8838_v17  ;;  %v3414_v16 = vld [vmem:[#allocation6 + $0x2c0] sm:$0xff] }
 0x205   :  { %8008 = vmatpush3.msra.mxu1 %v3327_v52  ;;  %8014 = vmatprep.subr.mxu0 %v3389_v36  ;;  %v3365_v52 = vld [vmem:[#allocation6 + $0x138] sm:$0xff]  ;;  %v3380_v36 = vld [vmem:[#allocation6 + $0x1b0] sm:$0xff] }
 0x206   :  { %8009 = vmatprep.subr.mxu1 %v3342_v19  ;;  %v3398_v19 = vld [vmem:[#allocation6 + $0x240] sm:$0xff] }
 0x207   :  { %8010 = vmatpush3.msra.mxu1 %v3326_v20  ;;  %v9834_v39 = vpop.f32.mrf.mxu0  ;;  %8193 = vmatmul.mubr.bf16.vlgmr.msra.gmra.mxu0 %v9431_v48  ;;  %v3413_v20 = vld [vmem:[#allocation6 + $0x2b8] sm:$0xff]  ;;  %v3410_v48 = vld [vmem:[#allocation6 + $0x2a0] sm:$0xff] }
 0x208   :  { %v2947_v34 = vpop.f32.mrf.mxu1  ;;  %3510 = vmatmul.mubr.f32.vlgmr.msra.gmra.mxu1 %v3319_v30  ;;  %8015 = vmatpush3.msra.mxu0 %v3373_v25  ;;  %v3397_v25 = vld [vmem:[#allocation6 + $0x238] sm:$0xff]  ;;  %v3363_v30 = vld [vmem:[#allocation6 + $0x128] sm:$0xff] }
 0x209   :  { %8049 = vmatprep.subr.mxu1 %v3421_v27  ;;  %v2990_v46 = vpop.f32.mrf.mxu0  ;;  %8016 = vmatprep.subr.mxu0 %v3388_v28  ;;  %v2948_v7 = vadd.f32 %v2947_v34, %v2907_v58  ;;  %v3379_v27 = vld [vmem:[#allocation6 + $0x1a8] sm:$0xff]  ;;  %v3412_v28 = vld [vmem:[#allocation6 + $0x2b0] sm:$0xff]  ;;  %v3433_v58 = vld [vmem:[#allocation6 + $0x358] sm:$0xff] }
 0x20a   :  { %v2949_v44 = vpop.f32.mrf.mxu1  ;;  %8050 = vmatpush3.msra.mxu1 %v3405_v29  ;;  %8017 = vmatpush3.msra.mxu0 %v3372_v31  ;;  %v3396_v31 = vld [vmem:[#allocation6 + $0x230] sm:$0xff]  ;;  %v3395_v34 = vld [vmem:[#allocation6 + $0x228] sm:$0xff] }
 0x20b   :  { %v2950_v49 = vadd.f32 %v2949_v44, %v2909_v42  ;;  %8051 = vmatprep.subr.mxu1 %v3420_v1  ;;  %v2992_v51 = vpop.f32.mrf.mxu0  ;;  %8018 = vmatprep.subr.mxu0 %v3387_v59  ;;  %v9843_v17 = vadd.f32 %v9834_v39, %v2948_v7  ;;  %v3411_v59 = vld [vmem:[#allocation6 + $0x2a8] sm:$0xff]  ;;  %v3377_v39 = vld [vmem:[#allocation6 + $0x198] sm:$0xff]  ;;  %v3394_v1 = vld [vmem:[#allocation6 + $0x220] sm:$0xff] }
 0x20c   :  { %v2951_v53 = vpop.f32.mrf.mxu1  ;;  %8052 = vmatpush3.msra.mxu1 %v3404_v41  ;;  %8019 = vmatpush3.msra.mxu0 %v3371_v26  ;;  %v3361_v26 = vld [vmem:[#allocation6 + $0x118] sm:$0xff]  ;;  %v3376_v42 = vld [vmem:[#allocation6 + $0x190] sm:$0xff]  ;;  %v3391_v51 = vld [vmem:[#allocation6 + $0x208] sm:$0xff] }
 0x20d   :  { %v2991_v55 = vadd.f32 %v2990_v46, %v2950_v49  ;;  %8053 = vmatprep.subr.mxu1 %v3419_v47  ;;  %v2993_v60 = vpop.f32.mrf.mxu0  ;;  %8020 = vmatprep.subr.mxu0 %v3386_v5  ;;  %v3321_v29 = vmax.f32 %v9843_v17, 0.0  ;;  %v3409_v5 = vld [vmem:[#allocation6 + $0x298] sm:$0xff]  ;;  %v3360_v41 = vld [vmem:[#allocation6 + $0x110] sm:$0xff]  ;;  %v3375_v46 = vld [vmem:[#allocation6 + $0x188] sm:$0xff] }
 0x20e   :  { %v2952_v62 = vpop.f32.mrf.mxu1  ;;  %8054 = vmatpush3.msra.mxu1 %v3403_v18  ;;  %8021 = vmatpush3.msra.mxu0 %v3370_v33  ;;  %v3393_v44 = vld [vmem:[#allocation6 + $0x218] sm:$0xff]  ;;  %v3408_v33 = vld [vmem:[#allocation6 + $0x290] sm:$0xff]  ;;  %v3359_v47 = vld [vmem:[#allocation6 + $0x108] sm:$0xff] }
 0x20f   :  { %v3322_v63 = vmax.f32 %v2991_v55, 0.0  ;;  %8055 = vmatprep.subr.mxu1 %v3418_v54  ;;  %8022 = vmatprep.subr.mxu0 %v3385_v9  ;;  %v3392_v49 = vld [vmem:[#allocation6 + $0x210] sm:$0xff]  ;;  %v3374_v9 = vld [vmem:[#allocation6 + $0x180] sm:$0xff]  ;;  %v3407_v18 = vld [vmem:[#allocation6 + $0x288] sm:$0xff] }
 0x210   :  { %8056 = vmatpush3.msra.mxu1 %v3402_v57  ;;  %8023 = vmatpush3.msra.mxu0 %v3369_v43  ;;  %v3406_v43 = vld [vmem:[#allocation6 + $0x280] sm:$0xff]  ;;  %v3437_v54 = vld [vmem:[#allocation6 + $0x378] sm:$0xff]  ;;  %v3436_v55 = vld [vmem:[#allocation6 + $0x370] sm:$0xff] }
 0x211   :  { %3579 = vmatprep.mubr.f32.mxu0 %v3322_v63  ;;  %8024 = vmatprep.subr.mxu0 %v3384_v56  ;;  %v3390_v53 = vld [vmem:[#allocation6 + $0x200] sm:$0xff]  ;;  %v3435_v56 = vld [vmem:[#allocation6 + $0x368] sm:$0xff]  ;;  %v3432_v60 = vld [vmem:[#allocation6 + $0x350] sm:$0xff] }
 0x212   :  { %8057 = vmatprep.subr.mxu1 %v3417_v2  ;;  %8025 = vmatpush3.msra.mxu0 %v3368_v61  ;;  %v3434_v57 = vld [vmem:[#allocation6 + $0x360] sm:$0xff]  ;;  %v3431_v61 = vld [vmem:[#allocation6 + $0x348] sm:$0xff]  ;;  %v3429_v63 = vld [vmem:[#allocation6 + $0x338] sm:$0xff] }
 0x213   :  { %8058 = vmatpush3.msra.mxu1 %v3401_v3  ;;  %8026 = vmatprep.subr.mxu0 %v3383_v4  ;;  %v3430_v62 = vld [vmem:[#allocation6 + $0x340] sm:$0xff]  ;;  %v3428_v4 = vld [vmem:[#allocation6 + $0x330] sm:$0xff]  ;;  %v3427_v2 = vld [vmem:[#allocation6 + $0x328] sm:$0xff] }
 0x214   :  { %8059 = vmatprep.subr.mxu1 %v3416_v6  ;;  %8027 = vmatpush3.msra.mxu0 %v3367_v10  ;;  %v3426_v3 = vld [vmem:[#allocation6 + $0x320] sm:$0xff]  ;;  %v3425_v6 = vld [vmem:[#allocation6 + $0x318] sm:$0xff] }
 0x215   :  { %8060 = vmatpush3.msra.mxu1 %v3400_v8  ;;  %8028 = vmatprep.subr.mxu0 %v3382_v40  ;;  %v3424_v8 = vld [vmem:[#allocation6 + $0x310] sm:$0xff] }
 0x216   :  { %8061 = vmatprep.subr.mxu1 %v3415_v11  ;;  %8029 = vmatpush3.msra.mxu0 %v3366_v12  ;;  %v3423_v12 = vld [vmem:[#allocation6 + $0x308] sm:$0xff] }
 0x217   :  { %8062 = vmatpush3.msra.mxu1 %v3399_v13  ;;  %8030 = vmatprep.subr.mxu0 %v3381_v45 }
 0x218   :  { %8063 = vmatprep.subr.mxu1 %v3414_v16  ;;  %8031 = vmatpush3.msra.mxu0 %v3365_v52  ;;  %v3422_v16 = vld [vmem:[#allocation6 + $0x300] sm:$0xff] }
 0x219   :  { %8064 = vmatpush3.msra.mxu1 %v3398_v19  ;;  %8032 = vmatprep.subr.mxu0 %v3380_v36 }
 0x21a   :  { %8065 = vmatprep.subr.mxu1 %v3413_v20  ;;  %8033 = vmatpush3.msra.mxu0 %v3364_v23  ;;  %v3726_v23 = vld [vmem:[%s10060_s1] sm:$0xff] }
 0x21b   :  { %8066 = vmatpush3.msra.mxu1 %v3397_v25  ;;  %8034 = vmatprep.subr.mxu0 %v3379_v27  ;;  %v9868_v27 = vsub.s32 4, %v9761_v15 }
 0x21c   :  { %8067 = vmatprep.subr.mxu1 %v3412_v28  ;;  %8035 = vmatpush3.msra.mxu0 %v3363_v30  ;;  %v9871_v28 = vsub.s32 5, %v9761_v15 }
 0x21d   :  { %8068 = vmatpush3.msra.mxu1 %v3396_v31  ;;  %8036 = vmatprep.subr.mxu0 %v3378_v32 }
 0x21e   :  { %8069 = vmatprep.subr.mxu1 %v3411_v59  ;;  %8037 = vmatpush3.msra.mxu0 %v3362_v35  ;;  %v614_v30 = vrot.slane %v9823_v21, %v9871_v28 }
 0x21f   :  { %8070 = vmatpush3.msra.mxu1 %v3395_v34  ;;  %8038 = vmatprep.subr.mxu0 %v3377_v39 }
 0x220   :  { %8071 = vmatprep.subr.mxu1 %v3410_v48  ;;  %8039 = vmatpush3.msra.mxu0 %v3361_v26 }
 0x221   :  { %8072 = vmatpush3.msra.mxu1 %v3394_v1  ;;  %8040 = vmatprep.subr.mxu0 %v3376_v42 }
 0x222   :  { %8073 = vmatprep.subr.mxu1 %v3409_v5  ;;  %8041 = vmatpush3.msra.mxu0 %v3360_v41 }
 0x223   :  { %8074 = vmatpush3.msra.mxu1 %v3393_v44  ;;  %8042 = vmatprep.subr.mxu0 %v3375_v46 }
 0x224   :  { %8075 = vmatprep.subr.mxu1 %v3408_v33  ;;  %8043 = vmatpush3.msra.mxu0 %v3359_v47 }
 0x225   :  { %8076 = vmatpush3.msra.mxu1 %v3392_v49  ;;  %8044 = vmatprep.subr.mxu0 %v3374_v9 }
 0x226   :  { %8077 = vmatprep.subr.mxu1 %v3407_v18  ;;  %8045 = vmatpush3.msra.mxu0 %v3358_v50 }
 0x227   :  { %8078 = vmatpush3.msra.mxu1 %v3391_v51  ;;  %3580 = vmatmul.mubr.f32.vlgmr.msra.gmra.mxu0 %v3321_v29  ;;  %v610_v29 = vrot.slane %v9823_v21, %v9868_v27 }
 0x228   :  { %8079 = vmatprep.subr.mxu1 %v3406_v43  ;;  %8196 = vmatprep.subr.mxu0 %v9615_v38 }
 0x229   :  { %8080 = vmatpush3.msra.mxu1 %v3390_v53  ;;  %8228 = vmatprep.mubr.msk.f32.mxu0 %vm9616_vm0, %v9615_v38 }
 0x22a   :  { %8197 = vmatpush3.msra.mxu0 %v3437_v54  ;;  %3730 = vrot.lane.b32.xlu0 %v3726_v23, %s9617_s2 }
 0x22b   :  { %8198 = vmatprep.subr.mxu0 %v9615_v38 }
 0x22c   :  { %8199 = vmatpush3.msra.mxu0 %v3436_v55 }
 0x22d   :  { %8200 = vmatprep.subr.mxu0 %v9615_v38 }
 0x22e   :  { %8201 = vmatpush3.msra.mxu0 %v3435_v56 }
 0x22f   :  { %8202 = vmatprep.subr.mxu0 %v9615_v38 }
 0x230   :  { %8203 = vmatpush3.msra.mxu0 %v3434_v57  ;;  %v9878_v57 = vsub.s32 6, %v9761_v15 }
 0x231   :  { %8204 = vmatprep.subr.mxu0 %v9615_v38 }
 0x232   :  { %8205 = vmatpush3.msra.mxu0 %v3433_v58  ;;  %v618_v58 = vrot.slane %v9823_v21, %v9878_v57  ;;  %v7504_v21 = vld [vmem:[#allocation7] ss:$0 sm:$0xff] }
 0x233   :  { %8206 = vmatprep.subr.mxu0 %v9615_v38 }
 0x234   :  { %8207 = vmatpush3.msra.mxu0 %v3432_v60 }
 0x235   :  { %8208 = vmatprep.subr.mxu0 %v9615_v38 }
 0x236   :  { %8209 = vmatpush3.msra.mxu0 %v3431_v61 }
 0x237   :  { %8210 = vmatprep.subr.mxu0 %v9615_v38 }
 0x238   :  { %8211 = vmatpush3.msra.mxu0 %v3430_v62 }
 0x239   :  { %8212 = vmatprep.subr.mxu0 %v9615_v38 }
 0x23a   :  { %8213 = vmatpush3.msra.mxu0 %v3429_v63 }
 0x23b   :  { %8214 = vmatprep.subr.mxu0 %v9615_v38 }
 0x23c   :  { %8215 = vmatpush3.msra.mxu0 %v3428_v4 }
 0x23d   :  { %8216 = vmatprep.subr.mxu0 %v9615_v38 }
 0x23e   :  { %8217 = vmatpush3.msra.mxu0 %v3427_v2 }
 0x23f   :  { %8218 = vmatprep.subr.mxu0 %v9615_v38 }
 0x240   :  { %8219 = vmatpush3.msra.mxu0 %v3426_v3 }
 0x241   :  { %8220 = vmatprep.subr.mxu0 %v9615_v38 }
 0x242   :  { %8221 = vmatpush3.msra.mxu0 %v3425_v6 }
 0x243   :  { %8222 = vmatprep.subr.mxu0 %v9615_v38 }
 0x244   :  { %8223 = vmatpush3.msra.mxu0 %v3424_v8 }
 0x245   :  { %8224 = vmatprep.subr.mxu0 %v9615_v38 }
 0x246   :  { %8225 = vmatpush3.msra.mxu0 %v3423_v12 }
 0x247   :  { %v3029_v7 = vpop.f32.mrf.mxu0  ;;  %8226 = vmatprep.subr.mxu0 %v9615_v38 }
 0x248   :  { %v3070_v10 = vpop.f32.mrf.mxu1  ;;  %8227 = vmatpush3.msra.mxu0 %v3422_v16  ;;  %v3030_v31 = vadd.f32 %v3029_v7, %v610_v29 }
 0x249   :  { %v3031_v40 = vpop.f32.mrf.mxu0 }
 0x24a   :  { %v3072_v11 = vpop.f32.mrf.mxu1  ;;  %v3032_v32 = vadd.f32 %v3031_v40, %v614_v30  ;;  %v3071_v59 = vadd.f32 %v3070_v10, %v3030_v31 }
 0x24b   :  { %v3033_v13 = vpop.f32.mrf.mxu0 }
 0x24c   :  { %v3074_v45 = vpop.f32.mrf.mxu1  ;;  %v3073_v39 = vadd.f32 %v3072_v11, %v3032_v32  ;;  %v9618_v32 = vmov 1  }
 0x24d   :  { %v3034_v17 = vpop.f32.mrf.mxu0  ;;  %8271 = vset.pattern.permute.xlu0 %v9618_v32 }
 0x24e   :  { %v3075_v52 = vpop.f32.mrf.mxu1 }
 0x268   :  { %v3152_v19 = vpop.f32.mrf.mxu1 }
 0x26a   :  { %v3154_v36 = vpop.f32.mrf.mxu1 }
 0x26c   :  { %v3156_v20 = vpop.f32.mrf.mxu1 }
 0x26e   :  { %v3157_v25 = vpop.f32.mrf.mxu1 }
 0x287   :  { %v3111_v35 = vpop.f32.mrf.mxu0 }
 0x288   :  { %v7920_v34 = vpop.f32.mrf.mxu1  ;;  %v3112_v48 = vadd.f32 %v3111_v35, %v3071_v59  ;;  %v8839_v59 = vld [vmem:[#allocation12 + $0x188] ss:$28 sps:$4 sm:$0xff]  }
 0x289   :  { %v3113_v26 = vpop.f32.mrf.mxu0  ;;  %v8841_v35 = vld [vmem:[#allocation12 + $0x18c] ss:$28 sps:$4 sm:$0xff]  }
 0x28a   :  { %v7921_v1 = vpop.f32.mrf.mxu1  ;;  %v3114_v42 = vadd.f32 %v3113_v26, %v3073_v39  ;;  %v3153_v5 = vadd.f32 %v3152_v19, %v3112_v48  ;;  %v8844_v48 = vld [vmem:[#allocation12 + $0x50c] ss:$28 sps:$4 sm:$0xff]   ;;  %v8847_v26 = vld [vmem:[#allocation12 + $0x154] ss:$28 sps:$4 sm:$0xff]   ;;  %6391 = vmatprep.subr.bf16.mxu1 %v8841_v35 }
 0x28b   :  { %v3115_v41 = vpop.f32.mrf.mxu0  ;;  %v7922_v60 = vadd.f32 %v7921_v1, %v7920_v34  ;;  %v8842_v34 = vld [vmem:[#allocation12 + $0x508] ss:$28 sps:$4 sm:$0xff]   ;;  %v8850_v1 = vld [vmem:[#allocation12 + $0x4d4] ss:$28 sps:$4 sm:$0xff]   ;;  %6432 = vmatprep.subr.bf16.mxu0 %v8844_v48 }
 0x28c   :  { %v7923_v44 = vpop.f32.mrf.mxu1  ;;  %v3155_v46 = vadd.f32 %v3154_v36, %v3114_v42  ;;  %v3323_v9 = vmax.f32 %v3153_v5, 0.0  ;;  %v8845_v5 = vld [vmem:[#allocation12 + $0x150] ss:$28 sps:$4 sm:$0xff]   ;;  %v8914_v35 = vld [vmem:[#allocation12 + $0x5e8] ss:$28 sps:$4 sm:$0xff]  }
 0x28d   :  { %v3116_v33 = vpop.f32.mrf.mxu0  ;;  %v3194_v62 = vadd.f32 %v7922_v60, %v618_v58  ;;  %v8848_v44 = vld [vmem:[#allocation12 + $0x4d0] ss:$28 sps:$4 sm:$0xff]  }
 0x28e   :  { %v7924_v47 = vpop.f32.mrf.mxu1  ;;  %v3324_v49 = vmax.f32 %v3155_v46, 0.0  ;;  %v8853_v46 = vld [vmem:[#allocation12 + $0x11c] ss:$28 sps:$4 sm:$0xff]   ;;  %v8874_v58 = vld [vmem:[#allocation12 + $0x3f4] ss:$28 sps:$4 sm:$0xff]  }
 0x28f   :  { %v8856_v33 = vld [vmem:[#allocation12 + $0x49c] ss:$28 sps:$4 sm:$0xff]   ;;  %v8869_v60 = vld [vmem:[#allocation12 + $0x70] ss:$28 sps:$4 sm:$0xff]  }
 0x290   :  { %3649 = vmatprep.mubr.f32.mxu1 %v3324_v49  ;;  %v8851_v47 = vld [vmem:[#allocation12 + $0x118] ss:$28 sps:$4 sm:$0xff]   ;;  %v8920_v48 = vld [vmem:[#allocation12 + $0x5b0] ss:$28 sps:$4 sm:$0xff]  }
 0x291   :  { %3650 = vmatmul.mubr.f32.vlgmr.msra.gmra.mxu1 %v3323_v9  ;;  %v8854_v49 = vld [vmem:[#allocation12 + $0x498] ss:$28 sps:$4 sm:$0xff]   ;;  %v8859_v9 = vld [vmem:[#allocation12 + $0xe4] ss:$28 sps:$4 sm:$0xff]  }
 0x292   :  { %6392 = vmatpush1.bf16.msra.mxu1 %v8839_v59  ;;  %v8911_v59 = vld [vmem:[#allocation12 + $0x268] ss:$28 sps:$4 sm:$0xff]  }
 0x293   :  { %6393 = vmatprep.subr.bf16.mxu1 %v8847_v26  ;;  %v8922_v26 = vld [vmem:[#allocation12 + $0x5b4] ss:$28 sps:$4 sm:$0xff]  }
 0x296   :  { %6394 = vmatpush1.bf16.msra.mxu1 %v8845_v5  ;;  %v8923_v5 = vld [vmem:[#allocation12 + $0x1f8] ss:$28 sps:$4 sm:$0xff]  }
 0x297   :  { %6395 = vmatprep.subr.bf16.mxu1 %v8853_v46  ;;  %v8928_v46 = vld [vmem:[#allocation12 + $0x57c] ss:$28 sps:$4 sm:$0xff]  }
 0x29a   :  { %6396 = vmatpush1.bf16.msra.mxu1 %v8851_v47  ;;  %v8934_v47 = vld [vmem:[#allocation12 + $0x544] ss:$28 sps:$4 sm:$0xff]  }
 0x29b   :  { %6397 = vmatprep.subr.bf16.mxu1 %v8859_v9  ;;  %v8932_v9 = vld [vmem:[#allocation12 + $0x540] ss:$28 sps:$4 sm:$0xff]  }
 0x29c   :  { %v3731_v39 = vpop.permute.xlu0 %3730 }
 0x2a7   :  { %v7942_v18 = vpop.f32.mrf.mxu0 }
 0x2a8   :  { %v7964_v50 = vpop.f32.mrf.mxu1 }
 0x2a9   :  { %v7943_v51 = vpop.f32.mrf.mxu0 }
 0x2aa   :  { %v7965_v43 = vpop.f32.mrf.mxu1  ;;  %v7944_v61 = vadd.f32 %v7943_v51, %v7942_v18  ;;  %v8862_v18 = vld [vmem:[#allocation12 + $0x464] ss:$28 sps:$4 sm:$0xff]  }
 0x2ab   :  { %v7945_v53 = vpop.f32.mrf.mxu0  ;;  %v7966_v4 = vadd.f32 %v7965_v43, %v7964_v50  ;;  %v8857_v50 = vld [vmem:[#allocation12 + $0xe0] ss:$28 sps:$4 sm:$0xff]   ;;  %v8865_v43 = vld [vmem:[#allocation12 + $0xac] ss:$28 sps:$4 sm:$0xff]  }
 0x2ac   :  { %v7967_v54 = vpop.f32.mrf.mxu1  ;;  %v3234_v63 = vadd.f32 %v7944_v61, %v3194_v62  ;;  %v8860_v51 = vld [vmem:[#allocation12 + $0x460] ss:$28 sps:$4 sm:$0xff]   ;;  %v8868_v53 = vld [vmem:[#allocation12 + $0x42c] ss:$28 sps:$4 sm:$0xff]   ;;  %6398 = vmatpush1.bf16.msra.mxu1 %v8857_v50 }
 0x2ad   :  { %v7946_v55 = vpop.f32.mrf.mxu0  ;;  %v8863_v54 = vld [vmem:[#allocation12 + $0xa8] ss:$28 sps:$4 sm:$0xff]   ;;  %6399 = vmatprep.subr.bf16.mxu1 %v8865_v43  ;;  %v8872_v61 = vld [vmem:[#allocation12 + $0x3f0] ss:$28 sps:$4 sm:$0xff]   ;;  %v8877_v62 = vld [vmem:[#allocation12 + $0x3c] ss:$28 sps:$4 sm:$0xff]  }
 0x2ae   :  { %v7968_v56 = vpop.f32.mrf.mxu1  ;;  %v3274_v2 = vadd.f32 %v7966_v4, %v3234_v63  ;;  %v8866_v55 = vld [vmem:[#allocation12 + $0x428] ss:$28 sps:$4 sm:$0xff]   ;;  %v8880_v63 = vld [vmem:[#allocation12 + $0x3bc] ss:$28 sps:$4 sm:$0xff]   ;;  %v3741_v43 = vld [vmem:[#allocation9 + $0x10] sm:$0xff] }
 0x2af   :  { %v8871_v56 = vld [vmem:[#allocation12 + $0x74] ss:$28 sps:$4 sm:$0xff]   ;;  %v3739_v50 = vld [vmem:[#allocation9] sm:$0xff] }
 0x2b0   :  { %6400 = vmatpush1.bf16.msra.mxu1 %v8863_v54  ;;  %v8875_v4 = vld [vmem:[#allocation12 + $0x38] ss:$28 sps:$4 sm:$0xff]  }
 0x2b1   :  { %6401 = vmatprep.subr.bf16.mxu1 %v8871_v56  ;;  %v3793_v56 = vrot.slane %v3739_v50, %v9767_v37 }
 0x2b4   :  { %6402 = vmatpush1.bf16.msra.mxu1 %v8869_v60  ;;  %v9896_v60 = vld [vmem:[#allocation10] sm:$0xff] }
 0x2b5   :  { %6403 = vmatprep.subr.bf16.mxu1 %v8877_v62 }
 0x2b8   :  { %6404 = vmatpush1.bf16.msra.mxu1 %v8875_v4  ;;  %v3762_v4 = vrot.slane %v3741_v43, %v9764_v22 }
 0x2c7   :  { %v3313_v3 = vpop.f32.mrf.mxu0 }
 0x2c8   :  { %v3314_v6 = vadd.f32 %v3313_v3, %v3274_v2  ;;  %v8011_v11 = vpop.f32.mrf.mxu1  ;;  %v8878_v2 = vld [vmem:[#allocation12 + $0x3b8] ss:$28 sps:$4 sm:$0xff]   ;;  %v8883_v3 = vld [vmem:[#allocation12 + $0x4] ss:$28 sps:$4 sm:$0xff]  }
 0x2c9   :  { %v8194_v7 = vpop.f32.mrf.mxu0  ;;  %6405 = vmatprep.subr.bf16.mxu1 %v8883_v3 }
 0x2ca   :  { %v3325_v10 = vmax.f32 %v3314_v6, 0.0  ;;  %v8012_v12 = vpop.f32.mrf.mxu1  ;;  %v8886_v6 = vld [vmem:[#allocation12 + $0x384] ss:$28 sps:$4 sm:$0xff]  }
 0x2cb   :  { %v3316_v8 = vpop.f32.mrf.mxu0  ;;  %v8013_v16 = vadd.f32 %v8012_v12, %v8011_v11  ;;  %v8881_v7 = vld [vmem:[#allocation12] ss:$28 sps:$4 sm:$0xff]   ;;  %v8887_v11 = vld [vmem:[#allocation12 + $0x348] ss:$28 sps:$4 sm:$0xff]  }
 0x2cc   :  { %8229 = vmatmul.mubr.f32.vlgmr.msra.gmra.mxu0 %v3325_v10  ;;  %v8884_v10 = vld [vmem:[#allocation12 + $0x380] ss:$28 sps:$4 sm:$0xff]   ;;  %v8889_v8 = vld [vmem:[#allocation12 + $0x34c] ss:$28 sps:$4 sm:$0xff]   ;;  %6406 = vmatpush1.bf16.msra.mxu1 %v8881_v7 }
 0x2cd   :  { %v8195_v40 = vpop.f32.mrf.mxu0  ;;  %v3512_v19 = vadd.f32 %v8013_v16, %v7504_v21  ;;  %6433 = vmatpush1.bf16.msra.mxu0 %v8842_v34  ;;  %6407 = vmatprep.subr.bf16.mxu1 %v8889_v8  ;;  %v8890_v12 = vld [vmem:[#allocation12 + $0x6c8] ss:$28 sps:$4 sm:$0xff]   ;;  %v8896_v16 = vld [vmem:[#allocation12 + $0x690] ss:$28 sps:$4 sm:$0xff]   ;;  %v8901_v21 = vld [vmem:[#allocation12 + $0x2dc] ss:$28 sps:$4 sm:$0xff]   ;;  %v3841_v8 = vrot.slane %v9896_v60, %v9767_v37 }
 0x2ce   :  { %6434 = vmatprep.subr.bf16.mxu0 %v8850_v1  ;;  %v8892_v40 = vld [vmem:[#allocation12 + $0x6cc] ss:$28 sps:$4 sm:$0xff]  }
 0x2cf   :  { %v8917_v34 = vld [vmem:[#allocation12 + $0x230] ss:$28 sps:$4 sm:$0xff]  }
 0x2d0   :  { %6408 = vmatpush2.bf16.msra.mxu1 %v8887_v11 }
 0x2d1   :  { %6435 = vmatpush1.bf16.msra.mxu0 %v8848_v44  ;;  %v8926_v44 = vld [vmem:[#allocation12 + $0x578] ss:$28 sps:$4 sm:$0xff]  }
 0x2d2   :  { %6436 = vmatprep.subr.bf16.mxu0 %v8856_v33  ;;  %v8931_v33 = vld [vmem:[#allocation12 + $0x1c4] ss:$28 sps:$4 sm:$0xff]  }
 0x2d5   :  { %6437 = vmatpush1.bf16.msra.mxu0 %v8854_v49  ;;  %v8929_v49 = vld [vmem:[#allocation12 + $0x1c0] ss:$28 sps:$4 sm:$0xff]  }
 0x2d6   :  { %6438 = vmatprep.subr.bf16.mxu0 %v8862_v18  ;;  %v8940_v18 = vld [vmem:[#allocation12 + $0xc0c] ss:$28 sps:$4 sm:$0xff]  }
 0x2d9   :  { %6439 = vmatpush1.bf16.msra.mxu0 %v8860_v51  ;;  %v3740_v51 = vld [vmem:[#allocation9 + $0x8] sm:$0xff] }
 0x2da   :  { %6440 = vmatprep.subr.bf16.mxu0 %v8868_v53  ;;  %v3743_v53 = vld [vmem:[#allocation9 + $0x20] sm:$0xff] }
 0x2db   :  { %v3770_v7 = vrot.slane %v3743_v53, %v9764_v22 }
 0x2dd   :  { %6441 = vmatpush1.bf16.msra.mxu0 %v8866_v55  ;;  %v3744_v55 = vld [vmem:[#allocation9 + $0x28] sm:$0xff] }
 0x2de   :  { %6442 = vmatprep.subr.bf16.mxu0 %v8874_v58  ;;  %v3797_v58 = vrot.slane %v3740_v51, %v9767_v37  ;;  %v3774_v11 = vrot.slane %v3744_v55, %v9764_v22 }
 0x2e1   :  { %6443 = vmatpush1.bf16.msra.mxu0 %v8872_v61  ;;  %v3758_v61 = vrot.slane %v3740_v51, %v9764_v22 }
 0x2e2   :  { %6444 = vmatprep.subr.bf16.mxu0 %v8880_v63  ;;  %v3754_v63 = vrot.slane %v3739_v50, %v9764_v22 }
 0x2e5   :  { %6445 = vmatpush1.bf16.msra.mxu0 %v8878_v2  ;;  %v3801_v2 = vrot.slane %v3741_v43, %v9767_v37 }
 0x2e6   :  { %6446 = vmatprep.subr.bf16.mxu0 %v8886_v6  ;;  %v3809_v6 = vrot.slane %v3743_v53, %v9767_v37  ;;  %v8938_v53 = vld [vmem:[#allocation12 + $0xc08] ss:$28 sps:$4 sm:$0xff]  }
 0x2e7   :  { %v8046_v15 = vpop.f32.mrf.mxu0 }
 0x2e9   :  { %v8047_v45 = vpop.f32.mrf.mxu0  ;;  %6447 = vmatpush1.bf16.msra.mxu0 %v8884_v10  ;;  %v3813_v10 = vrot.slane %v3744_v55, %v9767_v37 }
 0x2ea   :  { %v8048_v52 = vadd.f32 %v8047_v45, %v8046_v15  ;;  %v8895_v15 = vld [vmem:[#allocation12 + $0x314] ss:$28 sps:$4 sm:$0xff]   ;;  %6448 = vmatprep.subr.bf16.mxu0 %v8892_v40  ;;  %v3849_v40 = vrot.slane %v9896_v60, %v9820_v14 }
 0x2eb   :  { %v8893_v45 = vld [vmem:[#allocation12 + $0x310] ss:$28 sps:$4 sm:$0xff]   ;;  %6409 = vmatprep.subr.bf16.mxu1 %v8895_v15  ;;  %v3845_v15 = vrot.slane %v9896_v60, %v9828_v24 }
 0x2ec   :  { %v3582_v20 = vadd.f32 %v8048_v52, %v3512_v19  ;;  %6410 = vmatpush2.bf16.msra.mxu1 %v8893_v45  ;;  %v8899_v52 = vld [vmem:[#allocation12 + $0x2d8] ss:$28 sps:$4 sm:$0xff]   ;;  %v3853_v45 = vrot.slane %v9896_v60, %v9868_v27 }
 0x2ed   :  { %6449 = vmatpush2.bf16.msra.mxu0 %v8890_v12  ;;  %6411 = vmatprep.subr.bf16.mxu1 %v8901_v21  ;;  %v8902_v19 = vld [vmem:[#allocation12 + $0x658] ss:$28 sps:$4 sm:$0xff]   ;;  %v3837_v12 = vrot.slane %v9896_v60, %v9764_v22 }
 0x2f0   :  { %6412 = vmatpush2.bf16.msra.mxu1 %v8899_v52 }
 0x351   :  { %v8081_v13 = vpop.f32.mrf.mxu1 }
 0x353   :  { %v8082_v17 = vpop.f32.mrf.mxu1 }
 0x354   :  { %v8083_v36 = vadd.f32 %v8082_v17, %v8081_v13  ;;  %v8898_v13 = vld [vmem:[#allocation12 + $0x694] ss:$28 sps:$4 sm:$0xff]   ;;  %v8904_v17 = vld [vmem:[#allocation12 + $0x65c] ss:$28 sps:$4 sm:$0xff]  }
 0x355   :  { %6450 = vmatprep.subr.bf16.mxu0 %v8898_v13  ;;  %v3857_v13 = vrot.slane %v9896_v60, %v9871_v28 }
 0x356   :  { %v3652_v23 = vadd.f32 %v8083_v36, %v3582_v20  ;;  %6451 = vmatpush2.bf16.msra.mxu0 %v8896_v16  ;;  %v8907_v36 = vld [vmem:[#allocation12 + $0x2a4] ss:$28 sps:$4 sm:$0xff]  }
 0x357   :  { %6452 = vmatprep.subr.bf16.mxu0 %v8904_v17  ;;  %v8910_v20 = vld [vmem:[#allocation12 + $0x624] ss:$28 sps:$4 sm:$0xff]   ;;  %6413 = vmatprep.subr.bf16.mxu1 %v8907_v36 }
 0x35a   :  { %6453 = vmatpush2.bf16.msra.mxu0 %v8902_v19 }
 0x35b   :  { %6454 = vmatprep.subr.bf16.mxu0 %v8910_v20 }
 0x38c   :  { %v3721_v25 = vpop.f32.mrf.mxu0 }
 0x38d   :  { %v9882_v29 = vadd.f32 %v3721_v25, %v3652_v23  ;;  %v8905_v23 = vld [vmem:[#allocation12 + $0x2a0] ss:$28 sps:$4 sm:$0xff]  }
 0x38e   :  { %v8230_v30 = vpop.f32.mrf.mxu0  ;;  %v8908_v25 = vld [vmem:[#allocation12 + $0x620] ss:$28 sps:$4 sm:$0xff]   ;;  %6414 = vmatpush2.bf16.msra.mxu1 %v8905_v23 }
 0x38f   :  { %3725 = vst [vmem:[%s10070_s11] sm:$0xff] %v9882_v29  ;;  %v3727_v31 = vmul.f32 1.442695, %v9882_v29  ;;  %s9619_s11 = smov 126   ;;  %v8913_v30 = vld [vmem:[#allocation12 + $0x26c] ss:$28 sps:$4 sm:$0xff]   ;;  %6455 = vmatpush2.bf16.msra.mxu0 %v8908_v25 }
 0x390   :  { %6415 = vmatprep.subr.bf16.mxu1 %v8913_v30 }
 0x391   :  { %9399 = vpow2.f32 %v3727_v31  ;;  %v8916_v31 = vld [vmem:[#allocation12 + $0x5ec] ss:$28 sps:$4 sm:$0xff]  }
 0x392   :  { %6456 = vmatprep.subr.bf16.mxu0 %v8916_v31  ;;  %6416 = vmatpush2.bf16.msra.mxu1 %v8911_v59 }
 0x393   :  { %6457 = vmatpush2.bf16.msra.mxu0 %v8914_v35 }
 0x394   :  { %6458 = vmatprep.subr.bf16.mxu0 %v8922_v26 }
 0x397   :  { %6459 = vmatpush2.bf16.msra.mxu0 %v8920_v48 }
 0x398   :  { %6460 = vmatprep.subr.bf16.mxu0 %v8928_v46 }
 0x39b   :  { %6461 = vmatpush2.bf16.msra.mxu0 %v8926_v44 }
 0x39c   :  { %6462 = vmatprep.subr.bf16.mxu0 %v8934_v47 }
 0x39e   :  { %v9400_v42 = vpop.eup %9399 }
 0x39f   :  { %v3733_v41 = vmul.f32 %v9400_v42, %v3731_v39  ;;  %v8919_v39 = vld [vmem:[#allocation12 + $0x234] ss:$28 sps:$4 sm:$0xff]   ;;  %6463 = vmatpush2.bf16.msra.mxu0 %v8932_v9 }
 0x3a0   :  { %6417 = vmatprep.subr.bf16.mxu1 %v8919_v39  ;;  %6514 = vmatprep.subr.bf16.mxu0 %v8940_v18 }
 0x3a1   :  { %3735 = vrot.lane.b32.xlu0 %v3733_v41, %s9619_s11  ;;  %6418 = vmatpush2.bf16.msra.mxu1 %v8917_v34  ;;  %v8925_v41 = vld [vmem:[#allocation12 + $0x1fc] ss:$28 sps:$4 sm:$0xff]  }
 0x3a2   :  { %6419 = vmatprep.subr.bf16.mxu1 %v8925_v41 }
 0x3a5   :  { %6420 = vmatpush2.bf16.msra.mxu1 %v8923_v5 }
 0x3a6   :  { %6421 = vmatprep.subr.bf16.mxu1 %v8931_v33 }
 0x3a9   :  { %6422 = vmatpush2.bf16.msra.mxu1 %v8929_v49 }
 0x413   :  { %v3736_v1 = vpop.permute.xlu0 %3735 }
 0x414   :  { %v3738_v42 = vadd.f32 %v3736_v1, %v9882_v29  ;;  %v8937_v29 = vld [vmem:[#allocation12 + $0x88c] ss:$28 sps:$4 sm:$0xff]  }
 0x415   :  { %6473 = vmatprep.subr.bf16.mxu1 %v8937_v29 }
 0x416   :  { %3748 = vperm.xlu1 %8269, %v3738_v42  }
 0x41a   :  { %8270 = vset.pattern.permute.xlu1 %v9618_v32  ;;  %v3742_v32 = vld [vmem:[#allocation9 + $0x18] sm:$0xff] }
 0x41b   :  { %3787 = vperm.xlu1 %8270, %v3738_v42   ;;  %v3766_v62 = vrot.slane %v3742_v32, %v9764_v22  ;;  %v3805_v3 = vrot.slane %v3742_v32, %v9767_v37  ;;  %v8935_v32 = vld [vmem:[#allocation12 + $0x888] ss:$28 sps:$4 sm:$0xff]  }
 0x491   :  { %v9892_v54 = vpop.permute.xlu1 %3748 }
 0x492   :  { %v3780_v21 = vmul.f32 %v3758_v61, %v9892_v54  ;;  %v3782_v17 = vmul.f32 %v3766_v62, %v9892_v54  ;;  %v3779_v52 = vmul.f32 %v3754_v63, %v9892_v54  ;;  %v3781_v19 = vmul.f32 %v3762_v4, %v9892_v54  ;;  %v8946_v61 = vld [vmem:[#allocation12 + $0xbd4] ss:$28 sps:$4 sm:$0xff]  }
 0x493   :  { %v3784_v59 = vmul.f32 %v3774_v11, %v9892_v54  ;;  %v3783_v35 = vmul.f32 %v3770_v7, %v9892_v54  ;;  %v8941_v63 = vld [vmem:[#allocation12 + $0x850] ss:$28 sps:$4 sm:$0xff]   ;;  %v8950_v7 = vld [vmem:[#allocation12 + $0xb98] ss:$28 sps:$4 sm:$0xff]   ;;  %v8953_v11 = vld [vmem:[#allocation12 + $0x7e0] ss:$28 sps:$4 sm:$0xff]  }
 0x494   :  { %v8944_v4 = vld [vmem:[#allocation12 + $0xbd0] ss:$28 sps:$4 sm:$0xff]  }
 0x496   :  { %v9920_v16 = vpop.permute.xlu1 %3787 }
 0x497   :  { %v3818_v36 = vmul.f32 %v3793_v56, %v9920_v16  ;;  %v3819_v20 = vmul.f32 %v3797_v58, %v9920_v16  ;;  %v3820_v23 = vmul.f32 %v3801_v2, %v9920_v16  ;;  %v3821_v25 = vmul.f32 %v3805_v3, %v9920_v16  ;;  %v8943_v58 = vld [vmem:[#allocation12 + $0x854] ss:$28 sps:$4 sm:$0xff]   ;;  %v8949_v2 = vld [vmem:[#allocation12 + $0x81c] ss:$28 sps:$4 sm:$0xff]  }
 0x498   :  { %v3822_v30 = vmul.f32 %v3809_v6, %v9920_v16  ;;  %v3823_v31 = vmul.f32 %v3813_v10, %v9920_v16  ;;  %v8952_v3 = vld [vmem:[#allocation12 + $0xb9c] ss:$28 sps:$4 sm:$0xff]   ;;  %v8955_v10 = vld [vmem:[#allocation12 + $0x7e4] ss:$28 sps:$4 sm:$0xff]  }
 0x499   :  { %v3826_v34 = vadd.f32 %v3819_v20, %v3780_v21  ;;  %v3828_v39 = vadd.f32 %v3821_v25, %v3782_v17  ;;  %v3825_v48 = vadd.f32 %v3818_v36, %v3779_v52  ;;  %v3827_v26 = vadd.f32 %v3820_v23, %v3781_v19  ;;  %v8947_v6 = vld [vmem:[#allocation12 + $0x818] ss:$28 sps:$4 sm:$0xff]   ;;  %v8959_v17 = vld [vmem:[#allocation12 + $0x7a8] ss:$28 sps:$4 sm:$0xff]   ;;  %v8965_v25 = vld [vmem:[#allocation12 + $0x770] ss:$28 sps:$4 sm:$0xff]  }
 0x49a   :  { %v3830_v1 = vadd.f32 %v3823_v31, %v3784_v59  ;;  %v3829_v42 = vadd.f32 %v3822_v30, %v3783_v35  ;;  %v8962_v52 = vld [vmem:[#allocation12 + $0xb28] ss:$28 sps:$4 sm:$0xff]   ;;  %v8967_v36 = vld [vmem:[#allocation12 + $0x774] ss:$28 sps:$4 sm:$0xff]   ;;  %v8973_v31 = vld [vmem:[#allocation12 + $0x73c] ss:$28 sps:$4 sm:$0xff]  }
 0x49b   :  { %v3870_v5 = vadd.f32 %v3841_v8, %v3826_v34  ;;  %v3872_v41 = vadd.f32 %v3849_v40, %v3828_v39  ;;  %v3869_v44 = vadd.f32 %v3837_v12, %v3825_v48  ;;  %v3871_v46 = vadd.f32 %v3845_v15, %v3827_v26  ;;  %v8958_v8 = vld [vmem:[#allocation12 + $0xb64] ss:$28 sps:$4 sm:$0xff]   ;;  %v3745_v40 = vld [vmem:[#allocation9 + $0x30] sm:$0xff]  ;;  %v8976_v59 = vld [vmem:[#allocation12 + $0xabc] ss:$28 sps:$4 sm:$0xff]  }
 0x49c   :  { %v3874_v33 = vadd.f32 %v3857_v13, %v3830_v1  ;;  %v9934_v47 = vadd.f32 %v3853_v45, %v3829_v42  ;;  %v8956_v12 = vld [vmem:[#allocation12 + $0xb60] ss:$28 sps:$4 sm:$0xff]   ;;  %v3817_v15 = vrot.slane %v3745_v40, %v9767_v37  ;;  %v8961_v13 = vld [vmem:[#allocation12 + $0x7ac] ss:$28 sps:$4 sm:$0xff]   ;;  %v3778_v21 = vrot.slane %v3745_v40, %v9764_v22  ;;  %v8970_v20 = vld [vmem:[#allocation12 + $0xaf4] ss:$28 sps:$4 sm:$0xff]  }
 0x49d   :  { %v3877_v49 = vmax.f32 %v3870_v5, 0.0  ;;  %v3879_v9 = vmax.f32 %v3872_v41, 0.0  ;;  %v3876_v29 = vmax.f32 %v3869_v44, 0.0  ;;  %v3878_v18 = vmax.f32 %v3871_v46, 0.0  ;;  %v8964_v45 = vld [vmem:[#allocation12 + $0xb2c] ss:$28 sps:$4 sm:$0xff]  }
 0x49e   :  { %v3881_v50 = vmax.f32 %v3874_v33, 0.0  ;;  %v3824_v19 = vmul.f32 %v3817_v15, %v9920_v16  ;;  %v3785_v23 = vmul.f32 %v3778_v21, %v9892_v54  ;;  %v8968_v30 = vld [vmem:[#allocation12 + $0xaf0] ss:$28 sps:$4 sm:$0xff]   ;;  %v3861_v34 = vrot.slane %v9896_v60, %v9878_v57  ;;  %v8971_v16 = vld [vmem:[#allocation12 + $0x738] ss:$28 sps:$4 sm:$0xff]  }
 0x49f   :  { %v9936_v51 = vpack.c.bf16 %v3877_v49, %v3877_v49  ;;  %v9938_v43 = vpack.c.bf16 %v3879_v9, %v3879_v9  ;;  %v9940_v55 = vpack.c.bf16 %v3876_v29, %v3876_v29  ;;  %v9942_v56 = vpack.c.bf16 %v3878_v18, %v3878_v18  ;;  %v8974_v39 = vld [vmem:[#allocation12 + $0xab8] ss:$28 sps:$4 sm:$0xff]   ;;  %v8979_v48 = vld [vmem:[#allocation12 + $0x704] ss:$28 sps:$4 sm:$0xff]   ;;  %v8985_v5 = vld [vmem:[#allocation12 + $0xa4c] ss:$28 sps:$4 sm:$0xff]  }
 0x4a0   :  { %v9948_v62 = vpack.c.bf16 %v3881_v50, %v3881_v50  ;;  %v3831_v35 = vadd.f32 %v3824_v19, %v3785_v23  ;;  %v8982_v54 = vld [vmem:[#allocation12 + $0xa84] ss:$28 sps:$4 sm:$0xff]   ;;  %v8988_v44 = vld [vmem:[#allocation12 + $0x194] ss:$28 sps:$4 sm:$0xff]   ;;  %v8994_v9 = vld [vmem:[#allocation12 + $0x15c] ss:$28 sps:$4 sm:$0xff]  }
 0x4a1   :  { %6423 = vmatprep.mubr.bf16.mxu1 %v9936_v51  ;;  %6464 = vmatprep.mubr.bf16.mxu0 %v9938_v43  ;;  %v8977_v1 = vld [vmem:[#allocation12 + $0x700] ss:$28 sps:$4 sm:$0xff]   ;;  %v8983_v60 = vld [vmem:[#allocation12 + $0xa48] ss:$28 sps:$4 sm:$0xff]   ;;  %v8986_v46 = vld [vmem:[#allocation12 + $0x190] ss:$28 sps:$4 sm:$0xff]  }
 0x4a2   :  { %6424 = vmatmul.mubr.bf16.vlgmr.msra.gmra.mxu1 %v9940_v55  ;;  %6465 = vmatmul.mubr.bf16.vlgmr.msra.gmra.mxu0 %v9942_v56  ;;  %v3875_v26 = vadd.f32 %v3861_v34, %v3831_v35  ;;  %v8980_v42 = vld [vmem:[#allocation12 + $0xa80] ss:$28 sps:$4 sm:$0xff]   ;;  %v8991_v49 = vld [vmem:[#allocation12 + $0xa14] ss:$28 sps:$4 sm:$0xff]  }
 0x4a3   :  { %6474 = vmatpush1.bf16.msra.mxu1 %v8935_v32  ;;  %6515 = vmatpush1.bf16.msra.mxu0 %v8938_v53  ;;  %v8989_v29 = vld [vmem:[#allocation12 + $0xa10] ss:$28 sps:$4 sm:$0xff]   ;;  %v8992_v18 = vld [vmem:[#allocation12 + $0x158] ss:$28 sps:$4 sm:$0xff]   ;;  %v9000_v32 = vld [vmem:[#allocation12 + $0x124] ss:$28 sps:$4 sm:$0xff]  }
 0x4a4   :  { %6505 = vmatprep.mubr.bf16.mxu1 %v9948_v62  ;;  %6475 = vmatprep.subr.bf16.mxu1 %v8943_v58  ;;  %v3882_v41 = vmax.f32 %v3875_v26, 0.0  ;;  %v8997_v50 = vld [vmem:[#allocation12 + $0x9dc] ss:$28 sps:$4 sm:$0xff]   ;;  %v9033_v23 = vld [vmem:[#allocation12 + $0x354] ss:$28 sps:$4 sm:$0xff]  }
 0x4a5   :  { %6516 = vmatprep.subr.bf16.mxu0 %v8946_v61  ;;  %6546 = vmatprep.mubr.bf16.mxu0 %v9614_v0  ;;  %v8995_v53 = vld [vmem:[#allocation12 + $0x9d8] ss:$28 sps:$4 sm:$0xff]   ;;  %v8998_v58 = vld [vmem:[#allocation12 + $0x120] ss:$28 sps:$4 sm:$0xff]  }
 0x4a6   :  { %v9958_v33 = vpack.c.bf16 %v3882_v41, %v3882_v41  ;;  %v9003_v61 = vld [vmem:[#allocation12 + $0x9a4] ss:$28 sps:$4 sm:$0xff]   ;;  %v9018_v40 = vld [vmem:[#allocation12 + $0x7c] ss:$28 sps:$4 sm:$0xff]  }
 0x4a7   :  { %6476 = vmatpush1.bf16.msra.mxu1 %v8941_v63  ;;  %6517 = vmatpush1.bf16.msra.mxu0 %v8944_v4  ;;  %v9006_v63 = vld [vmem:[#allocation12 + $0xec] ss:$28 sps:$4 sm:$0xff]   ;;  %v9001_v4 = vld [vmem:[#allocation12 + $0x9a0] ss:$28 sps:$4 sm:$0xff]  }
 0x4a8   :  { %6477 = vmatprep.subr.bf16.mxu1 %v8949_v2  ;;  %6518 = vmatprep.subr.bf16.mxu0 %v8952_v3  ;;  %v9004_v2 = vld [vmem:[#allocation12 + $0xe8] ss:$28 sps:$4 sm:$0xff]   ;;  %v9021_v15 = vld [vmem:[#allocation12 + $0x8fc] ss:$28 sps:$4 sm:$0xff]  }
 0x4a9   :  { %v9009_v3 = vld [vmem:[#allocation12 + $0x96c] ss:$28 sps:$4 sm:$0xff]   ;;  %v9022_v21 = vld [vmem:[#allocation12 + $0x40] ss:$28 sps:$4 sm:$0xff]  }
 0x4aa   :  { %v9025_v19 = vld [vmem:[#allocation12 + $0x8c0] ss:$28 sps:$4 sm:$0xff]   ;;  %v9052_v41 = vld [vmem:[#allocation12 + $0x468] ss:$28 sps:$4 sm:$0xff]  }
 0x4ab   :  { %6478 = vmatpush1.bf16.msra.mxu1 %v8947_v6  ;;  %6519 = vmatpush1.bf16.msra.mxu0 %v8950_v7  ;;  %v9012_v6 = vld [vmem:[#allocation12 + $0xb4] ss:$28 sps:$4 sm:$0xff]   ;;  %v9007_v7 = vld [vmem:[#allocation12 + $0x968] ss:$28 sps:$4 sm:$0xff]   ;;  %v9039_v35 = vld [vmem:[#allocation12 + $0x31c] ss:$28 sps:$4 sm:$0xff]  }
 0x4ac   :  { %6479 = vmatprep.subr.bf16.mxu1 %v8955_v10  ;;  %6520 = vmatprep.subr.bf16.mxu0 %v8958_v8  ;;  %v9010_v10 = vld [vmem:[#allocation12 + $0xb0] ss:$28 sps:$4 sm:$0xff]   ;;  %v9042_v34 = vld [vmem:[#allocation12 + $0x4dc] ss:$28 sps:$4 sm:$0xff]  }
 0x4ad   :  { %v9015_v8 = vld [vmem:[#allocation12 + $0x934] ss:$28 sps:$4 sm:$0xff]   ;;  %v9046_v26 = vld [vmem:[#allocation12 + $0x4a0] ss:$28 sps:$4 sm:$0xff]  }
 0x4af   :  { %6480 = vmatpush1.bf16.msra.mxu1 %v8953_v11  ;;  %6521 = vmatpush1.bf16.msra.mxu0 %v8956_v12  ;;  %v9013_v11 = vld [vmem:[#allocation12 + $0x930] ss:$28 sps:$4 sm:$0xff]   ;;  %v9016_v12 = vld [vmem:[#allocation12 + $0x78] ss:$28 sps:$4 sm:$0xff]  }
 0x4b0   :  { %6481 = vmatprep.subr.bf16.mxu1 %v8961_v13  ;;  %6522 = vmatprep.subr.bf16.mxu0 %v8964_v45  ;;  %v9024_v13 = vld [vmem:[#allocation12 + $0x44] ss:$28 sps:$4 sm:$0xff]   ;;  %v9019_v45 = vld [vmem:[#allocation12 + $0x8f8] ss:$28 sps:$4 sm:$0xff]  }
 0x4b3   :  { %6482 = vmatpush1.bf16.msra.mxu1 %v8959_v17  ;;  %6523 = vmatpush1.bf16.msra.mxu0 %v8962_v52  ;;  %v9027_v17 = vld [vmem:[#allocation12 + $0x8c4] ss:$28 sps:$4 sm:$0xff]   ;;  %v9030_v52 = vld [vmem:[#allocation12 + $0xc] ss:$28 sps:$4 sm:$0xff]  }
 0x4b4   :  { %6483 = vmatprep.subr.bf16.mxu1 %v8967_v36  ;;  %6524 = vmatprep.subr.bf16.mxu0 %v8970_v20  ;;  %v9028_v36 = vld [vmem:[#allocation12 + $0x8] ss:$28 sps:$4 sm:$0xff]   ;;  %v3880_v20 = vmax.f32 %v9934_v47, 0.0 }
 0x4b5   :  { %v9045_v47 = vld [vmem:[#allocation12 + $0x2e4] ss:$28 sps:$4 sm:$0xff]  }
 0x4b7   :  { %6484 = vmatpush1.bf16.msra.mxu1 %v8965_v25  ;;  %6525 = vmatpush1.bf16.msra.mxu0 %v8968_v30  ;;  %v9036_v25 = vld [vmem:[#allocation12 + $0x514] ss:$28 sps:$4 sm:$0xff]  }
 0x4b8   :  { %6485 = vmatprep.subr.bf16.mxu1 %v8973_v31  ;;  %6526 = vmatprep.subr.bf16.mxu0 %v8976_v59  ;;  %v9031_v30 = vld [vmem:[#allocation12 + $0x350] ss:$28 sps:$4 sm:$0xff]   ;;  %v9963_v59 = vpack.c.bf16 %v3880_v20, %v3880_v20  ;;  %v9100_v20 = vld [vmem:[#allocation12 + $0x7e8] ss:$28 sps:$4 sm:$0xff]  }
 0x4b9   :  { %v9034_v31 = vld [vmem:[#allocation12 + $0x510] ss:$28 sps:$4 sm:$0xff]  }
 0x4bb   :  { %6486 = vmatpush1.bf16.msra.mxu1 %v8971_v16  ;;  %6527 = vmatpush1.bf16.msra.mxu0 %v8974_v39  ;;  %v9037_v16 = vld [vmem:[#allocation12 + $0x318] ss:$28 sps:$4 sm:$0xff]  }
 0x4bc   :  { %6487 = vmatprep.subr.bf16.mxu1 %v8979_v48  ;;  %6528 = vmatprep.subr.bf16.mxu0 %v8982_v54  ;;  %v9040_v39 = vld [vmem:[#allocation12 + $0x4d8] ss:$28 sps:$4 sm:$0xff]   ;;  %v9048_v48 = vld [vmem:[#allocation12 + $0x4a4] ss:$28 sps:$4 sm:$0xff]  }
 0x4bd   :  { %v9043_v54 = vld [vmem:[#allocation12 + $0x2e0] ss:$28 sps:$4 sm:$0xff]  }
 0x4bf   :  { %6488 = vmatpush1.bf16.msra.mxu1 %v8977_v1  ;;  %6529 = vmatpush1.bf16.msra.mxu0 %v8980_v42  ;;  %v9051_v1 = vld [vmem:[#allocation12 + $0x2ac] ss:$28 sps:$4 sm:$0xff]  }
 0x4c0   :  { %6489 = vmatprep.subr.bf16.mxu1 %v8985_v5  ;;  %6555 = vmatprep.subr.bf16.mxu0 %v8988_v44  ;;  %v9054_v42 = vld [vmem:[#allocation12 + $0x46c] ss:$28 sps:$4 sm:$0xff]   ;;  %v9057_v44 = vld [vmem:[#allocation12 + $0x274] ss:$28 sps:$4 sm:$0xff]  }
 0x4c1   :  { %v9049_v5 = vld [vmem:[#allocation12 + $0x2a8] ss:$28 sps:$4 sm:$0xff]  }
 0x4c2   :  { %6547 = vmatmul.mubr.bf16.vlgmr.msra.gmra.mxu0 %v9958_v33 }
 0x4c3   :  { %6490 = vmatpush2.bf16.msra.mxu1 %v8983_v60  ;;  %6556 = vmatpush1.bf16.msra.mxu0 %v8986_v46  ;;  %v9060_v60 = vld [vmem:[#allocation12 + $0x434] ss:$28 sps:$4 sm:$0xff]  }
 0x4c4   :  { %6587 = vmatprep.mubr.bf16.mxu0 %v9936_v51  ;;  %6491 = vmatprep.subr.bf16.mxu1 %v8991_v49  ;;  %v9055_v46 = vld [vmem:[#allocation12 + $0x270] ss:$28 sps:$4 sm:$0xff]  }
 0x4c5   :  { %6557 = vmatprep.subr.bf16.mxu0 %v8994_v9  ;;  %v9058_v49 = vld [vmem:[#allocation12 + $0x430] ss:$28 sps:$4 sm:$0xff]   ;;  %v9063_v9 = vld [vmem:[#allocation12 + $0x23c] ss:$28 sps:$4 sm:$0xff]  }
 0x4c7   :  { %6492 = vmatpush2.bf16.msra.mxu1 %v8989_v29  ;;  %6558 = vmatpush1.bf16.msra.mxu0 %v8992_v18  ;;  %v9066_v29 = vld [vmem:[#allocation12 + $0x3fc] ss:$28 sps:$4 sm:$0xff]  }
 0x4c8   :  { %6493 = vmatprep.subr.bf16.mxu1 %v8997_v50  ;;  %6559 = vmatprep.subr.bf16.mxu0 %v9000_v32  ;;  %v9061_v18 = vld [vmem:[#allocation12 + $0x238] ss:$28 sps:$4 sm:$0xff]   ;;  %v9069_v32 = vld [vmem:[#allocation12 + $0x204] ss:$28 sps:$4 sm:$0xff]  }
 0x4c9   :  { %v9064_v50 = vld [vmem:[#allocation12 + $0x3f8] ss:$28 sps:$4 sm:$0xff]  }
 0x4cb   :  { %6494 = vmatpush2.bf16.msra.mxu1 %v8995_v53  ;;  %6560 = vmatpush1.bf16.msra.mxu0 %v8998_v58  ;;  %v9072_v53 = vld [vmem:[#allocation12 + $0x3c4] ss:$28 sps:$4 sm:$0xff]  }
 0x4cc   :  { %6495 = vmatprep.subr.bf16.mxu1 %v9003_v61  ;;  %6561 = vmatprep.subr.bf16.mxu0 %v9006_v63  ;;  %v9067_v58 = vld [vmem:[#allocation12 + $0x200] ss:$28 sps:$4 sm:$0xff]   ;;  %v9075_v63 = vld [vmem:[#allocation12 + $0x1cc] ss:$28 sps:$4 sm:$0xff]  }
 0x4cd   :  { %v9070_v61 = vld [vmem:[#allocation12 + $0x3c0] ss:$28 sps:$4 sm:$0xff]  }
 0x4cf   :  { %6496 = vmatpush2.bf16.msra.mxu1 %v9001_v4  ;;  %6562 = vmatpush1.bf16.msra.mxu0 %v9004_v2  ;;  %v9078_v4 = vld [vmem:[#allocation12 + $0x38c] ss:$28 sps:$4 sm:$0xff]  }
 0x4d0   :  { %6497 = vmatprep.subr.bf16.mxu1 %v9009_v3  ;;  %6563 = vmatprep.subr.bf16.mxu0 %v9012_v6  ;;  %v9073_v2 = vld [vmem:[#allocation12 + $0x1c8] ss:$28 sps:$4 sm:$0xff]   ;;  %v9081_v6 = vld [vmem:[#allocation12 + $0x6d4] ss:$28 sps:$4 sm:$0xff]  }
 0x4d1   :  { %v9076_v3 = vld [vmem:[#allocation12 + $0x388] ss:$28 sps:$4 sm:$0xff]  }
 0x4d3   :  { %6498 = vmatpush2.bf16.msra.mxu1 %v9007_v7  ;;  %6564 = vmatpush1.bf16.msra.mxu0 %v9010_v10  ;;  %v9084_v7 = vld [vmem:[#allocation12 + $0x894] ss:$28 sps:$4 sm:$0xff]  }
 0x4d4   :  { %6499 = vmatprep.subr.bf16.mxu1 %v9015_v8  ;;  %6565 = vmatprep.subr.bf16.mxu0 %v9018_v40  ;;  %v9079_v10 = vld [vmem:[#allocation12 + $0x6d0] ss:$28 sps:$4 sm:$0xff]   ;;  %v9087_v40 = vld [vmem:[#allocation12 + $0x69c] ss:$28 sps:$4 sm:$0xff]  }
 0x4d5   :  { %v9082_v8 = vld [vmem:[#allocation12 + $0x890] ss:$28 sps:$4 sm:$0xff]  }
 0x4d7   :  { %6500 = vmatpush2.bf16.msra.mxu1 %v9013_v11  ;;  %6566 = vmatpush1.bf16.msra.mxu0 %v9016_v12  ;;  %v9090_v11 = vld [vmem:[#allocation12 + $0x85c] ss:$28 sps:$4 sm:$0xff]  }
 0x4d8   :  { %6501 = vmatprep.subr.bf16.mxu1 %v9021_v15  ;;  %6567 = vmatprep.subr.bf16.mxu0 %v9024_v13  ;;  %v9085_v12 = vld [vmem:[#allocation12 + $0x698] ss:$28 sps:$4 sm:$0xff]   ;;  %v9093_v13 = vld [vmem:[#allocation12 + $0x664] ss:$28 sps:$4 sm:$0xff]  }
 0x4d9   :  { %v9088_v15 = vld [vmem:[#allocation12 + $0x858] ss:$28 sps:$4 sm:$0xff]  }
 0x4db   :  { %6502 = vmatpush2.bf16.msra.mxu1 %v9019_v45  ;;  %6568 = vmatpush1.bf16.msra.mxu0 %v9022_v21  ;;  %v9096_v45 = vld [vmem:[#allocation12 + $0x824] ss:$28 sps:$4 sm:$0xff]  }
 0x4dc   :  { %6503 = vmatprep.subr.bf16.mxu1 %v9027_v17  ;;  %6569 = vmatprep.subr.bf16.mxu0 %v9030_v52  ;;  %v9091_v21 = vld [vmem:[#allocation12 + $0x660] ss:$28 sps:$4 sm:$0xff]   ;;  %v9099_v52 = vld [vmem:[#allocation12 + $0x62c] ss:$28 sps:$4 sm:$0xff]  }
 0x4dd   :  { %v9094_v17 = vld [vmem:[#allocation12 + $0x820] ss:$28 sps:$4 sm:$0xff]  }
 0x4df   :  { %6504 = vmatpush2.bf16.msra.mxu1 %v9025_v19  ;;  %6570 = vmatpush1.bf16.msra.mxu0 %v9028_v36  ;;  %v9102_v19 = vld [vmem:[#allocation12 + $0x7ec] ss:$28 sps:$4 sm:$0xff]  }
 0x4e0   :  { %6571 = vmatprep.subr.bf16.mxu0 %v9033_v23  ;;  %6596 = vmatprep.subr.bf16.mxu1 %v9036_v25  ;;  %v9097_v36 = vld [vmem:[#allocation12 + $0x628] ss:$28 sps:$4 sm:$0xff]   ;;  %v9105_v23 = vld [vmem:[#allocation12 + $0x5f4] ss:$28 sps:$4 sm:$0xff]  }
 0x4e1   :  { %v9108_v25 = vld [vmem:[#allocation12 + $0x7b4] ss:$28 sps:$4 sm:$0xff]  }
 0x4e2   :  { %6506 = vmatmul.mubr.bf16.vlgmr.msra.gmra.mxu1 %v9963_v59 }
 0x4e3   :  { %6572 = vmatpush2.bf16.msra.mxu0 %v9031_v30  ;;  %6597 = vmatpush1.bf16.msra.mxu1 %v9034_v31  ;;  %v9103_v30 = vld [vmem:[#allocation12 + $0x5f0] ss:$28 sps:$4 sm:$0xff]  }
 0x4e4   :  { %6628 = vmatprep.mubr.bf16.mxu1 %v9938_v43  ;;  %6573 = vmatprep.subr.bf16.mxu0 %v9039_v35  ;;  %v9106_v31 = vld [vmem:[#allocation12 + $0x7b0] ss:$28 sps:$4 sm:$0xff]   ;;  %v9111_v35 = vld [vmem:[#allocation12 + $0x5bc] ss:$28 sps:$4 sm:$0xff]  }
 0x4e5   :  { %6598 = vmatprep.subr.bf16.mxu1 %v9042_v34  ;;  %v9114_v34 = vld [vmem:[#allocation12 + $0x77c] ss:$28 sps:$4 sm:$0xff]  }
 0x4e7   :  { %6574 = vmatpush2.bf16.msra.mxu0 %v9037_v16  ;;  %6599 = vmatpush1.bf16.msra.mxu1 %v9040_v39  ;;  %v9109_v16 = vld [vmem:[#allocation12 + $0x5b8] ss:$28 sps:$4 sm:$0xff]  }
 0x4e8   :  { %6575 = vmatprep.subr.bf16.mxu0 %v9045_v47  ;;  %6600 = vmatprep.subr.bf16.mxu1 %v9048_v48  ;;  %v9112_v39 = vld [vmem:[#allocation12 + $0x778] ss:$28 sps:$4 sm:$0xff]   ;;  %v9117_v47 = vld [vmem:[#allocation12 + $0x584] ss:$28 sps:$4 sm:$0xff]  }
 0x4e9   :  { %v9120_v48 = vld [vmem:[#allocation12 + $0x744] ss:$28 sps:$4 sm:$0xff]  }
 0x4eb   :  { %6576 = vmatpush2.bf16.msra.mxu0 %v9043_v54  ;;  %6601 = vmatpush1.bf16.msra.mxu1 %v9046_v26  ;;  %v9115_v54 = vld [vmem:[#allocation12 + $0x580] ss:$28 sps:$4 sm:$0xff]  }
 0x4ec   :  { %6577 = vmatprep.subr.bf16.mxu0 %v9051_v1  ;;  %6602 = vmatprep.subr.bf16.mxu1 %v9054_v42  ;;  %v9118_v26 = vld [vmem:[#allocation12 + $0x740] ss:$28 sps:$4 sm:$0xff]   ;;  %v9123_v1 = vld [vmem:[#allocation12 + $0x54c] ss:$28 sps:$4 sm:$0xff]  }
 0x4ed   :  { %v9126_v42 = vld [vmem:[#allocation12 + $0x70c] ss:$28 sps:$4 sm:$0xff]  }
 0x4ef   :  { %6578 = vmatpush2.bf16.msra.mxu0 %v9049_v5  ;;  %6603 = vmatpush1.bf16.msra.mxu1 %v9052_v41  ;;  %v9121_v5 = vld [vmem:[#allocation12 + $0x548] ss:$28 sps:$4 sm:$0xff]  }
 0x4f0   :  { %6579 = vmatprep.subr.bf16.mxu0 %v9057_v44  ;;  %6604 = vmatprep.subr.bf16.mxu1 %v9060_v60  ;;  %v9124_v41 = vld [vmem:[#allocation12 + $0x708] ss:$28 sps:$4 sm:$0xff]   ;;  %v9129_v44 = vld [vmem:[#allocation12 + $0xa54] ss:$28 sps:$4 sm:$0xff]  }
 0x4f1   :  { %v9132_v60 = vld [vmem:[#allocation12 + $0xc14] ss:$28 sps:$4 sm:$0xff]  }
 0x4f3   :  { %6580 = vmatpush2.bf16.msra.mxu0 %v9055_v46  ;;  %6605 = vmatpush1.bf16.msra.mxu1 %v9058_v49  ;;  %v9127_v46 = vld [vmem:[#allocation12 + $0xa50] ss:$28 sps:$4 sm:$0xff]  }
 0x4f4   :  { %6581 = vmatprep.subr.bf16.mxu0 %v9063_v9  ;;  %6606 = vmatprep.subr.bf16.mxu1 %v9066_v29  ;;  %v9130_v49 = vld [vmem:[#allocation12 + $0xc10] ss:$28 sps:$4 sm:$0xff]   ;;  %v9135_v9 = vld [vmem:[#allocation12 + $0xa1c] ss:$28 sps:$4 sm:$0xff]  }
 0x4f5   :  { %v9138_v29 = vld [vmem:[#allocation12 + $0xbdc] ss:$28 sps:$4 sm:$0xff]  }
 0x4f7   :  { %6582 = vmatpush2.bf16.msra.mxu0 %v9061_v18  ;;  %6607 = vmatpush1.bf16.msra.mxu1 %v9064_v50  ;;  %v9133_v18 = vld [vmem:[#allocation12 + $0xa18] ss:$28 sps:$4 sm:$0xff]  }
 0x4f8   :  { %6583 = vmatprep.subr.bf16.mxu0 %v9069_v32  ;;  %6608 = vmatprep.subr.bf16.mxu1 %v9072_v53  ;;  %v9136_v50 = vld [vmem:[#allocation12 + $0xbd8] ss:$28 sps:$4 sm:$0xff]   ;;  %v9141_v32 = vld [vmem:[#allocation12 + $0x9e4] ss:$28 sps:$4 sm:$0xff]  }
 0x4f9   :  { %v9144_v53 = vld [vmem:[#allocation12 + $0xba4] ss:$28 sps:$4 sm:$0xff]  }
 0x4fb   :  { %6584 = vmatpush2.bf16.msra.mxu0 %v9067_v58  ;;  %6609 = vmatpush1.bf16.msra.mxu1 %v9070_v61  ;;  %v9139_v58 = vld [vmem:[#allocation12 + $0x9e0] ss:$28 sps:$4 sm:$0xff]  }
 0x4fc   :  { %6585 = vmatprep.subr.bf16.mxu0 %v9075_v63  ;;  %6610 = vmatprep.subr.bf16.mxu1 %v9078_v4  ;;  %v9142_v61 = vld [vmem:[#allocation12 + $0xba0] ss:$28 sps:$4 sm:$0xff]   ;;  %v9147_v63 = vld [vmem:[#allocation12 + $0x9ac] ss:$28 sps:$4 sm:$0xff]  }
 0x4fd   :  { %v9150_v4 = vld [vmem:[#allocation12 + $0xb6c] ss:$28 sps:$4 sm:$0xff]  }
 0x4ff   :  { %6586 = vmatpush2.bf16.msra.mxu0 %v9073_v2  ;;  %6611 = vmatpush1.bf16.msra.mxu1 %v9076_v3  ;;  %v9145_v2 = vld [vmem:[#allocation12 + $0x9a8] ss:$28 sps:$4 sm:$0xff]  }
 0x500   :  { %6612 = vmatprep.subr.bf16.mxu1 %v9081_v6  ;;  %6637 = vmatprep.subr.bf16.mxu0 %v9084_v7  ;;  %v9148_v3 = vld [vmem:[#allocation12 + $0xb68] ss:$28 sps:$4 sm:$0xff]   ;;  %v9153_v6 = vld [vmem:[#allocation12 + $0x974] ss:$28 sps:$4 sm:$0xff]  }
 0x501   :  { %v9156_v7 = vld [vmem:[#allocation12 + $0xb34] ss:$28 sps:$4 sm:$0xff]  }
 0x502   :  { %6588 = vmatmul.mubr.bf16.vlgmr.msra.gmra.mxu0 %v9940_v55 }
 0x503   :  { %6613 = vmatpush2.bf16.msra.mxu1 %v9079_v10  ;;  %6638 = vmatpush1.bf16.msra.mxu0 %v9082_v8  ;;  %v9151_v10 = vld [vmem:[#allocation12 + $0x970] ss:$28 sps:$4 sm:$0xff]  }
 0x504   :  { %6669 = vmatprep.mubr.bf16.mxu0 %v9948_v62  ;;  %6614 = vmatprep.subr.bf16.mxu1 %v9087_v40  ;;  %v9154_v8 = vld [vmem:[#allocation12 + $0xb30] ss:$28 sps:$4 sm:$0xff]   ;;  %v9159_v40 = vld [vmem:[#allocation12 + $0x93c] ss:$28 sps:$4 sm:$0xff]  }
 0x505   :  { %6639 = vmatprep.subr.bf16.mxu0 %v9090_v11  ;;  %v9162_v11 = vld [vmem:[#allocation12 + $0xafc] ss:$28 sps:$4 sm:$0xff]  }
 0x507   :  { %6615 = vmatpush2.bf16.msra.mxu1 %v9085_v12  ;;  %6640 = vmatpush1.bf16.msra.mxu0 %v9088_v15  ;;  %v9157_v12 = vld [vmem:[#allocation12 + $0x938] ss:$28 sps:$4 sm:$0xff]  }
 0x508   :  { %6616 = vmatprep.subr.bf16.mxu1 %v9093_v13  ;;  %6641 = vmatprep.subr.bf16.mxu0 %v9096_v45  ;;  %v9160_v15 = vld [vmem:[#allocation12 + $0xaf8] ss:$28 sps:$4 sm:$0xff]   ;;  %v9165_v13 = vld [vmem:[#allocation12 + $0x904] ss:$28 sps:$4 sm:$0xff]  }
 0x509   :  { %v9168_v45 = vld [vmem:[#allocation12 + $0xac4] ss:$28 sps:$4 sm:$0xff]  }
 0x50b   :  { %6617 = vmatpush2.bf16.msra.mxu1 %v9091_v21  ;;  %6642 = vmatpush1.bf16.msra.mxu0 %v9094_v17  ;;  %v9163_v21 = vld [vmem:[#allocation12 + $0x900] ss:$28 sps:$4 sm:$0xff]  }
 0x50c   :  { %6618 = vmatprep.subr.bf16.mxu1 %v9099_v52  ;;  %6643 = vmatprep.subr.bf16.mxu0 %v9102_v19  ;;  %v9166_v17 = vld [vmem:[#allocation12 + $0xac0] ss:$28 sps:$4 sm:$0xff]   ;;  %v9171_v52 = vld [vmem:[#allocation12 + $0x8cc] ss:$28 sps:$4 sm:$0xff]  }
 0x50d   :  { %v9174_v19 = vld [vmem:[#allocation12 + $0xa8c] ss:$28 sps:$4 sm:$0xff]  }
 0x50f   :  { %6619 = vmatpush2.bf16.msra.mxu1 %v9097_v36  ;;  %6644 = vmatpush1.bf16.msra.mxu0 %v9100_v20  ;;  %v9169_v36 = vld [vmem:[#allocation12 + $0x8c8] ss:$28 sps:$4 sm:$0xff]  }
 0x510   :  { %6620 = vmatprep.subr.bf16.mxu1 %v9105_v23  ;;  %6645 = vmatprep.subr.bf16.mxu0 %v9108_v25  ;;  %v9172_v20 = vld [vmem:[#allocation12 + $0xa88] ss:$28 sps:$4 sm:$0xff]   ;;  %v9177_v23 = vld [vmem:[#allocation12 + $0x19c] ss:$28 sps:$4 sm:$0xff]  }
 0x511   :  { %v9180_v25 = vld [vmem:[#allocation12 + $0x51c] ss:$28 sps:$4 sm:$0xff]  }
 0x513   :  { %6621 = vmatpush2.bf16.msra.mxu1 %v9103_v30  ;;  %6646 = vmatpush1.bf16.msra.mxu0 %v9106_v31  ;;  %v9175_v30 = vld [vmem:[#allocation12 + $0x198] ss:$28 sps:$4 sm:$0xff]  }
 0x514   :  { %6622 = vmatprep.subr.bf16.mxu1 %v9111_v35  ;;  %6647 = vmatprep.subr.bf16.mxu0 %v9114_v34  ;;  %v9178_v31 = vld [vmem:[#allocation12 + $0x518] ss:$28 sps:$4 sm:$0xff]   ;;  %v9183_v35 = vld [vmem:[#allocation12 + $0x164] ss:$28 sps:$4 sm:$0xff]  }
 0x515   :  { %v9186_v34 = vld [vmem:[#allocation12 + $0x4e4] ss:$28 sps:$4 sm:$0xff]  }
 0x517   :  { %6623 = vmatpush2.bf16.msra.mxu1 %v9109_v16  ;;  %6648 = vmatpush1.bf16.msra.mxu0 %v9112_v39  ;;  %v9181_v16 = vld [vmem:[#allocation12 + $0x160] ss:$28 sps:$4 sm:$0xff]  }
 0x518   :  { %6624 = vmatprep.subr.bf16.mxu1 %v9117_v47  ;;  %6649 = vmatprep.subr.bf16.mxu0 %v9120_v48  ;;  %v9184_v39 = vld [vmem:[#allocation12 + $0x4e0] ss:$28 sps:$4 sm:$0xff]   ;;  %v9189_v47 = vld [vmem:[#allocation12 + $0x12c] ss:$28 sps:$4 sm:$0xff]  }
 0x519   :  { %v9192_v48 = vld [vmem:[#allocation12 + $0x4ac] ss:$28 sps:$4 sm:$0xff]  }
 0x51b   :  { %6625 = vmatpush2.bf16.msra.mxu1 %v9115_v54  ;;  %6650 = vmatpush1.bf16.msra.mxu0 %v9118_v26  ;;  %v9187_v54 = vld [vmem:[#allocation12 + $0x128] ss:$28 sps:$4 sm:$0xff]  }
 0x51c   :  { %6626 = vmatprep.subr.bf16.mxu1 %v9123_v1  ;;  %6651 = vmatprep.subr.bf16.mxu0 %v9126_v42  ;;  %v9190_v26 = vld [vmem:[#allocation12 + $0x4a8] ss:$28 sps:$4 sm:$0xff]   ;;  %v9195_v1 = vld [vmem:[#allocation12 + $0xf4] ss:$28 sps:$4 sm:$0xff]  }
 0x51d   :  { %v9198_v42 = vld [vmem:[#allocation12 + $0x474] ss:$28 sps:$4 sm:$0xff]  }
 0x51f   :  { %6627 = vmatpush2.bf16.msra.mxu1 %v9121_v5  ;;  %6652 = vmatpush1.bf16.msra.mxu0 %v9124_v41  ;;  %v9193_v5 = vld [vmem:[#allocation12 + $0xf0] ss:$28 sps:$4 sm:$0xff]  }
 0x520   :  { %6653 = vmatprep.subr.bf16.mxu0 %v9129_v44  ;;  %6678 = vmatprep.subr.bf16.mxu1 %v9132_v60  ;;  %v9196_v41 = vld [vmem:[#allocation12 + $0x470] ss:$28 sps:$4 sm:$0xff]   ;;  %v9201_v44 = vld [vmem:[#allocation12 + $0xbc] ss:$28 sps:$4 sm:$0xff]  }
 0x521   :  { %v9204_v60 = vld [vmem:[#allocation12 + $0x43c] ss:$28 sps:$4 sm:$0xff]  }
 0x522   :  { %6629 = vmatmul.mubr.bf16.vlgmr.msra.gmra.mxu1 %v9942_v56 }
 0x523   :  { %6654 = vmatpush2.bf16.msra.mxu0 %v9127_v46  ;;  %6679 = vmatpush1.bf16.msra.mxu1 %v9130_v49  ;;  %v9199_v46 = vld [vmem:[#allocation12 + $0xb8] ss:$28 sps:$4 sm:$0xff]  }
 0x524   :  { %6655 = vmatprep.subr.bf16.mxu0 %v9135_v9  ;;  %6680 = vmatprep.subr.bf16.mxu1 %v9138_v29  ;;  %v9202_v49 = vld [vmem:[#allocation12 + $0x438] ss:$28 sps:$4 sm:$0xff]   ;;  %v9207_v9 = vld [vmem:[#allocation12 + $0x84] ss:$28 sps:$4 sm:$0xff]  }
 0x525   :  { %6710 = vmatprep.mubr.bf16.mxu1 %v9614_v0  ;;  %v9210_v29 = vld [vmem:[#allocation12 + $0x404] ss:$28 sps:$4 sm:$0xff]  }
 0x527   :  { %6656 = vmatpush2.bf16.msra.mxu0 %v9133_v18  ;;  %6681 = vmatpush1.bf16.msra.mxu1 %v9136_v50  ;;  %v9205_v18 = vld [vmem:[#allocation12 + $0x80] ss:$28 sps:$4 sm:$0xff]  }
 0x528   :  { %6657 = vmatprep.subr.bf16.mxu0 %v9141_v32  ;;  %6682 = vmatprep.subr.bf16.mxu1 %v9144_v53  ;;  %v9208_v50 = vld [vmem:[#allocation12 + $0x400] ss:$28 sps:$4 sm:$0xff]   ;;  %v9213_v32 = vld [vmem:[#allocation12 + $0x4c] ss:$28 sps:$4 sm:$0xff]  }
 0x529   :  { %v9216_v53 = vld [vmem:[#allocation12 + $0x3cc] ss:$28 sps:$4 sm:$0xff]  }
 0x52b   :  { %6658 = vmatpush2.bf16.msra.mxu0 %v9139_v58  ;;  %6683 = vmatpush1.bf16.msra.mxu1 %v9142_v61  ;;  %v9211_v58 = vld [vmem:[#allocation12 + $0x48] ss:$28 sps:$4 sm:$0xff]  }
 0x52c   :  { %6659 = vmatprep.subr.bf16.mxu0 %v9147_v63  ;;  %6684 = vmatprep.subr.bf16.mxu1 %v9150_v4  ;;  %v9214_v61 = vld [vmem:[#allocation12 + $0x3c8] ss:$28 sps:$4 sm:$0xff]   ;;  %v9219_v63 = vld [vmem:[#allocation12 + $0x14] ss:$28 sps:$4 sm:$0xff]  }
 0x52d   :  { %v9222_v4 = vld [vmem:[#allocation12 + $0x394] ss:$28 sps:$4 sm:$0xff]  }
 0x52f   :  { %6660 = vmatpush2.bf16.msra.mxu0 %v9145_v2  ;;  %6685 = vmatpush1.bf16.msra.mxu1 %v9148_v3  ;;  %v9217_v2 = vld [vmem:[#allocation12 + $0x10] ss:$28 sps:$4 sm:$0xff]  }
 0x530   :  { %6661 = vmatprep.subr.bf16.mxu0 %v9153_v6  ;;  %6686 = vmatprep.subr.bf16.mxu1 %v9156_v7  ;;  %v9220_v3 = vld [vmem:[#allocation12 + $0x390] ss:$28 sps:$4 sm:$0xff]   ;;  %v9225_v6 = vld [vmem:[#allocation12 + $0x35c] ss:$28 sps:$4 sm:$0xff]  }
 0x531   :  { %v9228_v7 = vld [vmem:[#allocation12 + $0x6dc] ss:$28 sps:$4 sm:$0xff]  }
 0x533   :  { %6662 = vmatpush2.bf16.msra.mxu0 %v9151_v10  ;;  %6687 = vmatpush1.bf16.msra.mxu1 %v9154_v8  ;;  %v9223_v10 = vld [vmem:[#allocation12 + $0x358] ss:$28 sps:$4 sm:$0xff]  }
 0x534   :  { %6663 = vmatprep.subr.bf16.mxu0 %v9159_v40  ;;  %6688 = vmatprep.subr.bf16.mxu1 %v9162_v11  ;;  %v9226_v8 = vld [vmem:[#allocation12 + $0x6d8] ss:$28 sps:$4 sm:$0xff]   ;;  %v9231_v40 = vld [vmem:[#allocation12 + $0x324] ss:$28 sps:$4 sm:$0xff]  }
 0x535   :  { %v9234_v11 = vld [vmem:[#allocation12 + $0x6a4] ss:$28 sps:$4 sm:$0xff]  }
 0x537   :  { %6664 = vmatpush2.bf16.msra.mxu0 %v9157_v12  ;;  %6689 = vmatpush1.bf16.msra.mxu1 %v9160_v15 }
 0x538   :  { %6665 = vmatprep.subr.bf16.mxu0 %v9165_v13  ;;  %6690 = vmatprep.subr.bf16.mxu1 %v9168_v45  ;;  %v9229_v13 = vld [vmem:[#allocation12 + $0x320] ss:$28 sps:$4 sm:$0xff]  }
 0x53b   :  { %6666 = vmatpush2.bf16.msra.mxu0 %v9163_v21  ;;  %6691 = vmatpush1.bf16.msra.mxu1 %v9166_v17  ;;  %v9232_v17 = vld [vmem:[#allocation12 + $0x6a0] ss:$28 sps:$4 sm:$0xff]  }
 0x53c   :  { %6667 = vmatprep.subr.bf16.mxu0 %v9171_v52  ;;  %6692 = vmatprep.subr.bf16.mxu1 %v9174_v19  ;;  %v9237_v52 = vld [vmem:[#allocation12 + $0x2ec] ss:$28 sps:$4 sm:$0xff]  }
 0x53d   :  { %v9240_v19 = vld [vmem:[#allocation12 + $0x66c] ss:$28 sps:$4 sm:$0xff]  }
 0x53f   :  { %6668 = vmatpush2.bf16.msra.mxu0 %v9169_v36  ;;  %6693 = vmatpush1.bf16.msra.mxu1 %v9172_v20 }
 0x540   :  { %6719 = vmatprep.subr.bf16.mxu1 %v9177_v23  ;;  %6760 = vmatprep.subr.bf16.mxu0 %v9180_v25  ;;  %v9235_v23 = vld [vmem:[#allocation12 + $0x2e8] ss:$28 sps:$4 sm:$0xff]  }
 0x542   :  { %6670 = vmatmul.mubr.bf16.vlgmr.msra.gmra.mxu0 %v9963_v59  ;;  %6711 = vmatmul.mubr.bf16.vlgmr.msra.gmra.mxu1 %v9958_v33 }
 0x543   :  { %6720 = vmatpush1.bf16.msra.mxu1 %v9175_v30  ;;  %6751 = vmatprep.mubr.bf16.mxu1 %v9936_v51 }
 0x544   :  { %6761 = vmatpush1.bf16.msra.mxu0 %v9178_v31  ;;  %6792 = vmatprep.mubr.bf16.mxu0 %v9938_v43  ;;  %v9238_v31 = vld [vmem:[#allocation12 + $0x668] ss:$28 sps:$4 sm:$0xff]  }
 0x545   :  { %6721 = vmatprep.subr.bf16.mxu1 %v9183_v35  ;;  %6762 = vmatprep.subr.bf16.mxu0 %v9186_v34  ;;  %v9243_v35 = vld [vmem:[#allocation12 + $0x2b4] ss:$28 sps:$4 sm:$0xff]  }
 0x546   :  { %v9246_v34 = vld [vmem:[#allocation12 + $0x634] ss:$28 sps:$4 sm:$0xff]  }
 0x547   :  { %6722 = vmatpush1.bf16.msra.mxu1 %v9181_v16  ;;  %v9241_v16 = vld [vmem:[#allocation12 + $0x2b0] ss:$28 sps:$4 sm:$0xff]  }
 0x548   :  { %6763 = vmatpush1.bf16.msra.mxu0 %v9184_v39  ;;  %6723 = vmatprep.subr.bf16.mxu1 %v9189_v47  ;;  %v9244_v39 = vld [vmem:[#allocation12 + $0x630] ss:$28 sps:$4 sm:$0xff]   ;;  %v9249_v47 = vld [vmem:[#allocation12 + $0x27c] ss:$28 sps:$4 sm:$0xff]  }
 0x549   :  { %6764 = vmatprep.subr.bf16.mxu0 %v9192_v48  ;;  %v9252_v48 = vld [vmem:[#allocation12 + $0x5fc] ss:$28 sps:$4 sm:$0xff]  }
 0x54b   :  { %6724 = vmatpush1.bf16.msra.mxu1 %v9187_v54  ;;  %v9247_v54 = vld [vmem:[#allocation12 + $0x278] ss:$28 sps:$4 sm:$0xff]  }
 0x54c   :  { %6765 = vmatpush1.bf16.msra.mxu0 %v9190_v26  ;;  %6725 = vmatprep.subr.bf16.mxu1 %v9195_v1  ;;  %v9250_v26 = vld [vmem:[#allocation12 + $0x5f8] ss:$28 sps:$4 sm:$0xff]   ;;  %v9255_v1 = vld [vmem:[#allocation12 + $0x244] ss:$28 sps:$4 sm:$0xff]  }
 0x54d   :  { %6766 = vmatprep.subr.bf16.mxu0 %v9198_v42  ;;  %v9258_v42 = vld [vmem:[#allocation12 + $0x5c4] ss:$28 sps:$4 sm:$0xff]  }
 0x54f   :  { %6726 = vmatpush1.bf16.msra.mxu1 %v9193_v5  ;;  %v9253_v5 = vld [vmem:[#allocation12 + $0x240] ss:$28 sps:$4 sm:$0xff]  }
 0x550   :  { %6767 = vmatpush1.bf16.msra.mxu0 %v9196_v41  ;;  %6727 = vmatprep.subr.bf16.mxu1 %v9201_v44  ;;  %v9256_v41 = vld [vmem:[#allocation12 + $0x5c0] ss:$28 sps:$4 sm:$0xff]   ;;  %v9261_v44 = vld [vmem:[#allocation12 + $0x20c] ss:$28 sps:$4 sm:$0xff]  }
 0x551   :  { %6768 = vmatprep.subr.bf16.mxu0 %v9204_v60  ;;  %v9264_v60 = vld [vmem:[#allocation12 + $0x58c] ss:$28 sps:$4 sm:$0xff]  }
 0x553   :  { %6728 = vmatpush1.bf16.msra.mxu1 %v9199_v46  ;;  %v9259_v46 = vld [vmem:[#allocation12 + $0x208] ss:$28 sps:$4 sm:$0xff]  }
 0x554   :  { %6769 = vmatpush1.bf16.msra.mxu0 %v9202_v49  ;;  %6729 = vmatprep.subr.bf16.mxu1 %v9207_v9  ;;  %v9262_v49 = vld [vmem:[#allocation12 + $0x588] ss:$28 sps:$4 sm:$0xff]   ;;  %v9267_v9 = vld [vmem:[#allocation12 + $0x1d4] ss:$28 sps:$4 sm:$0xff]  }
 0x555   :  { %6770 = vmatprep.subr.bf16.mxu0 %v9210_v29  ;;  %v9270_v29 = vld [vmem:[#allocation12 + $0x554] ss:$28 sps:$4 sm:$0xff]  }
 0x557   :  { %6730 = vmatpush1.bf16.msra.mxu1 %v9205_v18  ;;  %v9265_v18 = vld [vmem:[#allocation12 + $0x1d0] ss:$28 sps:$4 sm:$0xff]  }
 0x558   :  { %6771 = vmatpush1.bf16.msra.mxu0 %v9208_v50  ;;  %6731 = vmatprep.subr.bf16.mxu1 %v9213_v32  ;;  %v9268_v50 = vld [vmem:[#allocation12 + $0x550] ss:$28 sps:$4 sm:$0xff]   ;;  %v9273_v32 = vld [vmem:[#allocation12 + $0x89c] ss:$28 sps:$4 sm:$0xff]  }
 0x559   :  { %6772 = vmatprep.subr.bf16.mxu0 %v9216_v53  ;;  %v9276_v53 = vld [vmem:[#allocation12 + $0xc1c] ss:$28 sps:$4 sm:$0xff]  }
 0x55b   :  { %6732 = vmatpush1.bf16.msra.mxu1 %v9211_v58  ;;  %v9271_v58 = vld [vmem:[#allocation12 + $0x898] ss:$28 sps:$4 sm:$0xff]  }
 0x55c   :  { %6773 = vmatpush1.bf16.msra.mxu0 %v9214_v61  ;;  %6733 = vmatprep.subr.bf16.mxu1 %v9219_v63  ;;  %v9274_v61 = vld [vmem:[#allocation12 + $0xc18] ss:$28 sps:$4 sm:$0xff]   ;;  %v9279_v63 = vld [vmem:[#allocation12 + $0x864] ss:$28 sps:$4 sm:$0xff]  }
 0x55d   :  { %6774 = vmatprep.subr.bf16.mxu0 %v9222_v4  ;;  %v9282_v4 = vld [vmem:[#allocation12 + $0xbe4] ss:$28 sps:$4 sm:$0xff]  }
 0x55f   :  { %6734 = vmatpush1.bf16.msra.mxu1 %v9217_v2 }
 0x560   :  { %6775 = vmatpush1.bf16.msra.mxu0 %v9220_v3  ;;  %6735 = vmatprep.subr.bf16.mxu1 %v9225_v6  ;;  %v9277_v3 = vld [vmem:[#allocation12 + $0x860] ss:$28 sps:$4 sm:$0xff]  }
 0x561   :  { %6776 = vmatprep.subr.bf16.mxu0 %v9228_v7  ;;  %v9280_v7 = vld [vmem:[#allocation12 + $0xbe0] ss:$28 sps:$4 sm:$0xff]  }
 0x562   :  { %v9975_v12 = vpop.f32.mrf.mxu1  ;;  %v9977_v15 = vpop.f32.mrf.mxu0 }
 0x563   :  { %6736 = vmatpush2.bf16.msra.mxu1 %v9223_v10  ;;  %v9285_v10 = vld [vmem:[#allocation12 + $0x82c] ss:$28 sps:$4 sm:$0xff]  }
 0x564   :  { %6777 = vmatpush2.bf16.msra.mxu0 %v9226_v8  ;;  %v9979_v45 = vpop.f32.mrf.mxu1  ;;  %v9981_v21 = vpop.f32.mrf.mxu0  ;;  %6737 = vmatprep.subr.bf16.mxu1 %v9231_v40  ;;  %v9288_v8 = vld [vmem:[#allocation12 + $0xbac] ss:$28 sps:$4 sm:$0xff]  }
 0x565   :  { %6778 = vmatprep.subr.bf16.mxu0 %v9234_v11  ;;  %v9283_v11 = vld [vmem:[#allocation12 + $0x828] ss:$28 sps:$4 sm:$0xff]  }
 0x566   :  { %v6429_v36 = vpop.f32.mrf.mxu1  ;;  %v6470_v20 = vpop.f32.mrf.mxu0 }
 0x567   :  { %6738 = vmatpush2.bf16.msra.mxu1 %v9229_v13  ;;  %v9289_v36 = vld [vmem:[#allocation12 + $0x7f0] ss:$28 sps:$4 sm:$0xff]  }
 0x568   :  { %6779 = vmatpush2.bf16.msra.mxu0 %v9232_v17  ;;  %v6430_v25 = vpop.f32.mrf.mxu1  ;;  %v6471_v30 = vpop.f32.mrf.mxu0  ;;  %6739 = vmatprep.subr.bf16.mxu1 %v9237_v52  ;;  %v9286_v17 = vld [vmem:[#allocation12 + $0xba8] ss:$28 sps:$4 sm:$0xff]   ;;  %v9291_v52 = vld [vmem:[#allocation12 + $0x7f4] ss:$28 sps:$4 sm:$0xff]  }
 0x569   :  { %6780 = vmatprep.subr.bf16.mxu0 %v9240_v19  ;;  %v9294_v19 = vld [vmem:[#allocation12 + $0xb74] ss:$28 sps:$4 sm:$0xff]   ;;  %v9300_v25 = vld [vmem:[#allocation12 + $0xb3c] ss:$28 sps:$4 sm:$0xff]  }
 0x56a   :  { %v9292_v20 = vld [vmem:[#allocation12 + $0xb70] ss:$28 sps:$4 sm:$0xff]   ;;  %v9295_v30 = vld [vmem:[#allocation12 + $0x7b8] ss:$28 sps:$4 sm:$0xff]  }
 0x56b   :  { %6740 = vmatpush2.bf16.msra.mxu1 %v9235_v23  ;;  %v9297_v23 = vld [vmem:[#allocation12 + $0x7bc] ss:$28 sps:$4 sm:$0xff]  }
 0x56c   :  { %6781 = vmatpush2.bf16.msra.mxu0 %v9238_v31  ;;  %6741 = vmatprep.subr.bf16.mxu1 %v9243_v35  ;;  %v9303_v31 = vld [vmem:[#allocation12 + $0x784] ss:$28 sps:$4 sm:$0xff]  }
 0x56d   :  { %6782 = vmatprep.subr.bf16.mxu0 %v9246_v34  ;;  %v9306_v35 = vld [vmem:[#allocation12 + $0xb04] ss:$28 sps:$4 sm:$0xff]  }
 0x56e   :  { %v9301_v34 = vld [vmem:[#allocation12 + $0x780] ss:$28 sps:$4 sm:$0xff]  }
 0x56f   :  { %6742 = vmatpush2.bf16.msra.mxu1 %v9241_v16  ;;  %v9304_v16 = vld [vmem:[#allocation12 + $0xb00] ss:$28 sps:$4 sm:$0xff]  }
 0x570   :  { %6783 = vmatpush2.bf16.msra.mxu0 %v9244_v39  ;;  %6743 = vmatprep.subr.bf16.mxu1 %v9249_v47  ;;  %v9309_v39 = vld [vmem:[#allocation12 + $0x74c] ss:$28 sps:$4 sm:$0xff]  }
 0x571   :  { %6784 = vmatprep.subr.bf16.mxu0 %v9252_v48  ;;  %v9312_v47 = vld [vmem:[#allocation12 + $0xacc] ss:$28 sps:$4 sm:$0xff]   ;;  %v9991_v48 = vld [vmem:[#allocation13] sm:$0xff] }
 0x573   :  { %6744 = vmatpush2.bf16.msra.mxu1 %v9247_v54  ;;  %v9307_v54 = vld [vmem:[#allocation12 + $0x748] ss:$28 sps:$4 sm:$0xff]  }
 0x574   :  { %6785 = vmatpush2.bf16.msra.mxu0 %v9250_v26  ;;  %6745 = vmatprep.subr.bf16.mxu1 %v9255_v1  ;;  %v9310_v26 = vld [vmem:[#allocation12 + $0xac8] ss:$28 sps:$4 sm:$0xff]   ;;  %v9315_v1 = vld [vmem:[#allocation12 + $0x714] ss:$28 sps:$4 sm:$0xff]  }
 0x575   :  { %6786 = vmatprep.subr.bf16.mxu0 %v9258_v42  ;;  %v4343_v42 = vrot.slane %v9991_v48, %v9764_v22  ;;  %v9323_v22 = vld [vmem:[#allocation12 + $0x1a0] ss:$28 sps:$4 sm:$0xff]  }
 0x577   :  { %6746 = vmatpush2.bf16.msra.mxu1 %v9253_v5  ;;  %v9318_v5 = vld [vmem:[#allocation12 + $0xa94] ss:$28 sps:$4 sm:$0xff]  }
 0x578   :  { %6787 = vmatpush2.bf16.msra.mxu0 %v9256_v41  ;;  %6747 = vmatprep.subr.bf16.mxu1 %v9261_v44  ;;  %v4347_v41 = vrot.slane %v9991_v48, %v9767_v37  ;;  %v9313_v44 = vld [vmem:[#allocation12 + $0x710] ss:$28 sps:$4 sm:$0xff]   ;;  %v9326_v37 = vld [vmem:[#allocation12 + $0xa24] ss:$28 sps:$4 sm:$0xff]  }
 0x579   :  { %6788 = vmatprep.subr.bf16.mxu0 %v9264_v60  ;;  %v9316_v60 = vld [vmem:[#allocation12 + $0xa90] ss:$28 sps:$4 sm:$0xff]  }
 0x57b   :  { %6748 = vmatpush2.bf16.msra.mxu1 %v9259_v46  ;;  %v9321_v46 = vld [vmem:[#allocation12 + $0xa5c] ss:$28 sps:$4 sm:$0xff]  }
 0x57c   :  { %6789 = vmatpush2.bf16.msra.mxu0 %v9262_v49  ;;  %6749 = vmatprep.subr.bf16.mxu1 %v9267_v9  ;;  %v6426_v49 = vadd.f32 %v9975_v12, %v4343_v42  ;;  %v9322_v9 = vld [vmem:[#allocation12 + $0x360] ss:$28 sps:$4 sm:$0xff]  }
 0x57d   :  { %6790 = vmatprep.subr.bf16.mxu0 %v9270_v29  ;;  %v6428_v29 = vadd.f32 %v9979_v45, %v4347_v41  ;;  %v9324_v12 = vld [vmem:[#allocation12 + $0xa20] ss:$28 sps:$4 sm:$0xff]   ;;  %v9354_v41 = vld [vmem:[#allocation12 + $0x8d0] ss:$28 sps:$4 sm:$0xff]  }
 0x57f   :  { %6750 = vmatpush2.bf16.msra.mxu1 %v9265_v18  ;;  %v9319_v18 = vld [vmem:[#allocation12 + $0xa58] ss:$28 sps:$4 sm:$0xff]  }
 0x580   :  { %6791 = vmatpush2.bf16.msra.mxu0 %v9268_v50  ;;  %6801 = vmatprep.subr.bf16.mxu1 %v9273_v32  ;;  %v6467_v50 = vadd.f32 %v9977_v15, %v6426_v49  ;;  %v9327_v32 = vld [vmem:[#allocation12 + $0x328] ss:$28 sps:$4 sm:$0xff]   ;;  %v9361_v49 = vld [vmem:[#allocation12 + $0x520] ss:$28 sps:$4 sm:$0xff]  }
 0x581   :  { %6842 = vmatprep.subr.bf16.mxu0 %v9276_v53 }
 0x582   :  { %v9983_v2 = vpop.f32.mrf.mxu0  ;;  %6752 = vmatmul.mubr.bf16.vlgmr.msra.gmra.mxu1 %v9940_v55 }
 0x583   :  { %6793 = vmatmul.mubr.bf16.vlgmr.msra.gmra.mxu0 %v9942_v56  ;;  %6802 = vmatpush1.bf16.msra.mxu1 %v9271_v58  ;;  %v6469_v58 = vadd.f32 %v9981_v21, %v6428_v29  ;;  %v9363_v29 = vld [vmem:[#allocation12 + $0x6a8] ss:$28 sps:$4 sm:$0xff]  }
 0x584   :  { %6833 = vmatprep.mubr.bf16.mxu1 %v9948_v62  ;;  %6843 = vmatpush1.bf16.msra.mxu0 %v9274_v61  ;;  %v9988_v6 = vpop.f32.mrf.mxu0 }
 0x585   :  { %6803 = vmatprep.subr.bf16.mxu1 %v9279_v63  ;;  %6844 = vmatprep.subr.bf16.mxu0 %v9282_v4  ;;  %v9328_v63 = vld [vmem:[#allocation12 + $0x168] ss:$28 sps:$4 sm:$0xff]  }
 0x586   :  { %v6552_v40 = vpop.f32.mrf.mxu0  ;;  %6874 = vmatprep.mubr.bf16.mxu0 %v9614_v0  ;;  %v9298_v0 = vld [vmem:[#allocation12 + $0xb38] ss:$28 sps:$4 sm:$0xff]   ;;  %v9331_v4 = vld [vmem:[#allocation12 + $0x9ec] ss:$28 sps:$4 sm:$0xff]  }
 0x587   :  { %6804 = vmatpush1.bf16.msra.mxu1 %v9277_v3  ;;  %v9329_v40 = vld [vmem:[#allocation12 + $0x9e8] ss:$28 sps:$4 sm:$0xff]  }
 0x588   :  { %6845 = vmatpush1.bf16.msra.mxu0 %v9280_v7  ;;  %v6553_v13 = vpop.f32.mrf.mxu0  ;;  %6805 = vmatprep.subr.bf16.mxu1 %v9285_v10  ;;  %v9332_v7 = vld [vmem:[#allocation12 + $0x2f0] ss:$28 sps:$4 sm:$0xff]  }
 0x589   :  { %6846 = vmatprep.subr.bf16.mxu0 %v9288_v8  ;;  %v9333_v13 = vld [vmem:[#allocation12 + $0x130] ss:$28 sps:$4 sm:$0xff]  }
 0x58b   :  { %6806 = vmatpush1.bf16.msra.mxu1 %v9283_v11 }
 0x58c   :  { %6847 = vmatpush1.bf16.msra.mxu0 %v9286_v17  ;;  %6807 = vmatprep.subr.bf16.mxu1 %v9291_v52  ;;  %v9337_v52 = vld [vmem:[#allocation12 + $0x2b8] ss:$28 sps:$4 sm:$0xff]  }
 0x58d   :  { %6848 = vmatprep.subr.bf16.mxu0 %v9294_v19  ;;  %v9338_v19 = vld [vmem:[#allocation12 + $0xf8] ss:$28 sps:$4 sm:$0xff]  }
 0x58f   :  { %6808 = vmatpush1.bf16.msra.mxu1 %v9289_v36  ;;  %v9341_v36 = vld [vmem:[#allocation12 + $0x97c] ss:$28 sps:$4 sm:$0xff]  }
 0x590   :  { %6849 = vmatpush1.bf16.msra.mxu0 %v9292_v20  ;;  %6809 = vmatprep.subr.bf16.mxu1 %v9297_v23  ;;  %v9339_v20 = vld [vmem:[#allocation12 + $0x978] ss:$28 sps:$4 sm:$0xff]   ;;  %v9343_v23 = vld [vmem:[#allocation12 + $0xc0] ss:$28 sps:$4 sm:$0xff]  }
 0x591   :  { %6850 = vmatprep.subr.bf16.mxu0 %v9300_v25  ;;  %v9346_v25 = vld [vmem:[#allocation12 + $0x944] ss:$28 sps:$4 sm:$0xff]  }
 0x593   :  { %6810 = vmatpush1.bf16.msra.mxu1 %v9295_v30  ;;  %v9347_v30 = vld [vmem:[#allocation12 + $0x248] ss:$28 sps:$4 sm:$0xff]  }
 0x594   :  { %6851 = vmatpush1.bf16.msra.mxu0 %v9298_v0  ;;  %6811 = vmatprep.subr.bf16.mxu1 %v9303_v31  ;;  %v9344_v0 = vld [vmem:[#allocation12 + $0x940] ss:$28 sps:$4 sm:$0xff]   ;;  %v9348_v31 = vld [vmem:[#allocation12 + $0x88] ss:$28 sps:$4 sm:$0xff]  }
 0x595   :  { %6852 = vmatprep.subr.bf16.mxu0 %v9306_v35  ;;  %v9351_v35 = vld [vmem:[#allocation12 + $0x90c] ss:$28 sps:$4 sm:$0xff]  }
 0x597   :  { %6812 = vmatpush1.bf16.msra.mxu1 %v9301_v34  ;;  %v9352_v34 = vld [vmem:[#allocation12 + $0x210] ss:$28 sps:$4 sm:$0xff]  }
 0x598   :  { %6853 = vmatpush1.bf16.msra.mxu0 %v9304_v16  ;;  %6813 = vmatprep.subr.bf16.mxu1 %v9309_v39 }
 0x599   :  { %6854 = vmatprep.subr.bf16.mxu0 %v9312_v47  ;;  %v9349_v47 = vld [vmem:[#allocation12 + $0x908] ss:$28 sps:$4 sm:$0xff]  }
 0x59b   :  { %6814 = vmatpush1.bf16.msra.mxu1 %v9307_v54 }
 0x59c   :  { %6855 = vmatpush1.bf16.msra.mxu0 %v9310_v26  ;;  %6815 = vmatprep.subr.bf16.mxu1 %v9315_v1  ;;  %v9353_v26 = vld [vmem:[#allocation12 + $0x50] ss:$28 sps:$4 sm:$0xff]  }
 0x59d   :  { %6856 = vmatprep.subr.bf16.mxu0 %v9318_v5  ;;  %v9356_v1 = vld [vmem:[#allocation12 + $0x8d4] ss:$28 sps:$4 sm:$0xff]  }
 0x59e   :  { %v9357_v5 = vld [vmem:[#allocation12 + $0x1d8] ss:$28 sps:$4 sm:$0xff]  }
 0x59f   :  { %6816 = vmatpush1.bf16.msra.mxu1 %v9313_v44  ;;  %v9358_v44 = vld [vmem:[#allocation12 + $0x18] ss:$28 sps:$4 sm:$0xff]  }
 0x5a0   :  { %6857 = vmatpush1.bf16.msra.mxu0 %v9316_v60  ;;  %6817 = vmatprep.subr.bf16.mxu1 %v9321_v46  ;;  %v9359_v60 = vld [vmem:[#allocation12 + $0x6e0] ss:$28 sps:$4 sm:$0xff]  }
 0x5a1   :  { %8101 = vmatprep.subr.bf16.mxu0 %v9322_v9  ;;  %v9360_v46 = vld [vmem:[#allocation12 + $0xa60] ss:$28 sps:$4 sm:$0xff]  }
 0x5a2   :  { %v6507_v53 = vpop.f32.mrf.mxu1  ;;  %v9362_v9 = vld [vmem:[#allocation12 + $0x8a0] ss:$28 sps:$4 sm:$0xff]  }
 0x5a3   :  { %v6508_v61 = vadd.f32 %v6507_v53, %v6467_v50  ;;  %6875 = vmatmul.mubr.bf16.vlgmr.msra.gmra.mxu0 %v9958_v33  ;;  %6818 = vmatpush2.bf16.msra.mxu1 %v9319_v18  ;;  %v9365_v50 = vld [vmem:[#allocation12 + $0x4e8] ss:$28 sps:$4 sm:$0xff]   ;;  %v9367_v53 = vld [vmem:[#allocation12 + $0x670] ss:$28 sps:$4 sm:$0xff]  }
 0x5a4   :  { %8102 = vmatpush3.bf16.msra.mxu0 %v9323_v22  ;;  %6915 = vmatprep.mubr.bf16.mxu0 %v9936_v51  ;;  %v6509_v45 = vpop.f32.mrf.mxu1  ;;  %v9336_v51 = vld [vmem:[#allocation12 + $0x9b4] ss:$28 sps:$4 sm:$0xff]   ;;  %v9364_v22 = vld [vmem:[#allocation12 + $0xa28] ss:$28 sps:$4 sm:$0xff]  }
 0x5a5   :  { %v6549_v3 = vadd.f32 %v9983_v2, %v6508_v61  ;;  %v6510_v15 = vadd.f32 %v6509_v45, %v6469_v58  ;;  %6819 = vmatprep.subr.bf16.mxu1 %v9326_v37  ;;  %8103 = vmatprep.subr.bf16.mxu0 %v9327_v32  ;;  %v9334_v2 = vld [vmem:[#allocation12 + $0x9b0] ss:$28 sps:$4 sm:$0xff]   ;;  %v9366_v32 = vld [vmem:[#allocation12 + $0x868] ss:$28 sps:$4 sm:$0xff]  }
 0x5a6   :  { %v6511_v10 = vpop.f32.mrf.mxu1  ;;  %v9368_v58 = vld [vmem:[#allocation12 + $0x9f0] ss:$28 sps:$4 sm:$0xff]  }
 0x5a7   :  { %v7897_v8 = vmul.f32 -1.442695, %v6549_v3  ;;  %v6551_v21 = vadd.f32 %v9988_v6, %v6510_v15  ;;  %6820 = vmatpush2.bf16.msra.mxu1 %v9324_v12  ;;  %v9342_v6 = vld [vmem:[#allocation12 + $0x280] ss:$28 sps:$4 sm:$0xff]   ;;  %v9373_v3 = vld [vmem:[#allocation12 + $0x478] ss:$28 sps:$4 sm:$0xff]  }
 0x5a8   :  { %8104 = vmatpush3.bf16.msra.mxu0 %v9328_v63  ;;  %v6512_v11 = vpop.f32.mrf.mxu1  ;;  %6821 = vmatprep.subr.bf16.mxu1 %v9331_v4  ;;  %v9370_v63 = vld [vmem:[#allocation12 + $0x830] ss:$28 sps:$4 sm:$0xff]   ;;  %v9371_v4 = vld [vmem:[#allocation12 + $0x638] ss:$28 sps:$4 sm:$0xff]   ;;  %v9376_v10 = vld [vmem:[#allocation12 + $0x980] ss:$28 sps:$4 sm:$0xff]  }
 0x5a9   :  { %9401 = vpow2.f32 %v7897_v8  ;;  %v7898_v17 = vmul.f32 -1.442695, %v6551_v21  ;;  %8105 = vmatprep.subr.bf16.mxu0 %v9332_v7  ;;  %v9374_v15 = vld [vmem:[#allocation12 + $0x7f8] ss:$28 sps:$4 sm:$0xff]   ;;  %v9375_v7 = vld [vmem:[#allocation12 + $0x600] ss:$28 sps:$4 sm:$0xff]  }
 0x5aa   :  { %v9377_v8 = vld [vmem:[#allocation12 + $0x440] ss:$28 sps:$4 sm:$0xff]   ;;  %v9380_v11 = vld [vmem:[#allocation12 + $0x948] ss:$28 sps:$4 sm:$0xff]  }
 0x5ab   :  { %9403 = vpow2.f32 %v7898_v17  ;;  %6822 = vmatpush2.bf16.msra.mxu1 %v9329_v40  ;;  %v9378_v21 = vld [vmem:[#allocation12 + $0x7c0] ss:$28 sps:$4 sm:$0xff]   ;;  %v9379_v40 = vld [vmem:[#allocation12 + $0x5c8] ss:$28 sps:$4 sm:$0xff]   ;;  %v9383_v17 = vld [vmem:[#allocation12 + $0x590] ss:$28 sps:$4 sm:$0xff]  }
 0x5ac   :  { %8106 = vmatpush3.bf16.msra.mxu0 %v9333_v13  ;;  %6823 = vmatprep.subr.bf16.mxu1 %v9336_v51  ;;  %v9381_v13 = vld [vmem:[#allocation12 + $0x408] ss:$28 sps:$4 sm:$0xff]  }
 0x5ad   :  { %8107 = vmatprep.subr.bf16.mxu0 %v9337_v52  ;;  %v9382_v51 = vld [vmem:[#allocation12 + $0x788] ss:$28 sps:$4 sm:$0xff]   ;;  %v9384_v52 = vld [vmem:[#allocation12 + $0x910] ss:$28 sps:$4 sm:$0xff]  }
 0x5af   :  { %6824 = vmatpush2.bf16.msra.mxu1 %v9334_v2  ;;  %v9385_v2 = vld [vmem:[#allocation12 + $0x3d0] ss:$28 sps:$4 sm:$0xff]  }
 0x5b0   :  { %8108 = vmatpush3.bf16.msra.mxu0 %v9338_v19  ;;  %6825 = vmatprep.subr.bf16.mxu1 %v9341_v36  ;;  %v9386_v19 = vld [vmem:[#allocation12 + $0x750] ss:$28 sps:$4 sm:$0xff]   ;;  %v9387_v36 = vld [vmem:[#allocation12 + $0x558] ss:$28 sps:$4 sm:$0xff]  }
 0x5b1   :  { %8109 = vmatprep.subr.bf16.mxu0 %v9342_v6  ;;  %v9388_v6 = vld [vmem:[#allocation12 + $0x8d8] ss:$28 sps:$4 sm:$0xff]  }
 0x5b3   :  { %6826 = vmatpush2.bf16.msra.mxu1 %v9339_v20  ;;  %v9389_v20 = vld [vmem:[#allocation12 + $0x398] ss:$28 sps:$4 sm:$0xff]  }
 0x5b4   :  { %8110 = vmatpush3.bf16.msra.mxu0 %v9343_v23  ;;  %6827 = vmatprep.subr.bf16.mxu1 %v9346_v25  ;;  %v9390_v23 = vld [vmem:[#allocation12 + $0x718] ss:$28 sps:$4 sm:$0xff]   ;;  %v9391_v25 = vld [vmem:[#allocation12 + $0xc20] ss:$28 sps:$4 sm:$0xff]  }
 0x5b5   :  { %8111 = vmatprep.subr.bf16.mxu0 %v9347_v30 }
 0x5b6   :  { %v9402_v16 = vpop.eup %9401 }
 0x5b7   :  { %v7064_v39 = vadd.f32 1.0, %v9402_v16  ;;  %6828 = vmatpush2.bf16.msra.mxu1 %v9344_v0  ;;  %v9392_v0 = vld [vmem:[#allocation12 + $0xbe8] ss:$28 sps:$4 sm:$0xff]  }
 0x5b8   :  { %v9404_v54 = vpop.eup %9403  ;;  %8112 = vmatpush3.bf16.msra.mxu0 %v9348_v31  ;;  %6829 = vmatprep.subr.bf16.mxu1 %v9351_v35 }
 0x5b9   :  { %9405 = vrcp.f32 %v7064_v39  ;;  %v7065_v42 = vadd.f32 1.0, %v9404_v54  ;;  %8113 = vmatprep.subr.bf16.mxu0 %v9352_v34  ;;  %v9393_v34 = vld [vmem:[#allocation12 + $0xbb0] ss:$28 sps:$4 sm:$0xff]   ;;  %v9394_v39 = vld [vmem:[#allocation12 + $0xb78] ss:$28 sps:$4 sm:$0xff]   ;;  %v4351_v54 = vrot.slane %v9991_v48, %v9828_v24 }
 0x5bb   :  { %9407 = vrcp.f32 %v7065_v42  ;;  %6830 = vmatpush2.bf16.msra.mxu1 %v9349_v47  ;;  %v9397_v47 = vld [vmem:[#allocation12 + $0xad0] ss:$28 sps:$4 sm:$0xff]  }
 0x5bc   :  { %8114 = vmatpush3.bf16.msra.mxu0 %v9353_v26  ;;  %6831 = vmatprep.subr.bf16.mxu1 %v9356_v1  ;;  %v9398_v26 = vld [vmem:[#allocation12 + $0xa98] ss:$28 sps:$4 sm:$0xff]   ;;  %v4355_v1 = vrot.slane %v9991_v48, %v9820_v14 }
 0x5bd   :  { %8115 = vmatprep.subr.bf16.mxu0 %v9357_v5 }
 0x5bf   :  { %6832 = vmatpush2.bf16.msra.mxu1 %v9354_v41 }
 0x5c0   :  { %8116 = vmatpush3.bf16.msra.mxu0 %v9358_v44  ;;  %8123 = vmatprep.subr.bf16.mxu1 %v9359_v60 }
 0x5c1   :  { %8145 = vmatprep.subr.bf16.mxu0 %v9360_v46 }
 0x5c2   :  { %v10005_v18 = vpop.f32.mrf.mxu0  ;;  %6834 = vmatmul.mubr.bf16.vlgmr.msra.gmra.mxu1 %v9963_v59 }
 0x5c3   :  { %6916 = vmatmul.mubr.bf16.vlgmr.msra.gmra.mxu0 %v9940_v55  ;;  %8124 = vmatpush3.bf16.msra.mxu1 %v9361_v49  ;;  %v9369_v55 = vld [vmem:[#allocation12 + $0x4b0] ss:$28 sps:$4 sm:$0xff]   ;;  %v6590_v42 = vadd.f32 %v10005_v18, %v4351_v54 }
 0x5c4   :  { %6955 = vmatprep.mubr.bf16.mxu1 %v9938_v43  ;;  %8146 = vmatpush3.bf16.msra.mxu0 %v9362_v9  ;;  %v10010_v37 = vpop.f32.mrf.mxu0 }
 0x5c5   :  { %6995 = vmatprep.mubr.bf16.mxu0 %v9948_v62  ;;  %8125 = vmatprep.subr.bf16.mxu1 %v9363_v29  ;;  %v9372_v62 = vld [vmem:[#allocation12 + $0x9b8] ss:$28 sps:$4 sm:$0xff]   ;;  %v6592_v5 = vadd.f32 %v10010_v37, %v4355_v1 }
 0x5c6   :  { %v9406_v61 = vpop.eup %9405  ;;  %v6593_v12 = vpop.f32.mrf.mxu0  ;;  %8147 = vmatprep.subr.bf16.mxu0 %v9364_v22 }
 0x5c7   :  { %7085 = vst [vmem:[%s10069_s10] sm:$0xff] %v9406_v61  ;;  %8126 = vmatpush3.bf16.msra.mxu1 %v9365_v50 }
 0x5c8   :  { %v9408_v45 = vpop.eup %9407  ;;  %8148 = vmatpush3.bf16.msra.mxu0 %v9366_v32  ;;  %v6594_v43 = vpop.f32.mrf.mxu0  ;;  %8127 = vmatprep.subr.bf16.mxu1 %v9367_v53 }
 0x5c9   :  { %7086 = vst [vmem:[%s10069_s10 + $0x8] sm:$0xff] %v9408_v45  ;;  %8149 = vmatprep.subr.bf16.mxu0 %v9368_v58 }
 0x5cb   :  { %8128 = vmatpush3.bf16.msra.mxu1 %v9369_v55 }
 0x5cc   :  { %8150 = vmatpush3.bf16.msra.mxu0 %v9370_v63  ;;  %8129 = vmatprep.subr.bf16.mxu1 %v9371_v4 }
 0x5cd   :  { %8151 = vmatprep.subr.bf16.mxu0 %v9372_v62 }
 0x5cf   :  { %8130 = vmatpush3.bf16.msra.mxu1 %v9373_v3 }
 0x5d0   :  { %8152 = vmatpush3.bf16.msra.mxu0 %v9374_v15  ;;  %8131 = vmatprep.subr.bf16.mxu1 %v9375_v7 }
 0x5d1   :  { %8153 = vmatprep.subr.bf16.mxu0 %v9376_v10 }
 0x5d3   :  { %8132 = vmatpush3.bf16.msra.mxu1 %v9377_v8 }
 0x5d4   :  { %8154 = vmatpush3.bf16.msra.mxu0 %v9378_v21  ;;  %8133 = vmatprep.subr.bf16.mxu1 %v9379_v40 }
 0x5d5   :  { %8155 = vmatprep.subr.bf16.mxu0 %v9380_v11 }
 0x5d7   :  { %8134 = vmatpush3.bf16.msra.mxu1 %v9381_v13  ;;  %v4359_v13 = vrot.slane %v9991_v48, %v9868_v27 }
 0x5d8   :  { %8156 = vmatpush3.bf16.msra.mxu0 %v9382_v51  ;;  %8135 = vmatprep.subr.bf16.mxu1 %v9383_v17  ;;  %v4363_v51 = vrot.slane %v9991_v48, %v9871_v28 }
 0x5d9   :  { %8157 = vmatprep.subr.bf16.mxu0 %v9384_v52 }
 0x5db   :  { %8136 = vmatpush3.bf16.msra.mxu1 %v9385_v2 }
 0x5dc   :  { %8158 = vmatpush3.bf16.msra.mxu0 %v9386_v19  ;;  %8137 = vmatprep.subr.bf16.mxu1 %v9387_v36 }
 0x5dd   :  { %8159 = vmatprep.subr.bf16.mxu0 %v9388_v6 }
 0x5df   :  { %8138 = vmatpush3.bf16.msra.mxu1 %v9389_v20 }
 0x5e0   :  { %8160 = vmatpush3.bf16.msra.mxu0 %v9390_v23  ;;  %8231 = vmatprep.subr.bf16.mxu1 %v9615_v38 }
 0x5e2   :  { %v6630_v30 = vpop.f32.mrf.mxu1  ;;  %6956 = vmatmul.mubr.bf16.vlgmr.msra.gmra.mxu1 %v9942_v56  ;;  %v9395_v56 = vld [vmem:[#allocation12 + $0xb40] ss:$28 sps:$4 sm:$0xff]  }
 0x5e3   :  { %6996 = vmatmul.mubr.bf16.vlgmr.msra.gmra.mxu0 %v9963_v59  ;;  %8232 = vmatpush3.bf16.msra.mxu1 %v9391_v25  ;;  %v9396_v59 = vld [vmem:[#allocation12 + $0xb08] ss:$28 sps:$4 sm:$0xff]   ;;  %v6631_v41 = vadd.f32 %v6630_v30, %v6590_v42 }
 0x5e4   :  { %v6632_v31 = vpop.f32.mrf.mxu1  ;;  %8233 = vmatprep.subr.bf16.mxu1 %v9615_v38  ;;  %8247 = vmatprep.mubr.msk.bf16.mxu1 %vm9616_vm0, %v9615_v38 }
 0x5e5   :  { %v6633_v46 = vadd.f32 %v6632_v31, %v6592_v5 }
 0x5e6   :  { %v6634_v35 = vpop.f32.mrf.mxu1 }
 0x5e7   :  { %8234 = vmatpush3.bf16.msra.mxu1 %v9392_v0 }
 0x5e8   :  { %v6635_v16 = vpop.f32.mrf.mxu1  ;;  %8235 = vmatprep.subr.bf16.mxu1 %v9615_v38 }
 0x5eb   :  { %8236 = vmatpush3.bf16.msra.mxu1 %v9393_v34 }
 0x5ec   :  { %8237 = vmatprep.subr.bf16.mxu1 %v9615_v38 }
 0x5ef   :  { %8238 = vmatpush3.bf16.msra.mxu1 %v9394_v39 }
 0x5f0   :  { %8239 = vmatprep.subr.bf16.mxu1 %v9615_v38 }
 0x5f3   :  { %8240 = vmatpush3.bf16.msra.mxu1 %v9395_v56 }
 0x5f4   :  { %8241 = vmatprep.subr.bf16.mxu1 %v9615_v38 }
 0x5f7   :  { %8242 = vmatpush3.bf16.msra.mxu1 %v9396_v59 }
 0x5f8   :  { %8243 = vmatprep.subr.bf16.mxu1 %v9615_v38 }
 0x5fb   :  { %8244 = vmatpush3.bf16.msra.mxu1 %v9397_v47 }
 0x5fc   :  { %8245 = vmatprep.subr.bf16.mxu1 %v9615_v38 }
 0x5ff   :  { %8246 = vmatpush3.bf16.msra.mxu1 %v9398_v26 }
 0x602   :  { %v6671_v44 = vpop.f32.mrf.mxu0  ;;  %v6712_v60 = vpop.f32.mrf.mxu1  ;;  %8248 = vmatmul.mubr.bf16.vlgmr.msra.gmra.mxu1 %v9958_v33 }
 0x603   :  { %v6672_v49 = vadd.f32 %v6671_v44, %v6631_v41 }
 0x604   :  { %v6673_v24 = vpop.f32.mrf.mxu0  ;;  %v6714_v9 = vpop.f32.mrf.mxu1 }
 0x605   :  { %v6713_v29 = vadd.f32 %v6712_v60, %v6672_v49  ;;  %v6674_v22 = vadd.f32 %v6673_v24, %v6633_v46 }
 0x606   :  { %v6675_v38 = vpop.f32.mrf.mxu0  ;;  %v6716_v50 = vpop.f32.mrf.mxu1 }
 0x607   :  { %v7899_v32 = vmul.f32 -1.442695, %v6713_v29  ;;  %v6715_v14 = vadd.f32 %v6714_v9, %v6674_v22  ;;  %v4367_v9 = vrot.slane %v9991_v48, %v9878_v57 }
 0x608   :  { %v6676_v53 = vpop.f32.mrf.mxu0  ;;  %v6717_v18 = vpop.f32.mrf.mxu1 }
 0x609   :  { %9409 = vpow2.f32 %v7899_v32  ;;  %v7900_v58 = vmul.f32 -1.442695, %v6715_v14 }
 0x60b   :  { %9411 = vpow2.f32 %v7900_v58 }
 0x616   :  { %v9410_v37 = vpop.eup %9409 }
 0x617   :  { %v7066_v61 = vadd.f32 1.0, %v9410_v37 }
 0x618   :  { %v9412_v12 = vpop.eup %9411 }
 0x619   :  { %9413 = vrcp.f32 %v7066_v61  ;;  %v7067_v33 = vadd.f32 1.0, %v9412_v12 }
 0x61b   :  { %9415 = vrcp.f32 %v7067_v33 }
 0x626   :  { %v9414_v55 = vpop.eup %9413 }
 0x627   :  { %7087 = vst [vmem:[%s10069_s10 + $0x10] sm:$0xff] %v9414_v55 }
 0x628   :  { %v9416_v45 = vpop.eup %9415 }
 0x629   :  { %7088 = vst [vmem:[%s10069_s10 + $0x18] sm:$0xff] %v9416_v45 }
 0x642   :  { %v6753_v43 = vpop.f32.mrf.mxu1 }
 0x643   :  { %v6794_v63 = vpop.f32.mrf.mxu0  ;;  %v6754_v17 = vadd.f32 %v6753_v43, %v4359_v13 }
 0x644   :  { %v6755_v4 = vpop.f32.mrf.mxu1 }
 0x645   :  { %v6796_v62 = vpop.f32.mrf.mxu0  ;;  %v6756_v52 = vadd.f32 %v6755_v4, %v4363_v51  ;;  %v6795_v2 = vadd.f32 %v6794_v63, %v6754_v17 }
 0x646   :  { %v6757_v3 = vpop.f32.mrf.mxu1 }
 0x647   :  { %v6798_v15 = vpop.f32.mrf.mxu0  ;;  %v6797_v36 = vadd.f32 %v6796_v62, %v6756_v52 }
 0x648   :  { %v6758_v7 = vpop.f32.mrf.mxu1 }
 0x649   :  { %v6799_v10 = vpop.f32.mrf.mxu0 }
 0x663   :  { %v6876_v8 = vpop.f32.mrf.mxu0 }
 0x665   :  { %v6878_v21 = vpop.f32.mrf.mxu0 }
 0x667   :  { %v6880_v40 = vpop.f32.mrf.mxu0 }
 0x669   :  { %v6881_v11 = vpop.f32.mrf.mxu0 }
 0x682   :  { %v6835_v19 = vpop.f32.mrf.mxu1 }
 0x683   :  { %v6836_v6 = vadd.f32 %v6835_v19, %v6795_v2  ;;  %v8117_v20 = vpop.f32.mrf.mxu0 }
 0x684   :  { %v6837_v23 = vpop.f32.mrf.mxu1 }
 0x685   :  { %v6877_v25 = vadd.f32 %v6876_v8, %v6836_v6  ;;  %v6838_v30 = vadd.f32 %v6837_v23, %v6797_v36  ;;  %v8118_v0 = vpop.f32.mrf.mxu0 }
 0x686   :  { %v6839_v31 = vpop.f32.mrf.mxu1  ;;  %v8119_v29 = vadd.f32 %v8118_v0, %v8117_v20 }
 0x687   :  { %v7901_v35 = vmul.f32 -1.442695, %v6877_v25  ;;  %v6879_v34 = vadd.f32 %v6878_v21, %v6838_v30  ;;  %v8120_v16 = vpop.f32.mrf.mxu0 }
 0x688   :  { %v6840_v39 = vpop.f32.mrf.mxu1  ;;  %v6918_v38 = vadd.f32 %v8119_v29, %v4367_v9 }
 0x689   :  { %9417 = vpow2.f32 %v7901_v35  ;;  %v7902_v27 = vmul.f32 -1.442695, %v6879_v34  ;;  %v8121_v56 = vpop.f32.mrf.mxu0 }
 0x68b   :  { %9419 = vpow2.f32 %v7902_v27 }
 0x696   :  { %v9418_v28 = vpop.eup %9417 }
 0x697   :  { %v7068_v59 = vadd.f32 1.0, %v9418_v28 }
 0x698   :  { %v9420_v47 = vpop.eup %9419 }
 0x699   :  { %9421 = vrcp.f32 %v7068_v59  ;;  %v7069_v54 = vadd.f32 1.0, %v9420_v47 }
 0x69b   :  { %9423 = vrcp.f32 %v7069_v54 }
 0x6a2   :  { %v8139_v26 = vpop.f32.mrf.mxu1 }
 0x6a3   :  { %v8161_v1 = vpop.f32.mrf.mxu0 }
 0x6a4   :  { %v8140_v42 = vpop.f32.mrf.mxu1 }
 0x6a5   :  { %v8162_v5 = vpop.f32.mrf.mxu0  ;;  %v8141_v22 = vadd.f32 %v8140_v42, %v8139_v26 }
 0x6a6   :  { %v9422_v41 = vpop.eup %9421  ;;  %v8142_v44 = vpop.f32.mrf.mxu1  ;;  %v8163_v32 = vadd.f32 %v8162_v5, %v8161_v1 }
 0x6a7   :  { %7089 = vst [vmem:[%s10069_s10 + $0x20] sm:$0xff] %v9422_v41  ;;  %v8164_v60 = vpop.f32.mrf.mxu0  ;;  %v6958_v50 = vadd.f32 %v8141_v22, %v6918_v38 }
 0x6a8   :  { %v9424_v46 = vpop.eup %9423  ;;  %v8143_v49 = vpop.f32.mrf.mxu1 }
 0x6a9   :  { %7090 = vst [vmem:[%s10069_s10 + $0x28] sm:$0xff] %v9424_v46  ;;  %v8165_v24 = vpop.f32.mrf.mxu0  ;;  %v6998_v14 = vadd.f32 %v8163_v32, %v6958_v50 }
 0x6c2   :  { %v7037_v53 = vpop.f32.mrf.mxu1 }
 0x6c3   :  { %v7038_v18 = vadd.f32 %v7037_v53, %v6998_v14 }
 0x6c4   :  { %v8249_v58 = vpop.f32.mrf.mxu1 }
 0x6c5   :  { %v7903_v37 = vmul.f32 -1.442695, %v7038_v18 }
 0x6c6   :  { %v7040_v61 = vpop.f32.mrf.mxu1 }
 0x6c7   :  { %9425 = vpow2.f32 %v7903_v37 }
 0x6c8   :  { %v8250_v12 = vpop.f32.mrf.mxu1 }
 0x6d4   :  { %v9426_v33 = vpop.eup %9425 }
 0x6d5   :  { %v7070_v55 = vadd.f32 1.0, %v9426_v33 }
 0x6d7   :  { %9427 = vrcp.f32 %v7070_v55 }
 0x6e4   :  { %v9428_v45 = vpop.eup %9427 }
 0x6e5   :  { %7091 = vst [vmem:[%s10069_s10 + $0x30] sm:$0xff] %v9428_v45 }
 0x6e6   :  { %7100 = vsyncpa [#allocation3], 1 }
 0x6e7   :  { %7101 = vsyncpa [#allocation5], 1 }
 0x6e8   :  { %7102 = vsyncpa [#allocation8], 1 }
 0x6e9   :  { %7103 = vsyncpa [#allocation11], 1 }
 0x6ea   :  { %7104 = vsyncpa [#allocation14], 1 }

</bundles_post_ra>
